<compile_context>
chip_gen: v7x
topology: tpu7x:2x2x1
jax: 0.10.0
libtpu: 0.0.40
codegen_flags: <defaults>
</compile_context>

<pallas_src>
import jax
import jax.numpy as jnp
from jax.experimental import pallas as pl
from jax.experimental.pallas import tpu as pltpu

# Small synthetic config (module used hidden_size=1024; scaled down per task).
HIDDEN = 32
NHEADS = 4
DHEAD = HIDDEN // NHEADS
FFN = 64
NLAYERS = 2
NLABELS = 2
VOCAB = 100
MAXPOS = 64
LN_EPS = 1e-5

# Lane-dense padded sizes (TPU vreg lane width = 128).
HPAD = 128                    # padded hidden
FPAD = 128                    # padded FFN
LPAD = 128                    # padded label dim
NHEAD_SLOTS = HPAD // DHEAD   # head slots in padded layout (only NHEADS real)

# fp32 additive mask value.
# TODO(synk): make dtype-aware (e.g. finfo.min/2) if activations move to bf16.
NEG_MASK = -1e9

# Order in which weights are passed to the fused kernel.
W_ORDER = ("emb_g", "emb_b",
           "wqkvT", "bqkvT", "wo_h", "bo",
           "g1", "be1", "w1", "b1", "w2", "b2", "g2", "be2",
           "wp", "bp", "wfc", "bfc")


def _gelu(x):
    # tanh-approximation GELU (EUP-friendly on TPU).
    # TODO(synk): HF RoBERTa uses the exact erf GELU; tanh approx drifts ~1e-3.
    c = 0.7978845608028654  # sqrt(2/pi)
    return 0.5 * x * (1.0 + jnp.tanh(c * (x + 0.044715 * x * x * x)))


# --------------------------- fused forward kernel -------------------------- #
def fused_forward_kernel(x_ref, neg_ref,
                         emb_g, emb_b,
                         wqkvT, bqkvT, wo_h, bo,
                         g1, be1, w1, b1, w2, b2, g2, be2,
                         wp, bp, wfc, bfc,
                         out_ref):
    """One grid step = one batch row: emb-LN -> NLAYERS encoder layers ->
    tanh pooler on token 0 -> FC, all on VMEM-resident padded weights."""
    f32 = jnp.float32
    x = x_ref[0].astype(f32)              # (S, HPAD); lanes >= HIDDEN are zero
    neg = neg_ref[0].astype(f32)          # (1, S) additive key mask (hoisted)
    s_len = x.shape[0]

    # Column mask of the real hidden lanes, computed once and reused by all
    # LayerNorms (padded lanes stay exactly zero through the whole network).
    cmask = (jax.lax.broadcasted_iota(jnp.int32, (1, HPAD), 1) < HIDDEN
             ).astype(f32)
    inv_h = 1.0 / HIDDEN

    def layer_norm(v, g, b):
        # Statistics over the real HIDDEN lanes only (padded lanes are zero).
        mu = jnp.sum(v, axis=-1, keepdims=True) * inv_h
        c = (v - mu) * cmask
        var = jnp.sum(c * c, axis=-1, keepdims=True) * inv_h
        return c * jax.lax.rsqrt(var + LN_EPS) * g + b

    x = layer_norm(x, emb_g[...], emb_b[...])

    for li in range(NLAYERS):             # static unroll; weights stay in VMEM
        wqkv_l, bqkv_l = wqkvT[li], bqkvT[li]      # (3*HPAD, HPAD), (3*HPAD, 1)
        wo_l = wo_h[li].reshape(NHEADS, DHEAD, HPAD)
        bo_l = bo[li]
        g1_l, be1_l = g1[li], be1[li]
        w1_l, b1_l = w1[li], b1[li]
        w2_l, b2_l = w2[li], b2[li]
        g2_l, be2_l = g2[li], be2[li]

        # Fused Q/K/V: one stacked matmul in transposed layout (3*HPAD, S),
        # single fused bias; per-head tensors via a leading/sublane-group
        # reshape -- no lane-offset slices of activations, no concatenate.
        # The 1/sqrt(DHEAD) scale is already folded into the Q rows at init.
        xt = x.T                                                     # (HPAD, S)
        qkvt = jnp.dot(wqkv_l, xt, preferred_element_type=f32) + bqkv_l
        qkv3 = qkvt.reshape(3 * NHEAD_SLOTS, DHEAD, s_len)

        # TODO(synk): the 4-head static loop could become batched dot_generals
        # (hds,hdt->hst / hst,hdt->hsd); kept as proven 2-D matmul forms here
        # to guarantee clean Mosaic lowering at these tiny shapes.
        attn = None
        for h in range(NHEADS):                    # static unroll, real heads
            qh = qkv3[h]                           # (DHEAD, S) leading index
            kh = qkv3[NHEAD_SLOTS + h]
            vh = qkv3[2 * NHEAD_SLOTS + h]
            sc = jnp.dot(qh.T, kh, preferred_element_type=f32) + neg
            sc = sc - jnp.max(sc, axis=-1, keepdims=True)
            p = jnp.exp(sc)
            p = p * pl.reciprocal(jnp.sum(p, axis=-1, keepdims=True),
                                  approx=True)     # EUP divide, off the VALU
            ctx_h = jnp.dot(p, vh.T, preferred_element_type=f32)   # (S, DHEAD)
            part = jnp.dot(ctx_h, wo_l[h],
                           preferred_element_type=f32)             # (S, HPAD)
            attn = part if attn is None else attn + part
        attn = attn + bo_l

        h1 = layer_norm(x + attn, g1_l, be1_l)
        ff = jnp.dot(h1, w1_l, preferred_element_type=f32) + b1_l
        ff = _gelu(ff)
        ff = jnp.dot(ff, w2_l, preferred_element_type=f32) + b2_l
        x = layer_norm(h1 + ff, g2_l, be2_l)

    # Pooler (tanh on the first token <s>) + final FC, still in the same kernel.
    x0 = x[0:1, :]                                                   # (1, HPAD)
    pooled = jnp.tanh(jnp.dot(x0, wp[...], preferred_element_type=f32)
                      + bp[...])
    logits = jnp.dot(pooled, wfc[...], preferred_element_type=f32) + bfc[...]
    out_ref[0] = logits.astype(out_ref.dtype)        # (1, LPAD) lane-dense


def run_fused_forward(x_emb, neg_mask, params):
    B, S, _ = x_emb.shape
    w_args = [params[k] for k in W_ORDER]
    # Weight windows have constant block indices -> fetched once, never
    # re-fetched per grid step.
    w_specs = [pl.BlockSpec(w.shape, lambda b, _n=w.ndim: (0,) * _n)
               for w in w_args]
    return pl.pallas_call(
        fused_forward_kernel,
        out_shape=jax.ShapeDtypeStruct((B, 1, LPAD), jnp.float32),
        grid=(B,),
        in_specs=[pl.BlockSpec((1, S, HPAD), lambda b: (b, 0, 0)),
                  pl.BlockSpec((1, 1, S), lambda b: (b, 0, 0))] + w_specs,
        out_specs=pl.BlockSpec((1, 1, LPAD), lambda b: (b, 0, 0)),
        compiler_params=pltpu.CompilerParams(
            # Batch rows are independent: lets v7x spread them over both
            # TensorCores; on v5e/v6e (1 TC) this is just a B-step loop.
            dimension_semantics=("parallel",)),
    )(x_emb, neg_mask, *w_args)


# ------------------------------ parameters -------------------------------- #
def init_params(key):
    ks = jax.random.split(key, 4 + NLAYERS)

    def norm(k, shape, scale=0.02):
        return jax.random.normal(k, shape, jnp.float32) * scale

    def pad2(w, rows, cols):
        out = jnp.zeros((rows, cols), jnp.float32)
        return out.at[:w.shape[0], :w.shape[1]].set(w)

    def ln_gamma():
        return jnp.zeros((1, HPAD), jnp.float32).at[:, :HIDDEN].set(1.0)

    zeros_h = jnp.zeros((1, HPAD), jnp.float32)
    attn_scale = 1.0 / (DHEAD ** 0.5)

    params = {
        "word_emb": pad2(norm(ks[0], (VOCAB, HIDDEN)), VOCAB, HPAD),
        "pos_emb": pad2(norm(ks[1], (MAXPOS, HIDDEN)), MAXPOS, HPAD),
        "emb_g": ln_gamma(),
        "emb_b": zeros_h,
        "wp": pad2(norm(ks[2], (HIDDEN, HIDDEN)), HPAD, HPAD),
        "bp": zeros_h,
        "wfc": pad2(norm(ks[3], (HIDDEN, NLABELS)), HPAD, LPAD),
        "bfc": jnp.zeros((1, LPAD), jnp.float32),
    }

    layer_keys = ("wqkvT", "bqkvT", "wo_h", "bo",
                  "g1", "be1", "w1", "b1", "w2", "b2", "g2", "be2")
    per_layer = {k: [] for k in layer_keys}
    for li in range(NLAYERS):
        lk = jax.random.split(ks[4 + li], 6)        # fixed per-layer RNG index
        wq = pad2(norm(lk[0], (HIDDEN, HIDDEN)), HPAD, HPAD)
        wk = pad2(norm(lk[1], (HIDDEN, HIDDEN)), HPAD, HPAD)
        wv = pad2(norm(lk[2], (HIDDEN, HIDDEN)), HPAD, HPAD)
        # Stacked + transposed QKV weight; attention scale folded into Q rows.
        wqkvT = jnp.concatenate([wq.T * attn_scale, wk.T, wv.T], axis=0)
        per_layer["wqkvT"].append(wqkvT)                      # (3*HPAD, HPAD)
        per_layer["bqkvT"].append(jnp.zeros((3 * HPAD, 1), jnp.float32))
        # Output projection kept row-major (HIDDEN, HPAD); reshaped per-head
        # inside the kernel with a trivial leading-dim split.
        per_layer["wo_h"].append(pad2(norm(lk[3], (HIDDEN, HIDDEN)),
                                      HIDDEN, HPAD))
        per_layer["bo"].append(zeros_h)
        per_layer["g1"].append(ln_gamma())
        per_layer["be1"].append(zeros_h)
        per_layer["w1"].append(pad2(norm(lk[4], (HIDDEN, FFN)), HPAD, FPAD))
        per_layer["b1"].append(jnp.zeros((1, FPAD), jnp.float32))
        per_layer["w2"].append(pad2(norm(lk[5], (FFN, HIDDEN)), FPAD, HPAD))
        per_layer["b2"].append(zeros_h)
        per_layer["g2"].append(ln_gamma())
        per_layer["be2"].append(zeros_h)
    for k, v in per_layer.items():
        params[k] = jnp.stack(v, axis=0)
    return params


# ------------------------------- forward ----------------------------------- #
def roberta_detector_forward(params, bert_ids, bert_mask):
    B, S = bert_ids.shape
    # TODO(synk): token-id embedding gather kept in plain JAX (jnp.take); a
    # true in-kernel lookup would need a manual DMA-gather pattern.
    pos = jnp.arange(S)
    x = (jnp.take(params["word_emb"], bert_ids, axis=0)
         + params["pos_emb"][pos][None]).astype(jnp.float32)
    # Additive attention mask, hoisted out of the kernel (computed once).
    neg = (1.0 - bert_mask.astype(jnp.float32)).reshape(B, 1, S) * NEG_MASK
    logits_pad = run_fused_forward(x, neg, params)      # (B, 1, LPAD)
    return logits_pad[:, 0, :NLABELS]                   # (B, 2)


if __name__ == "__main__":
    key = jax.random.PRNGKey(0)
    pkey, ikey = jax.random.split(key)
    params = init_params(pkey)

    B, S = 2, 8
    bert_ids = jax.random.randint(ikey, (B, S), 0, VOCAB, dtype=jnp.int32)
    bert_mask = jnp.array([[1, 1, 1, 1, 1, 1, 1, 1],
                           [1, 1, 1, 1, 1, 1, 0, 0]], dtype=jnp.int32)

    logits = roberta_detector_forward(params, bert_ids, bert_mask)
    logits = jax.block_until_ready(logits)
    assert logits.shape == (B, NLABELS), logits.shape
    print("KERNEL_OK")
</pallas_src>

<mosaic_0001>
module attributes {stable_mosaic.version = 11 : i64} {
  func.func @fused_forward_kernel(%arg0: i32, %arg1: memref<1x8x128xf32, #tpu.memory_space<vmem>>, %arg2: memref<1x1x8xf32, #tpu.memory_space<vmem>>, %arg3: memref<1x128xf32, #tpu.memory_space<vmem>>, %arg4: memref<1x128xf32, #tpu.memory_space<vmem>>, %arg5: memref<2x384x128xf32, #tpu.memory_space<vmem>>, %arg6: memref<2x384x1xf32, #tpu.memory_space<vmem>>, %arg7: memref<2x32x128xf32, #tpu.memory_space<vmem>>, %arg8: memref<2x1x128xf32, #tpu.memory_space<vmem>>, %arg9: memref<2x1x128xf32, #tpu.memory_space<vmem>>, %arg10: memref<2x1x128xf32, #tpu.memory_space<vmem>>, %arg11: memref<2x128x128xf32, #tpu.memory_space<vmem>>, %arg12: memref<2x1x128xf32, #tpu.memory_space<vmem>>, %arg13: memref<2x128x128xf32, #tpu.memory_space<vmem>>, %arg14: memref<2x1x128xf32, #tpu.memory_space<vmem>>, %arg15: memref<2x1x128xf32, #tpu.memory_space<vmem>>, %arg16: memref<2x1x128xf32, #tpu.memory_space<vmem>>, %arg17: memref<128x128xf32, #tpu.memory_space<vmem>>, %arg18: memref<1x128xf32, #tpu.memory_space<vmem>>, %arg19: memref<128x128xf32, #tpu.memory_space<vmem>>, %arg20: memref<1x128xf32, #tpu.memory_space<vmem>>, %arg21: memref<1x1x128xf32, #tpu.memory_space<vmem>>) attributes {dimension_semantics = [#tpu.dimension_semantics<parallel>], iteration_bounds = array<i64: 2>, scalar_prefetch = 0 : i64, scratch_operands = 0 : i64, tpu.core_type = #tpu.core_type<tc>, window_params = [{transform_indices = @transform_0, window_bounds = array<i64: 1, 8, 128>}, {transform_indices = @transform_1, window_bounds = array<i64: 1, 1, 8>}, {pipeline_mode = #tpu.pipeline_mode<synchronous>, transform_indices = @transform_2, window_bounds = array<i64: 1, 128>}, {pipeline_mode = #tpu.pipeline_mode<synchronous>, transform_indices = @transform_3, window_bounds = array<i64: 1, 128>}, {pipeline_mode = #tpu.pipeline_mode<synchronous>, transform_indices = @transform_4, window_bounds = array<i64: 2, 384, 128>}, {pipeline_mode = #tpu.pipeline_mode<synchronous>, transform_indices = @transform_5, window_bounds = array<i64: 2, 384, 1>}, {pipeline_mode = #tpu.pipeline_mode<synchronous>, transform_indices = @transform_6, window_bounds = array<i64: 2, 32, 128>}, {pipeline_mode = #tpu.pipeline_mode<synchronous>, transform_indices = @transform_7, window_bounds = array<i64: 2, 1, 128>}, {pipeline_mode = #tpu.pipeline_mode<synchronous>, transform_indices = @transform_8, window_bounds = array<i64: 2, 1, 128>}, {pipeline_mode = #tpu.pipeline_mode<synchronous>, transform_indices = @transform_9, window_bounds = array<i64: 2, 1, 128>}, {pipeline_mode = #tpu.pipeline_mode<synchronous>, transform_indices = @transform_10, window_bounds = array<i64: 2, 128, 128>}, {pipeline_mode = #tpu.pipeline_mode<synchronous>, transform_indices = @transform_11, window_bounds = array<i64: 2, 1, 128>}, {pipeline_mode = #tpu.pipeline_mode<synchronous>, transform_indices = @transform_12, window_bounds = array<i64: 2, 128, 128>}, {pipeline_mode = #tpu.pipeline_mode<synchronous>, transform_indices = @transform_13, window_bounds = array<i64: 2, 1, 128>}, {pipeline_mode = #tpu.pipeline_mode<synchronous>, transform_indices = @transform_14, window_bounds = array<i64: 2, 1, 128>}, {pipeline_mode = #tpu.pipeline_mode<synchronous>, transform_indices = @transform_15, window_bounds = array<i64: 2, 1, 128>}, {pipeline_mode = #tpu.pipeline_mode<synchronous>, transform_indices = @transform_16, window_bounds = array<i64: 128, 128>}, {pipeline_mode = #tpu.pipeline_mode<synchronous>, transform_indices = @transform_17, window_bounds = array<i64: 1, 128>}, {pipeline_mode = #tpu.pipeline_mode<synchronous>, transform_indices = @transform_18, window_bounds = array<i64: 128, 128>}, {pipeline_mode = #tpu.pipeline_mode<synchronous>, transform_indices = @transform_19, window_bounds = array<i64: 1, 128>}, {transform_indices = @transform_20, window_bounds = array<i64: 1, 1, 128>}]} {
    %c0 = arith.constant 0 : index
    %c0_0 = arith.constant 0 : index
    %c0_1 = arith.constant 0 : index
    %0 = vector.load %arg1[%c0, %c0_0, %c0_1] : memref<1x8x128xf32, #tpu.memory_space<vmem>>, vector<1x8x128xf32>
    %1 = vector.shape_cast %0 : vector<1x8x128xf32> to vector<8x128xf32>
    %c0_2 = arith.constant 0 : index
    %c0_3 = arith.constant 0 : index
    %c0_4 = arith.constant 0 : index
    %2 = vector.load %arg2[%c0_2, %c0_3, %c0_4] : memref<1x1x8xf32, #tpu.memory_space<vmem>>, vector<1x1x8xf32>
    %3 = vector.shape_cast %2 : vector<1x1x8xf32> to vector<1x8xf32>
    %4 = tpu.iota {dimensions = array<i32: 1>} : vector<1x128xi32>
    %c32_i32 = arith.constant 32 : i32
    %5 = vector.broadcast %c32_i32 : i32 to vector<1x128xi32>
    %6 = arith.cmpi slt, %4, %5 : vector<1x128xi32>
    %7 = arith.extui %6 : vector<1x128xi1> to vector<1x128xi32>
    %8 = arith.sitofp %7 : vector<1x128xi32> to vector<1x128xf32>
    %c0_5 = arith.constant 0 : index
    %c0_6 = arith.constant 0 : index
    %9 = vector.load %arg3[%c0_5, %c0_6] : memref<1x128xf32, #tpu.memory_space<vmem>>, vector<1x128xf32>
    %c0_7 = arith.constant 0 : index
    %c0_8 = arith.constant 0 : index
    %10 = vector.load %arg4[%c0_7, %c0_8] : memref<1x128xf32, #tpu.memory_space<vmem>>, vector<1x128xf32>
    %cst = arith.constant dense<0.000000e+00> : vector<8xf32>
    %11 = vector.multi_reduction <add>, %1, %cst [1] : vector<8x128xf32> to vector<8xf32>
    %12 = vector.shape_cast %11 : vector<8xf32> to vector<8x1xf32>
    %cst_9 = arith.constant 3.125000e-02 : f32
    %13 = vector.broadcast %cst_9 : f32 to vector<8x1xf32>
    %14 = arith.mulf %12, %13 : vector<8x1xf32>
    %15 = vector.broadcast %14 : vector<8x1xf32> to vector<8x128xf32>
    %16 = arith.subf %1, %15 : vector<8x128xf32>
    %17 = vector.broadcast %8 : vector<1x128xf32> to vector<8x128xf32>
    %18 = arith.mulf %16, %17 : vector<8x128xf32>
    %19 = arith.mulf %18, %18 : vector<8x128xf32>
    %cst_10 = arith.constant dense<0.000000e+00> : vector<8xf32>
    %20 = vector.multi_reduction <add>, %19, %cst_10 [1] : vector<8x128xf32> to vector<8xf32>
    %21 = vector.shape_cast %20 : vector<8xf32> to vector<8x1xf32>
    %cst_11 = arith.constant 3.125000e-02 : f32
    %22 = vector.broadcast %cst_11 : f32 to vector<8x1xf32>
    %23 = arith.mulf %21, %22 : vector<8x1xf32>
    %cst_12 = arith.constant 9.99999974E-6 : f32
    %24 = vector.broadcast %cst_12 : f32 to vector<8x1xf32>
    %25 = arith.addf %23, %24 : vector<8x1xf32>
    %26 = math.rsqrt %25 : vector<8x1xf32>
    %27 = vector.broadcast %26 : vector<8x1xf32> to vector<8x128xf32>
    %28 = arith.mulf %18, %27 : vector<8x128xf32>
    %29 = vector.broadcast %9 : vector<1x128xf32> to vector<8x128xf32>
    %30 = arith.mulf %28, %29 : vector<8x128xf32>
    %31 = vector.broadcast %10 : vector<1x128xf32> to vector<8x128xf32>
    %32 = arith.addf %30, %31 : vector<8x128xf32>
    %c0_13 = arith.constant 0 : index
    %c0_14 = arith.constant 0 : index
    %c0_15 = arith.constant 0 : index
    %33 = vector.load %arg5[%c0_13, %c0_14, %c0_15] : memref<2x384x128xf32, #tpu.memory_space<vmem>>, vector<1x384x128xf32>
    %34 = vector.shape_cast %33 : vector<1x384x128xf32> to vector<384x128xf32>
    %c0_16 = arith.constant 0 : index
    %c0_17 = arith.constant 0 : index
    %c0_18 = arith.constant 0 : index
    %35 = vector.load %arg6[%c0_16, %c0_17, %c0_18] : memref<2x384x1xf32, #tpu.memory_space<vmem>>, vector<1x384x1xf32>
    %36 = vector.shape_cast %35 : vector<1x384x1xf32> to vector<384x1xf32>
    %c0_19 = arith.constant 0 : index
    %c0_20 = arith.constant 0 : index
    %c0_21 = arith.constant 0 : index
    %37 = vector.load %arg7[%c0_19, %c0_20, %c0_21] : memref<2x32x128xf32, #tpu.memory_space<vmem>>, vector<1x32x128xf32>
    %38 = vector.shape_cast %37 : vector<1x32x128xf32> to vector<32x128xf32>
    %39 = vector.shape_cast %38 : vector<32x128xf32> to vector<4x8x128xf32>
    %c0_22 = arith.constant 0 : index
    %c0_23 = arith.constant 0 : index
    %c0_24 = arith.constant 0 : index
    %40 = vector.load %arg8[%c0_22, %c0_23, %c0_24] : memref<2x1x128xf32, #tpu.memory_space<vmem>>, vector<1x1x128xf32>
    %41 = vector.shape_cast %40 : vector<1x1x128xf32> to vector<1x128xf32>
    %c0_25 = arith.constant 0 : index
    %c0_26 = arith.constant 0 : index
    %c0_27 = arith.constant 0 : index
    %42 = vector.load %arg9[%c0_25, %c0_26, %c0_27] : memref<2x1x128xf32, #tpu.memory_space<vmem>>, vector<1x1x128xf32>
    %43 = vector.shape_cast %42 : vector<1x1x128xf32> to vector<1x128xf32>
    %c0_28 = arith.constant 0 : index
    %c0_29 = arith.constant 0 : index
    %c0_30 = arith.constant 0 : index
    %44 = vector.load %arg10[%c0_28, %c0_29, %c0_30] : memref<2x1x128xf32, #tpu.memory_space<vmem>>, vector<1x1x128xf32>
    %45 = vector.shape_cast %44 : vector<1x1x128xf32> to vector<1x128xf32>
    %c0_31 = arith.constant 0 : index
    %c0_32 = arith.constant 0 : index
    %c0_33 = arith.constant 0 : index
    %46 = vector.load %arg11[%c0_31, %c0_32, %c0_33] : memref<2x128x128xf32, #tpu.memory_space<vmem>>, vector<1x128x128xf32>
    %47 = vector.shape_cast %46 : vector<1x128x128xf32> to vector<128x128xf32>
    %c0_34 = arith.constant 0 : index
    %c0_35 = arith.constant 0 : index
    %c0_36 = arith.constant 0 : index
    %48 = vector.load %arg12[%c0_34, %c0_35, %c0_36] : memref<2x1x128xf32, #tpu.memory_space<vmem>>, vector<1x1x128xf32>
    %49 = vector.shape_cast %48 : vector<1x1x128xf32> to vector<1x128xf32>
    %c0_37 = arith.constant 0 : index
    %c0_38 = arith.constant 0 : index
    %c0_39 = arith.constant 0 : index
    %50 = vector.load %arg13[%c0_37, %c0_38, %c0_39] : memref<2x128x128xf32, #tpu.memory_space<vmem>>, vector<1x128x128xf32>
    %51 = vector.shape_cast %50 : vector<1x128x128xf32> to vector<128x128xf32>
    %c0_40 = arith.constant 0 : index
    %c0_41 = arith.constant 0 : index
    %c0_42 = arith.constant 0 : index
    %52 = vector.load %arg14[%c0_40, %c0_41, %c0_42] : memref<2x1x128xf32, #tpu.memory_space<vmem>>, vector<1x1x128xf32>
    %53 = vector.shape_cast %52 : vector<1x1x128xf32> to vector<1x128xf32>
    %c0_43 = arith.constant 0 : index
    %c0_44 = arith.constant 0 : index
    %c0_45 = arith.constant 0 : index
    %54 = vector.load %arg15[%c0_43, %c0_44, %c0_45] : memref<2x1x128xf32, #tpu.memory_space<vmem>>, vector<1x1x128xf32>
    %55 = vector.shape_cast %54 : vector<1x1x128xf32> to vector<1x128xf32>
    %c0_46 = arith.constant 0 : index
    %c0_47 = arith.constant 0 : index
    %c0_48 = arith.constant 0 : index
    %56 = vector.load %arg16[%c0_46, %c0_47, %c0_48] : memref<2x1x128xf32, #tpu.memory_space<vmem>>, vector<1x1x128xf32>
    %57 = vector.shape_cast %56 : vector<1x1x128xf32> to vector<1x128xf32>
    %58 = tpu.transpose %32, [1, 0] : vector<8x128xf32> -> vector<128x8xf32>
    %cst_49 = arith.constant dense<0.000000e+00> : vector<384x8xf32>
    %59 = tpu.matmul %34, %58, %cst_49 {dimension_numbers = #tpu.dot_dimension_numbers<[1], [0], [0], [1], [0, 0, 1, 1], [], []>} : vector<384x128xf32>, vector<128x8xf32>, vector<384x8xf32> -> vector<384x8xf32>
    %60 = vector.broadcast %36 : vector<384x1xf32> to vector<384x8xf32>
    %61 = arith.addf %59, %60 : vector<384x8xf32>
    %62 = vector.shape_cast %61 : vector<384x8xf32> to vector<48x8x8xf32>
    %63 = vector.extract_strided_slice %62 {offsets = [0, 0, 0], sizes = [1, 8, 8], strides = [1, 1, 1]} : vector<48x8x8xf32> to vector<1x8x8xf32>
    %64 = vector.shape_cast %63 : vector<1x8x8xf32> to vector<8x8xf32>
    %65 = vector.extract_strided_slice %62 {offsets = [16, 0, 0], sizes = [1, 8, 8], strides = [1, 1, 1]} : vector<48x8x8xf32> to vector<1x8x8xf32>
    %66 = vector.shape_cast %65 : vector<1x8x8xf32> to vector<8x8xf32>
    %67 = vector.extract_strided_slice %62 {offsets = [32, 0, 0], sizes = [1, 8, 8], strides = [1, 1, 1]} : vector<48x8x8xf32> to vector<1x8x8xf32>
    %68 = vector.shape_cast %67 : vector<1x8x8xf32> to vector<8x8xf32>
    %69 = tpu.transpose %64, [1, 0] : vector<8x8xf32> -> vector<8x8xf32>
    %cst_50 = arith.constant dense<0.000000e+00> : vector<8x8xf32>
    %70 = tpu.matmul %69, %66, %cst_50 {dimension_numbers = #tpu.dot_dimension_numbers<[1], [0], [0], [1], [0, 0, 1, 1], [], []>} : vector<8x8xf32>, vector<8x8xf32>, vector<8x8xf32> -> vector<8x8xf32>
    %71 = vector.broadcast %3 : vector<1x8xf32> to vector<8x8xf32>
    %72 = arith.addf %70, %71 : vector<8x8xf32>
    %cst_51 = arith.constant dense<0xFF800000> : vector<8xf32>
    %73 = vector.multi_reduction <maximumf>, %72, %cst_51 [1] : vector<8x8xf32> to vector<8xf32>
    %74 = vector.shape_cast %73 : vector<8xf32> to vector<8x1xf32>
    %75 = vector.broadcast %74 : vector<8x1xf32> to vector<8x8xf32>
    %76 = arith.subf %72, %75 : vector<8x8xf32>
    %77 = math.exp %76 : vector<8x8xf32>
    %cst_52 = arith.constant dense<0.000000e+00> : vector<8xf32>
    %78 = vector.multi_reduction <add>, %77, %cst_52 [1] : vector<8x8xf32> to vector<8xf32>
    %79 = vector.shape_cast %78 : vector<8xf32> to vector<8x1xf32>
    %80 = tpu.reciprocal %79 {approx = true} : vector<8x1xf32> -> vector<8x1xf32>
    %81 = vector.broadcast %80 : vector<8x1xf32> to vector<8x8xf32>
    %82 = arith.mulf %77, %81 : vector<8x8xf32>
    %83 = tpu.transpose %68, [1, 0] : vector<8x8xf32> -> vector<8x8xf32>
    %cst_53 = arith.constant dense<0.000000e+00> : vector<8x8xf32>
    %84 = tpu.matmul %82, %83, %cst_53 {dimension_numbers = #tpu.dot_dimension_numbers<[1], [0], [0], [1], [0, 0, 1, 1], [], []>} : vector<8x8xf32>, vector<8x8xf32>, vector<8x8xf32> -> vector<8x8xf32>
    %85 = vector.extract_strided_slice %39 {offsets = [0, 0, 0], sizes = [1, 8, 128], strides = [1, 1, 1]} : vector<4x8x128xf32> to vector<1x8x128xf32>
    %86 = vector.shape_cast %85 : vector<1x8x128xf32> to vector<8x128xf32>
    %cst_54 = arith.constant dense<0.000000e+00> : vector<8x128xf32>
    %87 = tpu.matmul %84, %86, %cst_54 {dimension_numbers = #tpu.dot_dimension_numbers<[1], [0], [0], [1], [0, 0, 1, 1], [], []>} : vector<8x8xf32>, vector<8x128xf32>, vector<8x128xf32> -> vector<8x128xf32>
    %88 = vector.extract_strided_slice %62 {offsets = [1, 0, 0], sizes = [1, 8, 8], strides = [1, 1, 1]} : vector<48x8x8xf32> to vector<1x8x8xf32>
    %89 = vector.shape_cast %88 : vector<1x8x8xf32> to vector<8x8xf32>
    %90 = vector.extract_strided_slice %62 {offsets = [17, 0, 0], sizes = [1, 8, 8], strides = [1, 1, 1]} : vector<48x8x8xf32> to vector<1x8x8xf32>
    %91 = vector.shape_cast %90 : vector<1x8x8xf32> to vector<8x8xf32>
    %92 = vector.extract_strided_slice %62 {offsets = [33, 0, 0], sizes = [1, 8, 8], strides = [1, 1, 1]} : vector<48x8x8xf32> to vector<1x8x8xf32>
    %93 = vector.shape_cast %92 : vector<1x8x8xf32> to vector<8x8xf32>
    %94 = tpu.transpose %89, [1, 0] : vector<8x8xf32> -> vector<8x8xf32>
    %cst_55 = arith.constant dense<0.000000e+00> : vector<8x8xf32>
    %95 = tpu.matmul %94, %91, %cst_55 {dimension_numbers = #tpu.dot_dimension_numbers<[1], [0], [0], [1], [0, 0, 1, 1], [], []>} : vector<8x8xf32>, vector<8x8xf32>, vector<8x8xf32> -> vector<8x8xf32>
    %96 = vector.broadcast %3 : vector<1x8xf32> to vector<8x8xf32>
    %97 = arith.addf %95, %96 : vector<8x8xf32>
    %cst_56 = arith.constant dense<0xFF800000> : vector<8xf32>
    %98 = vector.multi_reduction <maximumf>, %97, %cst_56 [1] : vector<8x8xf32> to vector<8xf32>
    %99 = vector.shape_cast %98 : vector<8xf32> to vector<8x1xf32>
    %100 = vector.broadcast %99 : vector<8x1xf32> to vector<8x8xf32>
    %101 = arith.subf %97, %100 : vector<8x8xf32>
    %102 = math.exp %101 : vector<8x8xf32>
    %cst_57 = arith.constant dense<0.000000e+00> : vector<8xf32>
    %103 = vector.multi_reduction <add>, %102, %cst_57 [1] : vector<8x8xf32> to vector<8xf32>
    %104 = vector.shape_cast %103 : vector<8xf32> to vector<8x1xf32>
    %105 = tpu.reciprocal %104 {approx = true} : vector<8x1xf32> -> vector<8x1xf32>
    %106 = vector.broadcast %105 : vector<8x1xf32> to vector<8x8xf32>
    %107 = arith.mulf %102, %106 : vector<8x8xf32>
    %108 = tpu.transpose %93, [1, 0] : vector<8x8xf32> -> vector<8x8xf32>
    %cst_58 = arith.constant dense<0.000000e+00> : vector<8x8xf32>
    %109 = tpu.matmul %107, %108, %cst_58 {dimension_numbers = #tpu.dot_dimension_numbers<[1], [0], [0], [1], [0, 0, 1, 1], [], []>} : vector<8x8xf32>, vector<8x8xf32>, vector<8x8xf32> -> vector<8x8xf32>
    %110 = vector.extract_strided_slice %39 {offsets = [1, 0, 0], sizes = [1, 8, 128], strides = [1, 1, 1]} : vector<4x8x128xf32> to vector<1x8x128xf32>
    %111 = vector.shape_cast %110 : vector<1x8x128xf32> to vector<8x128xf32>
    %cst_59 = arith.constant dense<0.000000e+00> : vector<8x128xf32>
    %112 = tpu.matmul %109, %111, %cst_59 {dimension_numbers = #tpu.dot_dimension_numbers<[1], [0], [0], [1], [0, 0, 1, 1], [], []>} : vector<8x8xf32>, vector<8x128xf32>, vector<8x128xf32> -> vector<8x128xf32>
    %113 = arith.addf %87, %112 : vector<8x128xf32>
    %114 = vector.extract_strided_slice %62 {offsets = [2, 0, 0], sizes = [1, 8, 8], strides = [1, 1, 1]} : vector<48x8x8xf32> to vector<1x8x8xf32>
    %115 = vector.shape_cast %114 : vector<1x8x8xf32> to vector<8x8xf32>
    %116 = vector.extract_strided_slice %62 {offsets = [18, 0, 0], sizes = [1, 8, 8], strides = [1, 1, 1]} : vector<48x8x8xf32> to vector<1x8x8xf32>
    %117 = vector.shape_cast %116 : vector<1x8x8xf32> to vector<8x8xf32>
    %118 = vector.extract_strided_slice %62 {offsets = [34, 0, 0], sizes = [1, 8, 8], strides = [1, 1, 1]} : vector<48x8x8xf32> to vector<1x8x8xf32>
    %119 = vector.shape_cast %118 : vector<1x8x8xf32> to vector<8x8xf32>
    %120 = tpu.transpose %115, [1, 0] : vector<8x8xf32> -> vector<8x8xf32>
    %cst_60 = arith.constant dense<0.000000e+00> : vector<8x8xf32>
    %121 = tpu.matmul %120, %117, %cst_60 {dimension_numbers = #tpu.dot_dimension_numbers<[1], [0], [0], [1], [0, 0, 1, 1], [], []>} : vector<8x8xf32>, vector<8x8xf32>, vector<8x8xf32> -> vector<8x8xf32>
    %122 = vector.broadcast %3 : vector<1x8xf32> to vector<8x8xf32>
    %123 = arith.addf %121, %122 : vector<8x8xf32>
    %cst_61 = arith.constant dense<0xFF800000> : vector<8xf32>
    %124 = vector.multi_reduction <maximumf>, %123, %cst_61 [1] : vector<8x8xf32> to vector<8xf32>
    %125 = vector.shape_cast %124 : vector<8xf32> to vector<8x1xf32>
    %126 = vector.broadcast %125 : vector<8x1xf32> to vector<8x8xf32>
    %127 = arith.subf %123, %126 : vector<8x8xf32>
    %128 = math.exp %127 : vector<8x8xf32>
    %cst_62 = arith.constant dense<0.000000e+00> : vector<8xf32>
    %129 = vector.multi_reduction <add>, %128, %cst_62 [1] : vector<8x8xf32> to vector<8xf32>
    %130 = vector.shape_cast %129 : vector<8xf32> to vector<8x1xf32>
    %131 = tpu.reciprocal %130 {approx = true} : vector<8x1xf32> -> vector<8x1xf32>
    %132 = vector.broadcast %131 : vector<8x1xf32> to vector<8x8xf32>
    %133 = arith.mulf %128, %132 : vector<8x8xf32>
    %134 = tpu.transpose %119, [1, 0] : vector<8x8xf32> -> vector<8x8xf32>
    %cst_63 = arith.constant dense<0.000000e+00> : vector<8x8xf32>
    %135 = tpu.matmul %133, %134, %cst_63 {dimension_numbers = #tpu.dot_dimension_numbers<[1], [0], [0], [1], [0, 0, 1, 1], [], []>} : vector<8x8xf32>, vector<8x8xf32>, vector<8x8xf32> -> vector<8x8xf32>
    %136 = vector.extract_strided_slice %39 {offsets = [2, 0, 0], sizes = [1, 8, 128], strides = [1, 1, 1]} : vector<4x8x128xf32> to vector<1x8x128xf32>
    %137 = vector.shape_cast %136 : vector<1x8x128xf32> to vector<8x128xf32>
    %cst_64 = arith.constant dense<0.000000e+00> : vector<8x128xf32>
    %138 = tpu.matmul %135, %137, %cst_64 {dimension_numbers = #tpu.dot_dimension_numbers<[1], [0], [0], [1], [0, 0, 1, 1], [], []>} : vector<8x8xf32>, vector<8x128xf32>, vector<8x128xf32> -> vector<8x128xf32>
    %139 = arith.addf %113, %138 : vector<8x128xf32>
    %140 = vector.extract_strided_slice %62 {offsets = [3, 0, 0], sizes = [1, 8, 8], strides = [1, 1, 1]} : vector<48x8x8xf32> to vector<1x8x8xf32>
    %141 = vector.shape_cast %140 : vector<1x8x8xf32> to vector<8x8xf32>
    %142 = vector.extract_strided_slice %62 {offsets = [19, 0, 0], sizes = [1, 8, 8], strides = [1, 1, 1]} : vector<48x8x8xf32> to vector<1x8x8xf32>
    %143 = vector.shape_cast %142 : vector<1x8x8xf32> to vector<8x8xf32>
    %144 = vector.extract_strided_slice %62 {offsets = [35, 0, 0], sizes = [1, 8, 8], strides = [1, 1, 1]} : vector<48x8x8xf32> to vector<1x8x8xf32>
    %145 = vector.shape_cast %144 : vector<1x8x8xf32> to vector<8x8xf32>
    %146 = tpu.transpose %141, [1, 0] : vector<8x8xf32> -> vector<8x8xf32>
    %cst_65 = arith.constant dense<0.000000e+00> : vector<8x8xf32>
    %147 = tpu.matmul %146, %143, %cst_65 {dimension_numbers = #tpu.dot_dimension_numbers<[1], [0], [0], [1], [0, 0, 1, 1], [], []>} : vector<8x8xf32>, vector<8x8xf32>, vector<8x8xf32> -> vector<8x8xf32>
    %148 = vector.broadcast %3 : vector<1x8xf32> to vector<8x8xf32>
    %149 = arith.addf %147, %148 : vector<8x8xf32>
    %cst_66 = arith.constant dense<0xFF800000> : vector<8xf32>
    %150 = vector.multi_reduction <maximumf>, %149, %cst_66 [1] : vector<8x8xf32> to vector<8xf32>
    %151 = vector.shape_cast %150 : vector<8xf32> to vector<8x1xf32>
    %152 = vector.broadcast %151 : vector<8x1xf32> to vector<8x8xf32>
    %153 = arith.subf %149, %152 : vector<8x8xf32>
    %154 = math.exp %153 : vector<8x8xf32>
    %cst_67 = arith.constant dense<0.000000e+00> : vector<8xf32>
    %155 = vector.multi_reduction <add>, %154, %cst_67 [1] : vector<8x8xf32> to vector<8xf32>
    %156 = vector.shape_cast %155 : vector<8xf32> to vector<8x1xf32>
    %157 = tpu.reciprocal %156 {approx = true} : vector<8x1xf32> -> vector<8x1xf32>
    %158 = vector.broadcast %157 : vector<8x1xf32> to vector<8x8xf32>
    %159 = arith.mulf %154, %158 : vector<8x8xf32>
    %160 = tpu.transpose %145, [1, 0] : vector<8x8xf32> -> vector<8x8xf32>
    %cst_68 = arith.constant dense<0.000000e+00> : vector<8x8xf32>
    %161 = tpu.matmul %159, %160, %cst_68 {dimension_numbers = #tpu.dot_dimension_numbers<[1], [0], [0], [1], [0, 0, 1, 1], [], []>} : vector<8x8xf32>, vector<8x8xf32>, vector<8x8xf32> -> vector<8x8xf32>
    %162 = vector.extract_strided_slice %39 {offsets = [3, 0, 0], sizes = [1, 8, 128], strides = [1, 1, 1]} : vector<4x8x128xf32> to vector<1x8x128xf32>
    %163 = vector.shape_cast %162 : vector<1x8x128xf32> to vector<8x128xf32>
    %cst_69 = arith.constant dense<0.000000e+00> : vector<8x128xf32>
    %164 = tpu.matmul %161, %163, %cst_69 {dimension_numbers = #tpu.dot_dimension_numbers<[1], [0], [0], [1], [0, 0, 1, 1], [], []>} : vector<8x8xf32>, vector<8x128xf32>, vector<8x128xf32> -> vector<8x128xf32>
    %165 = arith.addf %139, %164 : vector<8x128xf32>
    %166 = vector.broadcast %41 : vector<1x128xf32> to vector<8x128xf32>
    %167 = arith.addf %165, %166 : vector<8x128xf32>
    %168 = arith.addf %32, %167 : vector<8x128xf32>
    %cst_70 = arith.constant dense<0.000000e+00> : vector<8xf32>
    %169 = vector.multi_reduction <add>, %168, %cst_70 [1] : vector<8x128xf32> to vector<8xf32>
    %170 = vector.shape_cast %169 : vector<8xf32> to vector<8x1xf32>
    %cst_71 = arith.constant 3.125000e-02 : f32
    %171 = vector.broadcast %cst_71 : f32 to vector<8x1xf32>
    %172 = arith.mulf %170, %171 : vector<8x1xf32>
    %173 = vector.broadcast %172 : vector<8x1xf32> to vector<8x128xf32>
    %174 = arith.subf %168, %173 : vector<8x128xf32>
    %175 = vector.broadcast %8 : vector<1x128xf32> to vector<8x128xf32>
    %176 = arith.mulf %174, %175 : vector<8x128xf32>
    %177 = arith.mulf %176, %176 : vector<8x128xf32>
    %cst_72 = arith.constant dense<0.000000e+00> : vector<8xf32>
    %178 = vector.multi_reduction <add>, %177, %cst_72 [1] : vector<8x128xf32> to vector<8xf32>
    %179 = vector.shape_cast %178 : vector<8xf32> to vector<8x1xf32>
    %cst_73 = arith.constant 3.125000e-02 : f32
    %180 = vector.broadcast %cst_73 : f32 to vector<8x1xf32>
    %181 = arith.mulf %179, %180 : vector<8x1xf32>
    %cst_74 = arith.constant 9.99999974E-6 : f32
    %182 = vector.broadcast %cst_74 : f32 to vector<8x1xf32>
    %183 = arith.addf %181, %182 : vector<8x1xf32>
    %184 = math.rsqrt %183 : vector<8x1xf32>
    %185 = vector.broadcast %184 : vector<8x1xf32> to vector<8x128xf32>
    %186 = arith.mulf %176, %185 : vector<8x128xf32>
    %187 = vector.broadcast %43 : vector<1x128xf32> to vector<8x128xf32>
    %188 = arith.mulf %186, %187 : vector<8x128xf32>
    %189 = vector.broadcast %45 : vector<1x128xf32> to vector<8x128xf32>
    %190 = arith.addf %188, %189 : vector<8x128xf32>
    %cst_75 = arith.constant dense<0.000000e+00> : vector<8x128xf32>
    %191 = tpu.matmul %190, %47, %cst_75 {dimension_numbers = #tpu.dot_dimension_numbers<[1], [0], [0], [1], [0, 0, 1, 1], [], []>} : vector<8x128xf32>, vector<128x128xf32>, vector<8x128xf32> -> vector<8x128xf32>
    %192 = vector.broadcast %49 : vector<1x128xf32> to vector<8x128xf32>
    %193 = arith.addf %191, %192 : vector<8x128xf32>
    %cst_76 = arith.constant 5.000000e-01 : f32
    %194 = vector.broadcast %cst_76 : f32 to vector<8x128xf32>
    %195 = arith.mulf %194, %193 : vector<8x128xf32>
    %cst_77 = arith.constant 4.471500e-02 : f32
    %196 = vector.broadcast %cst_77 : f32 to vector<8x128xf32>
    %197 = arith.mulf %196, %193 : vector<8x128xf32>
    %198 = arith.mulf %197, %193 : vector<8x128xf32>
    %199 = arith.mulf %198, %193 : vector<8x128xf32>
    %200 = arith.addf %193, %199 : vector<8x128xf32>
    %cst_78 = arith.constant 0.797884583 : f32
    %201 = vector.broadcast %cst_78 : f32 to vector<8x128xf32>
    %202 = arith.mulf %201, %200 : vector<8x128xf32>
    %203 = math.tanh %202 : vector<8x128xf32>
    %cst_79 = arith.constant 1.000000e+00 : f32
    %204 = vector.broadcast %cst_79 : f32 to vector<8x128xf32>
    %205 = arith.addf %204, %203 : vector<8x128xf32>
    %206 = arith.mulf %195, %205 : vector<8x128xf32>
    %cst_80 = arith.constant dense<0.000000e+00> : vector<8x128xf32>
    %207 = tpu.matmul %206, %51, %cst_80 {dimension_numbers = #tpu.dot_dimension_numbers<[1], [0], [0], [1], [0, 0, 1, 1], [], []>} : vector<8x128xf32>, vector<128x128xf32>, vector<8x128xf32> -> vector<8x128xf32>
    %208 = vector.broadcast %53 : vector<1x128xf32> to vector<8x128xf32>
    %209 = arith.addf %207, %208 : vector<8x128xf32>
    %210 = arith.addf %190, %209 : vector<8x128xf32>
    %cst_81 = arith.constant dense<0.000000e+00> : vector<8xf32>
    %211 = vector.multi_reduction <add>, %210, %cst_81 [1] : vector<8x128xf32> to vector<8xf32>
    %212 = vector.shape_cast %211 : vector<8xf32> to vector<8x1xf32>
    %cst_82 = arith.constant 3.125000e-02 : f32
    %213 = vector.broadcast %cst_82 : f32 to vector<8x1xf32>
    %214 = arith.mulf %212, %213 : vector<8x1xf32>
    %215 = vector.broadcast %214 : vector<8x1xf32> to vector<8x128xf32>
    %216 = arith.subf %210, %215 : vector<8x128xf32>
    %217 = vector.broadcast %8 : vector<1x128xf32> to vector<8x128xf32>
    %218 = arith.mulf %216, %217 : vector<8x128xf32>
    %219 = arith.mulf %218, %218 : vector<8x128xf32>
    %cst_83 = arith.constant dense<0.000000e+00> : vector<8xf32>
    %220 = vector.multi_reduction <add>, %219, %cst_83 [1] : vector<8x128xf32> to vector<8xf32>
    %221 = vector.shape_cast %220 : vector<8xf32> to vector<8x1xf32>
    %cst_84 = arith.constant 3.125000e-02 : f32
    %222 = vector.broadcast %cst_84 : f32 to vector<8x1xf32>
    %223 = arith.mulf %221, %222 : vector<8x1xf32>
    %cst_85 = arith.constant 9.99999974E-6 : f32
    %224 = vector.broadcast %cst_85 : f32 to vector<8x1xf32>
    %225 = arith.addf %223, %224 : vector<8x1xf32>
    %226 = math.rsqrt %225 : vector<8x1xf32>
    %227 = vector.broadcast %226 : vector<8x1xf32> to vector<8x128xf32>
    %228 = arith.mulf %218, %227 : vector<8x128xf32>
    %229 = vector.broadcast %55 : vector<1x128xf32> to vector<8x128xf32>
    %230 = arith.mulf %228, %229 : vector<8x128xf32>
    %231 = vector.broadcast %57 : vector<1x128xf32> to vector<8x128xf32>
    %232 = arith.addf %230, %231 : vector<8x128xf32>
    %c1 = arith.constant 1 : index
    %c0_86 = arith.constant 0 : index
    %c0_87 = arith.constant 0 : index
    %233 = vector.load %arg5[%c1, %c0_86, %c0_87] : memref<2x384x128xf32, #tpu.memory_space<vmem>>, vector<1x384x128xf32>
    %234 = vector.shape_cast %233 : vector<1x384x128xf32> to vector<384x128xf32>
    %c1_88 = arith.constant 1 : index
    %c0_89 = arith.constant 0 : index
    %c0_90 = arith.constant 0 : index
    %235 = vector.load %arg6[%c1_88, %c0_89, %c0_90] : memref<2x384x1xf32, #tpu.memory_space<vmem>>, vector<1x384x1xf32>
    %236 = vector.shape_cast %235 : vector<1x384x1xf32> to vector<384x1xf32>
    %c1_91 = arith.constant 1 : index
    %c0_92 = arith.constant 0 : index
    %c0_93 = arith.constant 0 : index
    %237 = vector.load %arg7[%c1_91, %c0_92, %c0_93] : memref<2x32x128xf32, #tpu.memory_space<vmem>>, vector<1x32x128xf32>
    %238 = vector.shape_cast %237 : vector<1x32x128xf32> to vector<32x128xf32>
    %239 = vector.shape_cast %238 : vector<32x128xf32> to vector<4x8x128xf32>
    %c1_94 = arith.constant 1 : index
    %c0_95 = arith.constant 0 : index
    %c0_96 = arith.constant 0 : index
    %240 = vector.load %arg8[%c1_94, %c0_95, %c0_96] : memref<2x1x128xf32, #tpu.memory_space<vmem>>, vector<1x1x128xf32>
    %241 = vector.shape_cast %240 : vector<1x1x128xf32> to vector<1x128xf32>
    %c1_97 = arith.constant 1 : index
    %c0_98 = arith.constant 0 : index
    %c0_99 = arith.constant 0 : index
    %242 = vector.load %arg9[%c1_97, %c0_98, %c0_99] : memref<2x1x128xf32, #tpu.memory_space<vmem>>, vector<1x1x128xf32>
    %243 = vector.shape_cast %242 : vector<1x1x128xf32> to vector<1x128xf32>
    %c1_100 = arith.constant 1 : index
    %c0_101 = arith.constant 0 : index
    %c0_102 = arith.constant 0 : index
    %244 = vector.load %arg10[%c1_100, %c0_101, %c0_102] : memref<2x1x128xf32, #tpu.memory_space<vmem>>, vector<1x1x128xf32>
    %245 = vector.shape_cast %244 : vector<1x1x128xf32> to vector<1x128xf32>
    %c1_103 = arith.constant 1 : index
    %c0_104 = arith.constant 0 : index
    %c0_105 = arith.constant 0 : index
    %246 = vector.load %arg11[%c1_103, %c0_104, %c0_105] : memref<2x128x128xf32, #tpu.memory_space<vmem>>, vector<1x128x128xf32>
    %247 = vector.shape_cast %246 : vector<1x128x128xf32> to vector<128x128xf32>
    %c1_106 = arith.constant 1 : index
    %c0_107 = arith.constant 0 : index
    %c0_108 = arith.constant 0 : index
    %248 = vector.load %arg12[%c1_106, %c0_107, %c0_108] : memref<2x1x128xf32, #tpu.memory_space<vmem>>, vector<1x1x128xf32>
    %249 = vector.shape_cast %248 : vector<1x1x128xf32> to vector<1x128xf32>
    %c1_109 = arith.constant 1 : index
    %c0_110 = arith.constant 0 : index
    %c0_111 = arith.constant 0 : index
    %250 = vector.load %arg13[%c1_109, %c0_110, %c0_111] : memref<2x128x128xf32, #tpu.memory_space<vmem>>, vector<1x128x128xf32>
    %251 = vector.shape_cast %250 : vector<1x128x128xf32> to vector<128x128xf32>
    %c1_112 = arith.constant 1 : index
    %c0_113 = arith.constant 0 : index
    %c0_114 = arith.constant 0 : index
    %252 = vector.load %arg14[%c1_112, %c0_113, %c0_114] : memref<2x1x128xf32, #tpu.memory_space<vmem>>, vector<1x1x128xf32>
    %253 = vector.shape_cast %252 : vector<1x1x128xf32> to vector<1x128xf32>
    %c1_115 = arith.constant 1 : index
    %c0_116 = arith.constant 0 : index
    %c0_117 = arith.constant 0 : index
    %254 = vector.load %arg15[%c1_115, %c0_116, %c0_117] : memref<2x1x128xf32, #tpu.memory_space<vmem>>, vector<1x1x128xf32>
    %255 = vector.shape_cast %254 : vector<1x1x128xf32> to vector<1x128xf32>
    %c1_118 = arith.constant 1 : index
    %c0_119 = arith.constant 0 : index
    %c0_120 = arith.constant 0 : index
    %256 = vector.load %arg16[%c1_118, %c0_119, %c0_120] : memref<2x1x128xf32, #tpu.memory_space<vmem>>, vector<1x1x128xf32>
    %257 = vector.shape_cast %256 : vector<1x1x128xf32> to vector<1x128xf32>
    %258 = tpu.transpose %232, [1, 0] : vector<8x128xf32> -> vector<128x8xf32>
    %cst_121 = arith.constant dense<0.000000e+00> : vector<384x8xf32>
    %259 = tpu.matmul %234, %258, %cst_121 {dimension_numbers = #tpu.dot_dimension_numbers<[1], [0], [0], [1], [0, 0, 1, 1], [], []>} : vector<384x128xf32>, vector<128x8xf32>, vector<384x8xf32> -> vector<384x8xf32>
    %260 = vector.broadcast %236 : vector<384x1xf32> to vector<384x8xf32>
    %261 = arith.addf %259, %260 : vector<384x8xf32>
    %262 = vector.shape_cast %261 : vector<384x8xf32> to vector<48x8x8xf32>
    %263 = vector.extract_strided_slice %262 {offsets = [0, 0, 0], sizes = [1, 8, 8], strides = [1, 1, 1]} : vector<48x8x8xf32> to vector<1x8x8xf32>
    %264 = vector.shape_cast %263 : vector<1x8x8xf32> to vector<8x8xf32>
    %265 = vector.extract_strided_slice %262 {offsets = [16, 0, 0], sizes = [1, 8, 8], strides = [1, 1, 1]} : vector<48x8x8xf32> to vector<1x8x8xf32>
    %266 = vector.shape_cast %265 : vector<1x8x8xf32> to vector<8x8xf32>
    %267 = vector.extract_strided_slice %262 {offsets = [32, 0, 0], sizes = [1, 8, 8], strides = [1, 1, 1]} : vector<48x8x8xf32> to vector<1x8x8xf32>
    %268 = vector.shape_cast %267 : vector<1x8x8xf32> to vector<8x8xf32>
    %269 = tpu.transpose %264, [1, 0] : vector<8x8xf32> -> vector<8x8xf32>
    %cst_122 = arith.constant dense<0.000000e+00> : vector<8x8xf32>
    %270 = tpu.matmul %269, %266, %cst_122 {dimension_numbers = #tpu.dot_dimension_numbers<[1], [0], [0], [1], [0, 0, 1, 1], [], []>} : vector<8x8xf32>, vector<8x8xf32>, vector<8x8xf32> -> vector<8x8xf32>
    %271 = vector.broadcast %3 : vector<1x8xf32> to vector<8x8xf32>
    %272 = arith.addf %270, %271 : vector<8x8xf32>
    %cst_123 = arith.constant dense<0xFF800000> : vector<8xf32>
    %273 = vector.multi_reduction <maximumf>, %272, %cst_123 [1] : vector<8x8xf32> to vector<8xf32>
    %274 = vector.shape_cast %273 : vector<8xf32> to vector<8x1xf32>
    %275 = vector.broadcast %274 : vector<8x1xf32> to vector<8x8xf32>
    %276 = arith.subf %272, %275 : vector<8x8xf32>
    %277 = math.exp %276 : vector<8x8xf32>
    %cst_124 = arith.constant dense<0.000000e+00> : vector<8xf32>
    %278 = vector.multi_reduction <add>, %277, %cst_124 [1] : vector<8x8xf32> to vector<8xf32>
    %279 = vector.shape_cast %278 : vector<8xf32> to vector<8x1xf32>
    %280 = tpu.reciprocal %279 {approx = true} : vector<8x1xf32> -> vector<8x1xf32>
    %281 = vector.broadcast %280 : vector<8x1xf32> to vector<8x8xf32>
    %282 = arith.mulf %277, %281 : vector<8x8xf32>
    %283 = tpu.transpose %268, [1, 0] : vector<8x8xf32> -> vector<8x8xf32>
    %cst_125 = arith.constant dense<0.000000e+00> : vector<8x8xf32>
    %284 = tpu.matmul %282, %283, %cst_125 {dimension_numbers = #tpu.dot_dimension_numbers<[1], [0], [0], [1], [0, 0, 1, 1], [], []>} : vector<8x8xf32>, vector<8x8xf32>, vector<8x8xf32> -> vector<8x8xf32>
    %285 = vector.extract_strided_slice %239 {offsets = [0, 0, 0], sizes = [1, 8, 128], strides = [1, 1, 1]} : vector<4x8x128xf32> to vector<1x8x128xf32>
    %286 = vector.shape_cast %285 : vector<1x8x128xf32> to vector<8x128xf32>
    %cst_126 = arith.constant dense<0.000000e+00> : vector<8x128xf32>
    %287 = tpu.matmul %284, %286, %cst_126 {dimension_numbers = #tpu.dot_dimension_numbers<[1], [0], [0], [1], [0, 0, 1, 1], [], []>} : vector<8x8xf32>, vector<8x128xf32>, vector<8x128xf32> -> vector<8x128xf32>
    %288 = vector.extract_strided_slice %262 {offsets = [1, 0, 0], sizes = [1, 8, 8], strides = [1, 1, 1]} : vector<48x8x8xf32> to vector<1x8x8xf32>
    %289 = vector.shape_cast %288 : vector<1x8x8xf32> to vector<8x8xf32>
    %290 = vector.extract_strided_slice %262 {offsets = [17, 0, 0], sizes = [1, 8, 8], strides = [1, 1, 1]} : vector<48x8x8xf32> to vector<1x8x8xf32>
    %291 = vector.shape_cast %290 : vector<1x8x8xf32> to vector<8x8xf32>
    %292 = vector.extract_strided_slice %262 {offsets = [33, 0, 0], sizes = [1, 8, 8], strides = [1, 1, 1]} : vector<48x8x8xf32> to vector<1x8x8xf32>
    %293 = vector.shape_cast %292 : vector<1x8x8xf32> to vector<8x8xf32>
    %294 = tpu.transpose %289, [1, 0] : vector<8x8xf32> -> vector<8x8xf32>
    %cst_127 = arith.constant dense<0.000000e+00> : vector<8x8xf32>
    %295 = tpu.matmul %294, %291, %cst_127 {dimension_numbers = #tpu.dot_dimension_numbers<[1], [0], [0], [1], [0, 0, 1, 1], [], []>} : vector<8x8xf32>, vector<8x8xf32>, vector<8x8xf32> -> vector<8x8xf32>
    %296 = vector.broadcast %3 : vector<1x8xf32> to vector<8x8xf32>
    %297 = arith.addf %295, %296 : vector<8x8xf32>
    %cst_128 = arith.constant dense<0xFF800000> : vector<8xf32>
    %298 = vector.multi_reduction <maximumf>, %297, %cst_128 [1] : vector<8x8xf32> to vector<8xf32>
    %299 = vector.shape_cast %298 : vector<8xf32> to vector<8x1xf32>
    %300 = vector.broadcast %299 : vector<8x1xf32> to vector<8x8xf32>
    %301 = arith.subf %297, %300 : vector<8x8xf32>
    %302 = math.exp %301 : vector<8x8xf32>
    %cst_129 = arith.constant dense<0.000000e+00> : vector<8xf32>
    %303 = vector.multi_reduction <add>, %302, %cst_129 [1] : vector<8x8xf32> to vector<8xf32>
    %304 = vector.shape_cast %303 : vector<8xf32> to vector<8x1xf32>
    %305 = tpu.reciprocal %304 {approx = true} : vector<8x1xf32> -> vector<8x1xf32>
    %306 = vector.broadcast %305 : vector<8x1xf32> to vector<8x8xf32>
    %307 = arith.mulf %302, %306 : vector<8x8xf32>
    %308 = tpu.transpose %293, [1, 0] : vector<8x8xf32> -> vector<8x8xf32>
    %cst_130 = arith.constant dense<0.000000e+00> : vector<8x8xf32>
    %309 = tpu.matmul %307, %308, %cst_130 {dimension_numbers = #tpu.dot_dimension_numbers<[1], [0], [0], [1], [0, 0, 1, 1], [], []>} : vector<8x8xf32>, vector<8x8xf32>, vector<8x8xf32> -> vector<8x8xf32>
    %310 = vector.extract_strided_slice %239 {offsets = [1, 0, 0], sizes = [1, 8, 128], strides = [1, 1, 1]} : vector<4x8x128xf32> to vector<1x8x128xf32>
    %311 = vector.shape_cast %310 : vector<1x8x128xf32> to vector<8x128xf32>
    %cst_131 = arith.constant dense<0.000000e+00> : vector<8x128xf32>
    %312 = tpu.matmul %309, %311, %cst_131 {dimension_numbers = #tpu.dot_dimension_numbers<[1], [0], [0], [1], [0, 0, 1, 1], [], []>} : vector<8x8xf32>, vector<8x128xf32>, vector<8x128xf32> -> vector<8x128xf32>
    %313 = arith.addf %287, %312 : vector<8x128xf32>
    %314 = vector.extract_strided_slice %262 {offsets = [2, 0, 0], sizes = [1, 8, 8], strides = [1, 1, 1]} : vector<48x8x8xf32> to vector<1x8x8xf32>
    %315 = vector.shape_cast %314 : vector<1x8x8xf32> to vector<8x8xf32>
    %316 = vector.extract_strided_slice %262 {offsets = [18, 0, 0], sizes = [1, 8, 8], strides = [1, 1, 1]} : vector<48x8x8xf32> to vector<1x8x8xf32>
    %317 = vector.shape_cast %316 : vector<1x8x8xf32> to vector<8x8xf32>
    %318 = vector.extract_strided_slice %262 {offsets = [34, 0, 0], sizes = [1, 8, 8], strides = [1, 1, 1]} : vector<48x8x8xf32> to vector<1x8x8xf32>
    %319 = vector.shape_cast %318 : vector<1x8x8xf32> to vector<8x8xf32>
    %320 = tpu.transpose %315, [1, 0] : vector<8x8xf32> -> vector<8x8xf32>
    %cst_132 = arith.constant dense<0.000000e+00> : vector<8x8xf32>
    %321 = tpu.matmul %320, %317, %cst_132 {dimension_numbers = #tpu.dot_dimension_numbers<[1], [0], [0], [1], [0, 0, 1, 1], [], []>} : vector<8x8xf32>, vector<8x8xf32>, vector<8x8xf32> -> vector<8x8xf32>
    %322 = vector.broadcast %3 : vector<1x8xf32> to vector<8x8xf32>
    %323 = arith.addf %321, %322 : vector<8x8xf32>
    %cst_133 = arith.constant dense<0xFF800000> : vector<8xf32>
    %324 = vector.multi_reduction <maximumf>, %323, %cst_133 [1] : vector<8x8xf32> to vector<8xf32>
    %325 = vector.shape_cast %324 : vector<8xf32> to vector<8x1xf32>
    %326 = vector.broadcast %325 : vector<8x1xf32> to vector<8x8xf32>
    %327 = arith.subf %323, %326 : vector<8x8xf32>
    %328 = math.exp %327 : vector<8x8xf32>
    %cst_134 = arith.constant dense<0.000000e+00> : vector<8xf32>
    %329 = vector.multi_reduction <add>, %328, %cst_134 [1] : vector<8x8xf32> to vector<8xf32>
    %330 = vector.shape_cast %329 : vector<8xf32> to vector<8x1xf32>
    %331 = tpu.reciprocal %330 {approx = true} : vector<8x1xf32> -> vector<8x1xf32>
    %332 = vector.broadcast %331 : vector<8x1xf32> to vector<8x8xf32>
    %333 = arith.mulf %328, %332 : vector<8x8xf32>
    %334 = tpu.transpose %319, [1, 0] : vector<8x8xf32> -> vector<8x8xf32>
    %cst_135 = arith.constant dense<0.000000e+00> : vector<8x8xf32>
    %335 = tpu.matmul %333, %334, %cst_135 {dimension_numbers = #tpu.dot_dimension_numbers<[1], [0], [0], [1], [0, 0, 1, 1], [], []>} : vector<8x8xf32>, vector<8x8xf32>, vector<8x8xf32> -> vector<8x8xf32>
    %336 = vector.extract_strided_slice %239 {offsets = [2, 0, 0], sizes = [1, 8, 128], strides = [1, 1, 1]} : vector<4x8x128xf32> to vector<1x8x128xf32>
    %337 = vector.shape_cast %336 : vector<1x8x128xf32> to vector<8x128xf32>
    %cst_136 = arith.constant dense<0.000000e+00> : vector<8x128xf32>
    %338 = tpu.matmul %335, %337, %cst_136 {dimension_numbers = #tpu.dot_dimension_numbers<[1], [0], [0], [1], [0, 0, 1, 1], [], []>} : vector<8x8xf32>, vector<8x128xf32>, vector<8x128xf32> -> vector<8x128xf32>
    %339 = arith.addf %313, %338 : vector<8x128xf32>
    %340 = vector.extract_strided_slice %262 {offsets = [3, 0, 0], sizes = [1, 8, 8], strides = [1, 1, 1]} : vector<48x8x8xf32> to vector<1x8x8xf32>
    %341 = vector.shape_cast %340 : vector<1x8x8xf32> to vector<8x8xf32>
    %342 = vector.extract_strided_slice %262 {offsets = [19, 0, 0], sizes = [1, 8, 8], strides = [1, 1, 1]} : vector<48x8x8xf32> to vector<1x8x8xf32>
    %343 = vector.shape_cast %342 : vector<1x8x8xf32> to vector<8x8xf32>
    %344 = vector.extract_strided_slice %262 {offsets = [35, 0, 0], sizes = [1, 8, 8], strides = [1, 1, 1]} : vector<48x8x8xf32> to vector<1x8x8xf32>
    %345 = vector.shape_cast %344 : vector<1x8x8xf32> to vector<8x8xf32>
    %346 = tpu.transpose %341, [1, 0] : vector<8x8xf32> -> vector<8x8xf32>
    %cst_137 = arith.constant dense<0.000000e+00> : vector<8x8xf32>
    %347 = tpu.matmul %346, %343, %cst_137 {dimension_numbers = #tpu.dot_dimension_numbers<[1], [0], [0], [1], [0, 0, 1, 1], [], []>} : vector<8x8xf32>, vector<8x8xf32>, vector<8x8xf32> -> vector<8x8xf32>
    %348 = vector.broadcast %3 : vector<1x8xf32> to vector<8x8xf32>
    %349 = arith.addf %347, %348 : vector<8x8xf32>
    %cst_138 = arith.constant dense<0xFF800000> : vector<8xf32>
    %350 = vector.multi_reduction <maximumf>, %349, %cst_138 [1] : vector<8x8xf32> to vector<8xf32>
    %351 = vector.shape_cast %350 : vector<8xf32> to vector<8x1xf32>
    %352 = vector.broadcast %351 : vector<8x1xf32> to vector<8x8xf32>
    %353 = arith.subf %349, %352 : vector<8x8xf32>
    %354 = math.exp %353 : vector<8x8xf32>
    %cst_139 = arith.constant dense<0.000000e+00> : vector<8xf32>
    %355 = vector.multi_reduction <add>, %354, %cst_139 [1] : vector<8x8xf32> to vector<8xf32>
    %356 = vector.shape_cast %355 : vector<8xf32> to vector<8x1xf32>
    %357 = tpu.reciprocal %356 {approx = true} : vector<8x1xf32> -> vector<8x1xf32>
    %358 = vector.broadcast %357 : vector<8x1xf32> to vector<8x8xf32>
    %359 = arith.mulf %354, %358 : vector<8x8xf32>
    %360 = tpu.transpose %345, [1, 0] : vector<8x8xf32> -> vector<8x8xf32>
    %cst_140 = arith.constant dense<0.000000e+00> : vector<8x8xf32>
    %361 = tpu.matmul %359, %360, %cst_140 {dimension_numbers = #tpu.dot_dimension_numbers<[1], [0], [0], [1], [0, 0, 1, 1], [], []>} : vector<8x8xf32>, vector<8x8xf32>, vector<8x8xf32> -> vector<8x8xf32>
    %362 = vector.extract_strided_slice %239 {offsets = [3, 0, 0], sizes = [1, 8, 128], strides = [1, 1, 1]} : vector<4x8x128xf32> to vector<1x8x128xf32>
    %363 = vector.shape_cast %362 : vector<1x8x128xf32> to vector<8x128xf32>
    %cst_141 = arith.constant dense<0.000000e+00> : vector<8x128xf32>
    %364 = tpu.matmul %361, %363, %cst_141 {dimension_numbers = #tpu.dot_dimension_numbers<[1], [0], [0], [1], [0, 0, 1, 1], [], []>} : vector<8x8xf32>, vector<8x128xf32>, vector<8x128xf32> -> vector<8x128xf32>
    %365 = arith.addf %339, %364 : vector<8x128xf32>
    %366 = vector.broadcast %241 : vector<1x128xf32> to vector<8x128xf32>
    %367 = arith.addf %365, %366 : vector<8x128xf32>
    %368 = arith.addf %232, %367 : vector<8x128xf32>
    %cst_142 = arith.constant dense<0.000000e+00> : vector<8xf32>
    %369 = vector.multi_reduction <add>, %368, %cst_142 [1] : vector<8x128xf32> to vector<8xf32>
    %370 = vector.shape_cast %369 : vector<8xf32> to vector<8x1xf32>
    %cst_143 = arith.constant 3.125000e-02 : f32
    %371 = vector.broadcast %cst_143 : f32 to vector<8x1xf32>
    %372 = arith.mulf %370, %371 : vector<8x1xf32>
    %373 = vector.broadcast %372 : vector<8x1xf32> to vector<8x128xf32>
    %374 = arith.subf %368, %373 : vector<8x128xf32>
    %375 = vector.broadcast %8 : vector<1x128xf32> to vector<8x128xf32>
    %376 = arith.mulf %374, %375 : vector<8x128xf32>
    %377 = arith.mulf %376, %376 : vector<8x128xf32>
    %cst_144 = arith.constant dense<0.000000e+00> : vector<8xf32>
    %378 = vector.multi_reduction <add>, %377, %cst_144 [1] : vector<8x128xf32> to vector<8xf32>
    %379 = vector.shape_cast %378 : vector<8xf32> to vector<8x1xf32>
    %cst_145 = arith.constant 3.125000e-02 : f32
    %380 = vector.broadcast %cst_145 : f32 to vector<8x1xf32>
    %381 = arith.mulf %379, %380 : vector<8x1xf32>
    %cst_146 = arith.constant 9.99999974E-6 : f32
    %382 = vector.broadcast %cst_146 : f32 to vector<8x1xf32>
    %383 = arith.addf %381, %382 : vector<8x1xf32>
    %384 = math.rsqrt %383 : vector<8x1xf32>
    %385 = vector.broadcast %384 : vector<8x1xf32> to vector<8x128xf32>
    %386 = arith.mulf %376, %385 : vector<8x128xf32>
    %387 = vector.broadcast %243 : vector<1x128xf32> to vector<8x128xf32>
    %388 = arith.mulf %386, %387 : vector<8x128xf32>
    %389 = vector.broadcast %245 : vector<1x128xf32> to vector<8x128xf32>
    %390 = arith.addf %388, %389 : vector<8x128xf32>
    %cst_147 = arith.constant dense<0.000000e+00> : vector<8x128xf32>
    %391 = tpu.matmul %390, %247, %cst_147 {dimension_numbers = #tpu.dot_dimension_numbers<[1], [0], [0], [1], [0, 0, 1, 1], [], []>} : vector<8x128xf32>, vector<128x128xf32>, vector<8x128xf32> -> vector<8x128xf32>
    %392 = vector.broadcast %249 : vector<1x128xf32> to vector<8x128xf32>
    %393 = arith.addf %391, %392 : vector<8x128xf32>
    %cst_148 = arith.constant 5.000000e-01 : f32
    %394 = vector.broadcast %cst_148 : f32 to vector<8x128xf32>
    %395 = arith.mulf %394, %393 : vector<8x128xf32>
    %cst_149 = arith.constant 4.471500e-02 : f32
    %396 = vector.broadcast %cst_149 : f32 to vector<8x128xf32>
    %397 = arith.mulf %396, %393 : vector<8x128xf32>
    %398 = arith.mulf %397, %393 : vector<8x128xf32>
    %399 = arith.mulf %398, %393 : vector<8x128xf32>
    %400 = arith.addf %393, %399 : vector<8x128xf32>
    %cst_150 = arith.constant 0.797884583 : f32
    %401 = vector.broadcast %cst_150 : f32 to vector<8x128xf32>
    %402 = arith.mulf %401, %400 : vector<8x128xf32>
    %403 = math.tanh %402 : vector<8x128xf32>
    %cst_151 = arith.constant 1.000000e+00 : f32
    %404 = vector.broadcast %cst_151 : f32 to vector<8x128xf32>
    %405 = arith.addf %404, %403 : vector<8x128xf32>
    %406 = arith.mulf %395, %405 : vector<8x128xf32>
    %cst_152 = arith.constant dense<0.000000e+00> : vector<8x128xf32>
    %407 = tpu.matmul %406, %251, %cst_152 {dimension_numbers = #tpu.dot_dimension_numbers<[1], [0], [0], [1], [0, 0, 1, 1], [], []>} : vector<8x128xf32>, vector<128x128xf32>, vector<8x128xf32> -> vector<8x128xf32>
    %408 = vector.broadcast %253 : vector<1x128xf32> to vector<8x128xf32>
    %409 = arith.addf %407, %408 : vector<8x128xf32>
    %410 = arith.addf %390, %409 : vector<8x128xf32>
    %cst_153 = arith.constant dense<0.000000e+00> : vector<8xf32>
    %411 = vector.multi_reduction <add>, %410, %cst_153 [1] : vector<8x128xf32> to vector<8xf32>
    %412 = vector.shape_cast %411 : vector<8xf32> to vector<8x1xf32>
    %cst_154 = arith.constant 3.125000e-02 : f32
    %413 = vector.broadcast %cst_154 : f32 to vector<8x1xf32>
    %414 = arith.mulf %412, %413 : vector<8x1xf32>
    %415 = vector.broadcast %414 : vector<8x1xf32> to vector<8x128xf32>
    %416 = arith.subf %410, %415 : vector<8x128xf32>
    %417 = vector.broadcast %8 : vector<1x128xf32> to vector<8x128xf32>
    %418 = arith.mulf %416, %417 : vector<8x128xf32>
    %419 = arith.mulf %418, %418 : vector<8x128xf32>
    %cst_155 = arith.constant dense<0.000000e+00> : vector<8xf32>
    %420 = vector.multi_reduction <add>, %419, %cst_155 [1] : vector<8x128xf32> to vector<8xf32>
    %421 = vector.shape_cast %420 : vector<8xf32> to vector<8x1xf32>
    %cst_156 = arith.constant 3.125000e-02 : f32
    %422 = vector.broadcast %cst_156 : f32 to vector<8x1xf32>
    %423 = arith.mulf %421, %422 : vector<8x1xf32>
    %cst_157 = arith.constant 9.99999974E-6 : f32
    %424 = vector.broadcast %cst_157 : f32 to vector<8x1xf32>
    %425 = arith.addf %423, %424 : vector<8x1xf32>
    %426 = math.rsqrt %425 : vector<8x1xf32>
    %427 = vector.broadcast %426 : vector<8x1xf32> to vector<8x128xf32>
    %428 = arith.mulf %418, %427 : vector<8x128xf32>
    %429 = vector.broadcast %255 : vector<1x128xf32> to vector<8x128xf32>
    %430 = arith.mulf %428, %429 : vector<8x128xf32>
    %431 = vector.broadcast %257 : vector<1x128xf32> to vector<8x128xf32>
    %432 = arith.addf %430, %431 : vector<8x128xf32>
    %433 = vector.extract_strided_slice %432 {offsets = [0, 0], sizes = [1, 128], strides = [1, 1]} : vector<8x128xf32> to vector<1x128xf32>
    %c0_158 = arith.constant 0 : index
    %c0_159 = arith.constant 0 : index
    %434 = vector.load %arg17[%c0_158, %c0_159] : memref<128x128xf32, #tpu.memory_space<vmem>>, vector<128x128xf32>
    %cst_160 = arith.constant dense<0.000000e+00> : vector<1x128xf32>
    %435 = tpu.matmul %433, %434, %cst_160 {dimension_numbers = #tpu.dot_dimension_numbers<[1], [0], [0], [1], [0, 0, 1, 1], [], []>} : vector<1x128xf32>, vector<128x128xf32>, vector<1x128xf32> -> vector<1x128xf32>
    %c0_161 = arith.constant 0 : index
    %c0_162 = arith.constant 0 : index
    %436 = vector.load %arg18[%c0_161, %c0_162] : memref<1x128xf32, #tpu.memory_space<vmem>>, vector<1x128xf32>
    %437 = arith.addf %435, %436 : vector<1x128xf32>
    %438 = math.tanh %437 : vector<1x128xf32>
    %c0_163 = arith.constant 0 : index
    %c0_164 = arith.constant 0 : index
    %439 = vector.load %arg19[%c0_163, %c0_164] : memref<128x128xf32, #tpu.memory_space<vmem>>, vector<128x128xf32>
    %cst_165 = arith.constant dense<0.000000e+00> : vector<1x128xf32>
    %440 = tpu.matmul %438, %439, %cst_165 {dimension_numbers = #tpu.dot_dimension_numbers<[1], [0], [0], [1], [0, 0, 1, 1], [], []>} : vector<1x128xf32>, vector<128x128xf32>, vector<1x128xf32> -> vector<1x128xf32>
    %c0_166 = arith.constant 0 : index
    %c0_167 = arith.constant 0 : index
    %441 = vector.load %arg20[%c0_166, %c0_167] : memref<1x128xf32, #tpu.memory_space<vmem>>, vector<1x128xf32>
    %442 = arith.addf %440, %441 : vector<1x128xf32>
    %c0_168 = arith.constant 0 : index
    %c0_169 = arith.constant 0 : index
    %c0_170 = arith.constant 0 : index
    %443 = vector.load %arg21[%c0_168, %c0_169, %c0_170] : memref<1x1x128xf32, #tpu.memory_space<vmem>>, vector<1x1x128xf32>
    %444 = vector.shape_cast %443 : vector<1x1x128xf32> to vector<1x128xf32>
    %445 = vector.shape_cast %442 : vector<1x128xf32> to vector<1x1x128xf32>
    tpu.vector_store %arg21[%c0_168, %c0_169, %c0_170], %445 {strides = array<i32>} : memref<1x1x128xf32, #tpu.memory_space<vmem>>, vector<1x1x128xf32>,
    return
  }
  func.func @transform_0(%arg0: i32) -> (i32, i32, i32) {
    %c0_i32 = arith.constant 0 : i32
    %c0_i32_0 = arith.constant 0 : i32
    %c0_i32_1 = arith.constant 0 : i32
    return %arg0, %c0_i32, %c0_i32_0 : i32, i32, i32
  }
  func.func @transform_1(%arg0: i32) -> (i32, i32, i32) {
    %c0_i32 = arith.constant 0 : i32
    %c0_i32_0 = arith.constant 0 : i32
    %c0_i32_1 = arith.constant 0 : i32
    return %arg0, %c0_i32, %c0_i32_0 : i32, i32, i32
  }
  func.func @transform_2(%arg0: i32) -> (i32, i32) {
    %c0_i32 = arith.constant 0 : i32
    %c0_i32_0 = arith.constant 0 : i32
    %c0_i32_1 = arith.constant 0 : i32
    return %c0_i32, %c0_i32_0 : i32, i32
  }
  func.func @transform_3(%arg0: i32) -> (i32, i32) {
    %c0_i32 = arith.constant 0 : i32
    %c0_i32_0 = arith.constant 0 : i32
    %c0_i32_1 = arith.constant 0 : i32
    return %c0_i32, %c0_i32_0 : i32, i32
  }
  func.func @transform_4(%arg0: i32) -> (i32, i32, i32) {
    %c0_i32 = arith.constant 0 : i32
    %c0_i32_0 = arith.constant 0 : i32
    %c0_i32_1 = arith.constant 0 : i32
    %c0_i32_2 = arith.constant 0 : i32
    return %c0_i32, %c0_i32_0, %c0_i32_1 : i32, i32, i32
  }
  func.func @transform_5(%arg0: i32) -> (i32, i32, i32) {
    %c0_i32 = arith.constant 0 : i32
    %c0_i32_0 = arith.constant 0 : i32
    %c0_i32_1 = arith.constant 0 : i32
    %c0_i32_2 = arith.constant 0 : i32
    return %c0_i32, %c0_i32_0, %c0_i32_1 : i32, i32, i32
  }
  func.func @transform_6(%arg0: i32) -> (i32, i32, i32) {
    %c0_i32 = arith.constant 0 : i32
    %c0_i32_0 = arith.constant 0 : i32
    %c0_i32_1 = arith.constant 0 : i32
    %c0_i32_2 = arith.constant 0 : i32
    return %c0_i32, %c0_i32_0, %c0_i32_1 : i32, i32, i32
  }
  func.func @transform_7(%arg0: i32) -> (i32, i32, i32) {
    %c0_i32 = arith.constant 0 : i32
    %c0_i32_0 = arith.constant 0 : i32
    %c0_i32_1 = arith.constant 0 : i32
    %c0_i32_2 = arith.constant 0 : i32
    return %c0_i32, %c0_i32_0, %c0_i32_1 : i32, i32, i32
  }
  func.func @transform_8(%arg0: i32) -> (i32, i32, i32) {
    %c0_i32 = arith.constant 0 : i32
    %c0_i32_0 = arith.constant 0 : i32
    %c0_i32_1 = arith.constant 0 : i32
    %c0_i32_2 = arith.constant 0 : i32
    return %c0_i32, %c0_i32_0, %c0_i32_1 : i32, i32, i32
  }
  func.func @transform_9(%arg0: i32) -> (i32, i32, i32) {
    %c0_i32 = arith.constant 0 : i32
    %c0_i32_0 = arith.constant 0 : i32
    %c0_i32_1 = arith.constant 0 : i32
    %c0_i32_2 = arith.constant 0 : i32
    return %c0_i32, %c0_i32_0, %c0_i32_1 : i32, i32, i32
  }
  func.func @transform_10(%arg0: i32) -> (i32, i32, i32) {
    %c0_i32 = arith.constant 0 : i32
    %c0_i32_0 = arith.constant 0 : i32
    %c0_i32_1 = arith.constant 0 : i32
    %c0_i32_2 = arith.constant 0 : i32
    return %c0_i32, %c0_i32_0, %c0_i32_1 : i32, i32, i32
  }
  func.func @transform_11(%arg0: i32) -> (i32, i32, i32) {
    %c0_i32 = arith.constant 0 : i32
    %c0_i32_0 = arith.constant 0 : i32
    %c0_i32_1 = arith.constant 0 : i32
    %c0_i32_2 = arith.constant 0 : i32
    return %c0_i32, %c0_i32_0, %c0_i32_1 : i32, i32, i32
  }
  func.func @transform_12(%arg0: i32) -> (i32, i32, i32) {
    %c0_i32 = arith.constant 0 : i32
    %c0_i32_0 = arith.constant 0 : i32
    %c0_i32_1 = arith.constant 0 : i32
    %c0_i32_2 = arith.constant 0 : i32
    return %c0_i32, %c0_i32_0, %c0_i32_1 : i32, i32, i32
  }
  func.func @transform_13(%arg0: i32) -> (i32, i32, i32) {
    %c0_i32 = arith.constant 0 : i32
    %c0_i32_0 = arith.constant 0 : i32
    %c0_i32_1 = arith.constant 0 : i32
    %c0_i32_2 = arith.constant 0 : i32
    return %c0_i32, %c0_i32_0, %c0_i32_1 : i32, i32, i32
  }
  func.func @transform_14(%arg0: i32) -> (i32, i32, i32) {
    %c0_i32 = arith.constant 0 : i32
    %c0_i32_0 = arith.constant 0 : i32
    %c0_i32_1 = arith.constant 0 : i32
    %c0_i32_2 = arith.constant 0 : i32
    return %c0_i32, %c0_i32_0, %c0_i32_1 : i32, i32, i32
  }
  func.func @transform_15(%arg0: i32) -> (i32, i32, i32) {
    %c0_i32 = arith.constant 0 : i32
    %c0_i32_0 = arith.constant 0 : i32
    %c0_i32_1 = arith.constant 0 : i32
    %c0_i32_2 = arith.constant 0 : i32
    return %c0_i32, %c0_i32_0, %c0_i32_1 : i32, i32, i32
  }
  func.func @transform_16(%arg0: i32) -> (i32, i32) {
    %c0_i32 = arith.constant 0 : i32
    %c0_i32_0 = arith.constant 0 : i32
    %c0_i32_1 = arith.constant 0 : i32
    return %c0_i32, %c0_i32_0 : i32, i32
  }
  func.func @transform_17(%arg0: i32) -> (i32, i32) {
    %c0_i32 = arith.constant 0 : i32
    %c0_i32_0 = arith.constant 0 : i32
    %c0_i32_1 = arith.constant 0 : i32
    return %c0_i32, %c0_i32_0 : i32, i32
  }
  func.func @transform_18(%arg0: i32) -> (i32, i32) {
    %c0_i32 = arith.constant 0 : i32
    %c0_i32_0 = arith.constant 0 : i32
    %c0_i32_1 = arith.constant 0 : i32
    return %c0_i32, %c0_i32_0 : i32, i32
  }
  func.func @transform_19(%arg0: i32) -> (i32, i32) {
    %c0_i32 = arith.constant 0 : i32
    %c0_i32_0 = arith.constant 0 : i32
    %c0_i32_1 = arith.constant 0 : i32
    return %c0_i32, %c0_i32_0 : i32, i32
  }
  func.func @transform_20(%arg0: i32) -> (i32, i32, i32) {
    %c0_i32 = arith.constant 0 : i32
    %c0_i32_0 = arith.constant 0 : i32
    %c0_i32_1 = arith.constant 0 : i32
    return %arg0, %c0_i32, %c0_i32_0 : i32, i32, i32
  }
}

</mosaic_0001>

<bundles_post_ra>
// kernel: tpu_custom_call.1
= control target key start
LH: loop header
LB: loop body
LE: loop exit
PB: predicated region body
PF: predicated region fallthrough
CT: control target
= control target key end

     0   :  { %s7479_s0 = inlined_call_operand.vmem [shape: f32[2,8,128], index: 0, kind: input, shape index: {}]   ;;  %s7480_s1 = inlined_call_operand.vmem [shape: f32[2,1,8], index: 1, kind: input, shape index: {}]   ;;  %s7481_s2 = inlined_call_operand.hbm [shape: f32[1,128], index: 2, kind: input, shape index: {}]   ;;  %s7482_s3 = inlined_call_operand.hbm [shape: f32[1,128], index: 3, kind: input, shape index: {}]   ;;  %s7483_s4 = inlined_call_operand.vmem [shape: f32[2,384,128], index: 4, kind: input, shape index: {}]   ;;  %s7484_s5 = inlined_call_operand.vmem [shape: f32[2,384,1], index: 5, kind: input, shape index: {}]   ;;  %s7485_s6 = inlined_call_operand.hbm [shape: f32[2,32,128], index: 6, kind: input, shape index: {}]   ;;  %s7486_s7 = inlined_call_operand.vmem [shape: f32[2,1,128], index: 7, kind: input, shape index: {}]   ;;  %s7487_s8 = inlined_call_operand.vmem [shape: f32[2,1,128], index: 8, kind: input, shape index: {}]   ;;  %s7488_s9 = inlined_call_operand.vmem [shape: f32[2,1,128], index: 9, kind: input, shape index: {}]   ;;  %s7489_s10 = inlined_call_operand.hbm [shape: f32[2,128,128], index: 10, kind: input, shape index: {}]   ;;  %s7490_s11 = inlined_call_operand.vmem [shape: f32[2,1,128], index: 11, kind: input, shape index: {}]   ;;  %s7491_s12 = inlined_call_operand.hbm [shape: f32[2,128,128], index: 12, kind: input, shape index: {}]   ;;  %s7492_s13 = inlined_call_operand.vmem [shape: f32[2,1,128], index: 13, kind: input, shape index: {}]   ;;  %s7493_s14 = inlined_call_operand.vmem [shape: f32[2,1,128], index: 14, kind: input, shape index: {}]   ;;  %s7494_s15 = inlined_call_operand.vmem [shape: f32[2,1,128], index: 15, kind: input, shape index: {}]   ;;  %s7495_s16 = inlined_call_operand.hbm [shape: f32[128,128], index: 16, kind: input, shape index: {}]   ;;  %s7496_s17 = inlined_call_operand.vmem [shape: f32[1,128], index: 17, kind: input, shape index: {}]   ;;  %s7497_s18 = inlined_call_operand.hbm [shape: f32[128,128], index: 18, kind: input, shape index: {}]   ;;  %s7498_s19 = inlined_call_operand.vmem [shape: f32[1,128], index: 19, kind: input, shape index: {}]   ;;  %s7499_s20 = inlined_call_operand.hbm [shape: f32[2,1,128], index: 20, kind: output, shape index: {}]  }
   0x1   :  { %7518 = sst [smem:[#allocation28_spill]] %s7479_s0 }
   0x2   :  { %7519 = sst [smem:[#allocation29_spill]] %s7480_s1 }
   0x3   :  { %7520 = sst [smem:[#allocation30_spill]] %s7481_s2 }
   0x4   :  { %7521 = sst [smem:[#allocation31_spill]] %s7482_s3 }
   0x5   :  { %7522 = sst [smem:[#allocation32_spill]] %s7483_s4 }
   0x6   :  { %7523 = sst [smem:[#allocation33_spill]] %s7489_s10 }
   0x7   :  { %7524 = sst [smem:[#allocation34_spill]] %s7494_s15 }
   0x8   :  { %7525 = sst [smem:[#allocation35_spill]] %s7496_s17 }
   0x9   :  { %7526 = sst [smem:[#allocation36_spill]] %s7498_s19 }
   0xa   :  { %7527 = sst [smem:[#allocation37_spill]] %s7499_s20 }
   0xb   :  { %25 = vsyncpa [#allocation3], 0 }
   0xc   :  { %26 = vsyncpa [#allocation6], 0 }
   0xd   :  { %27 = vsyncpa [#allocation9], 0 }
   0xe   :  { %28 = vsyncpa [#allocation12], 0 }
   0xf   :  { %29 = vsyncpa [#allocation4], 0 }
  0x10   :  { %31 = vsyncpa [#allocation4 + $0x1], 0  ;;  %s6511_s1 = smov 0   ;;  %s6513_s22 = smov 0  }
  0x11   :  { %s6515_s23 = smov 0   ;;  %s6517_s24 = smov 0  }
  0x12 LB: > { %7528 = sst [smem:[#allocation20_spill]] %s6378_s1  ;;  %s6532_s2 = sadd.s32 4294967295, %s6390_s24   ;;  %s6390_s24 = sphi %s6517_s24, %s7568_s24   ;;  %s6386_s23 = sphi %s6515_s23, %s7571_s23   ;;  %s6382_s22 = sphi %s6513_s22, %s7570_s22   ;;  %s6378_s1 = sphi %s6511_s1, %s7569_s1  }
  0x13   : > { %7529 = sst [smem:[#allocation21_spill]] %s6382_s22  ;;  %s4904_s25 = sadd.s32 4294967294, %s6390_s24  }
  0x14   : > { %7530 = sst [smem:[#allocation22_spill]] %s6386_s23  ;;  %s6536_s3 = sadd.s32 1, %s6390_s24  }
  0x15   : > { %7531 = sst [smem:[#allocation23_spill]] %s6390_s24  ;;  %s474_s26 = sadd.s32 1, %s6386_s23 }
  0x16   : > { %7532 = sst [smem:[#allocation24_spill]] %s6536_s3  ;;  %s471_s27 = ssub.s32 %s6390_s24, %s6536_s3 }
  0x17   : > { %p484_p0 = scmp.ne.s32.totalorder %s6386_s23, %s6382_s22  ;;  %p472_p1 = scmp.eq.s32.totalorder %s471_s27, 0 }
  0x18   : > { %p485_p2 = scmp.eq.s32.totalorder %s6532_s2, 1  ;;  %p490_p3 = scmp.ne.s32.totalorder %s6382_s22, %s6378_s1 }
  0x19   : > { %p491_p4 = scmp.eq.s32.totalorder %s4904_s25, 1  ;;  %p4905_p7 = scmp.ge.s32.totalorder %s6390_s24, 1 }
  0x1a   : > { %s6547_s28 = scalar_select %p472_p1, %s6386_s23, %s474_s26  }
  0x1b   : > { %p6549_p5 = por %p485_p2, %p484_p0  ;;  %p6553_p6 = por %p491_p4, %p490_p3 }
  0x1c   : > { %7533 = sst [smem:[#allocation25_spill]] %s6547_s28  ;;  %p498_p8 = scmp.lt.s32.totalorder %s6390_s24, 3 }
  0x1d   : > { %s7534_s4 = scalar_select %p6549_p5, 1, 0 }
  0x1e   : > { %s7536_s29 = scalar_select %p6553_p6, 1, 0 }
  0x1f   : > { %7535 = sst [smem:[#allocation26_spill]] %s7534_s4  ;;  %p7512_p9 = scmp.eq.s32.totalorder %s6532_s2, 0 }
  0x20   : > { %7537 = sst [smem:[#allocation27_spill]] %s7536_s29  ;;  %p6560_p10 = pnand %p4905_p7, %p498_p8 }
  0x21   : > { %s6392_s0 = smov [#allocation5]   ;;  %s6393_s26 = smov [#allocation8]  }
  0x22   : > { %s7538_s30 = scalar_select %p6560_p10, 1, 0 }
  0x23   : > { %s522_s21 = sshll.u32 %s6392_s0, 4  ;;  %p5979_p11 = pneg %p6560_p10  ;;  %s523_s21 = int_to_ptr.vmem [resolvable:$true] %s522_s21 }
  0x24   : > { %s560_s27 = sshll.u32 %s6393_s26, 4  ;;  %s6394_s28 = smov [#allocation11]   ;;  %s6572_s27 = int_to_ptr.vmem [resolvable:$true] %s560_s27 }
  0x25   : > { %p6568_p12 = pnand %p7512_p9, %p5979_p11  ;;  %s6574_s23 = sshll.u32 %s6394_s28, 4  ;;  %s599_s23 = int_to_ptr.vmem [resolvable:$true] %s6574_s23 }
  0x26   : > { %s7540_s1 = sld [smem:[#allocation31_spill]] }
  0x27   : > { %p6584_p0 = pneg %p6568_p12 }
  0x2c   : > { %s7541_s20 = smov %s7540_s1  ;;  %s6116_s0 = scalar_lea.hbm %s7540_s1, 16 }
  0x2d   : > { %p6117_p13 = scmp.ne.s32.totalorder %s7541_s20, %s6116_s0  ;;  %p6123_p3 = scmp.lt.u32.totalorder %s6116_s0, %s7541_s20 }
  0x2f   : > { %p6119_p1 = pnand %p6584_p0, %p6117_p13 }
  0x31   : > { %p6120_p2 = pneg %p6119_p1 }
  0x33   : > { %p6125_p4 = pnand %p6123_p3, %p6120_p2 }
  0x35   : > { %6128 = shalt.err (!%p6125_p4)
}
  0x36   : > { %s6129_s1 = scalar_lea.vmem %s523_s21, 16  ;;  %s6136_s19 = scalar_lea.vmem %s523_s21, 32 }
  0x37   : > { %p6130_p7 = scmp.ne.s32.totalorder %s523_s21, %s6129_s1  ;;  %p6137_p9 = scmp.lt.s32.totalorder %s523_s21, %s523_s21 }
  0x38   : > { %p6138_p6 = scmp.lt.s32.totalorder %s6136_s19, %s6129_s1 }
  0x39   : > { %p6132_p8 = pnand %p6130_p7, %p6584_p0 }
  0x3a   : > { %p6139_p5 = por %p6138_p6, %p6137_p9 }
  0x3b   : > { %p6133_p11 = pneg %p6132_p8 }
  0x3d   : > { %p6140_p10 = pnand %p6139_p5, %p6133_p11 }
  0x3f   : > { %6143 = shalt.err (!%p6140_p10)
}
  0x40   : > { %5985 = dma.hbm_to_vmem [thread:$0]  (!%p6568_p12), %s7541_s20, 16, %s523_s21, [#allocation6]  }
  0x41   : > { %s7543_s10 = sld [smem:[#allocation33_spill]] }
  0x47   : > { %s6144_s26 = scalar_lea.hbm %s7543_s10, 4096 }
  0x48   : > { %p6145_p13 = scmp.ne.s32.totalorder %s7543_s10, %s6144_s26  ;;  %p6151_p5 = scmp.lt.u32.totalorder %s6144_s26, %s7543_s10 }
  0x4a   : > { %p6147_p1 = pnand %p6145_p13, %p6584_p0 }
  0x4c   : > { %p6148_p6 = pneg %p6147_p1 }
  0x4e   : > { %p6153_p9 = pnand %p6151_p5, %p6148_p6 }
  0x50   : > { %6156 = shalt.err (!%p6153_p9)
}
  0x51   : > { %s6157_s21 = scalar_lea.vmem %s6572_s27, 4096  ;;  %p6165_p4 = scmp.lt.s32.totalorder %s6572_s27, %s6572_s27 }
  0x52   : > { %p6158_p10 = scmp.ne.s32.totalorder %s6572_s27, %s6157_s21  ;;  %p6166_p7 = scmp.lt.s32.totalorder %s6157_s21, %s6157_s21 }
  0x54   : > { %p6160_p2 = pnand %p6158_p10, %p6584_p0  ;;  %p6167_p8 = por %p6166_p7, %p6165_p4 }
  0x56   : > { %p6161_p3 = pneg %p6160_p2 }
  0x58   : > { %p6168_p11 = pnand %p6167_p8, %p6161_p3 }
  0x5a   : > { %6171 = shalt.err (!%p6168_p11)
}
  0x5b   : > { %s6395_s17 = smov 128   ;;  %s6396_s24 = smov 8  }
  0x5c   : > { %5991 = dma.hbm_to_vmem [thread:$0]  (!%p6568_p12), %s7543_s10, 4096, %s6572_s27, [#allocation9], %s6395_s17, %s6395_s17, %s6396_s24  }
  0x5d   : > { %s6172_s28 = scalar_lea.hbm %s7495_s16, 2048 }
  0x5e   : > { %p6173_p13 = scmp.ne.s32.totalorder %s7495_s16, %s6172_s28  ;;  %p6179_p5 = scmp.lt.u32.totalorder %s6172_s28, %s7495_s16 }
  0x60   : > { %p6175_p1 = pnand %p6173_p13, %p6584_p0 }
  0x62   : > { %p6176_p6 = pneg %p6175_p1 }
  0x64   : > { %p6181_p9 = pnand %p6179_p5, %p6176_p6 }
  0x66   : > { %6184 = shalt.err (!%p6181_p9)
}
  0x67   : > { %s6185_s3 = scalar_lea.vmem %s599_s23, 2048  ;;  %p6193_p4 = scmp.lt.s32.totalorder %s599_s23, %s599_s23 }
  0x68   : > { %p6186_p10 = scmp.ne.s32.totalorder %s599_s23, %s6185_s3  ;;  %p6194_p7 = scmp.lt.s32.totalorder %s6185_s3, %s6185_s3 }
  0x6a   : > { %p6188_p2 = pnand %p6186_p10, %p6584_p0  ;;  %p6195_p8 = por %p6194_p7, %p6193_p4 }
  0x6c   : > { %p6189_p3 = pneg %p6188_p2 }
  0x6e   : > { %p6196_p11 = pnand %p6195_p8, %p6189_p3 }
  0x70   : > { %6199 = shalt.err (!%p6196_p11)
}
  0x71   : > { %5997 = dma.hbm_to_vmem [thread:$0]  (!%p6568_p12), %s7495_s16, 2048, %s599_s23, [#allocation12], %s6395_s17, %s6395_s17, %s6396_s24  }
  0x72   : > { %s6397_s29 = smov [#allocation2]   ;;  %s6398_s26 = smov [#allocation7]  }
  0x73   : > { %s511_s0 = sshll.u32 %s6397_s29, 4  ;;  %s538_s28 = sshll.u32 %s6398_s26, 4  ;;  %s512_s0 = int_to_ptr.vmem [resolvable:$true] %s511_s0  ;;  %s539_s28 = int_to_ptr.vmem [resolvable:$true] %s538_s28 }
  0x74   : > { %s7544_s21 = sld [smem:[#allocation30_spill]] }
  0x7a   : > { %s6200_s3 = scalar_lea.hbm %s7544_s21, 16 }
  0x7b   : > { %p6201_p13 = scmp.ne.s32.totalorder %s7544_s21, %s6200_s3  ;;  %p6207_p5 = scmp.lt.u32.totalorder %s6200_s3, %s7544_s21 }
  0x7d   : > { %p6203_p1 = pnand %p6201_p13, %p6584_p0 }
  0x7f   : > { %p6204_p6 = pneg %p6203_p1 }
  0x81   : > { %p6209_p9 = pnand %p6207_p5, %p6204_p6 }
  0x83   : > { %6212 = shalt.err (!%p6209_p9)
}
  0x84   : > { %s6213_s23 = scalar_lea.vmem %s512_s0, 16  ;;  %s6220_s27 = scalar_lea.vmem %s512_s0, 32 }
  0x85   : > { %p6214_p10 = scmp.ne.s32.totalorder %s512_s0, %s6213_s23  ;;  %p6221_p4 = scmp.lt.s32.totalorder %s512_s0, %s512_s0 }
  0x86   : > { %p6222_p7 = scmp.lt.s32.totalorder %s6220_s27, %s6213_s23 }
  0x87   : > { %p6216_p2 = pnand %p6214_p10, %p6584_p0 }
  0x88   : > { %p6223_p8 = por %p6222_p7, %p6221_p4 }
  0x89   : > { %p6217_p3 = pneg %p6216_p2 }
  0x8b   : > { %p6224_p11 = pnand %p6223_p8, %p6217_p3 }
  0x8d   : > { %6227 = shalt.err (!%p6224_p11)
}
  0x8e   : > { %5982 = dma.hbm_to_vmem [thread:$0]  (!%p6568_p12), %s7544_s21, 16, %s512_s0, [#allocation3]  }
  0x8f   : > { %s6228_s26 = scalar_lea.hbm %s7485_s6, 1024 }
  0x90   : > { %p6229_p13 = scmp.ne.s32.totalorder %s7485_s6, %s6228_s26  ;;  %p6235_p5 = scmp.lt.u32.totalorder %s6228_s26, %s7485_s6 }
  0x92   : > { %p6231_p1 = pnand %p6229_p13, %p6584_p0 }
  0x94   : > { %p6232_p6 = pneg %p6231_p1 }
  0x96   : > { %p6237_p9 = pnand %p6235_p5, %p6232_p6 }
  0x98   : > { %6240 = shalt.err (!%p6237_p9)
}
  0x99   : > { %s6241_s23 = scalar_lea.vmem %s539_s28, 1024  ;;  %p6249_p4 = scmp.lt.s32.totalorder %s539_s28, %s539_s28 }
  0x9a   : > { %p6242_p10 = scmp.ne.s32.totalorder %s539_s28, %s6241_s23  ;;  %p6250_p7 = scmp.lt.s32.totalorder %s6241_s23, %s6241_s23 }
  0x9c   : > { %p6244_p2 = pnand %p6242_p10, %p6584_p0  ;;  %p6251_p8 = por %p6250_p7, %p6249_p4 }
  0x9e   : > { %p6245_p3 = pneg %p6244_p2 }
  0xa0   : > { %p6252_p11 = pnand %p6251_p8, %p6245_p3 }
  0xa2   : > { %6255 = shalt.err (!%p6252_p11)
}
  0xa3   : > { %5988 = dma.hbm_to_vmem [thread:$0]  (!%p6568_p12), %s7485_s6, 1024, %s539_s28, [#allocation6], %s6395_s17, %s6395_s17, %s6396_s24  }
  0xa4   : > { %s6399_s10 = smov [#allocation10]   ;;  %s6400_s15 = smov [#allocation13]  }
  0xa5   : > { %s576_s22 = sshll.u32 %s6399_s10, 4  ;;  %s614_s29 = sshll.u32 %s6400_s15, 4  ;;  %s577_s22 = int_to_ptr.vmem [resolvable:$true] %s576_s22  ;;  %s615_s29 = int_to_ptr.vmem [resolvable:$true] %s614_s29 }
  0xa6   : > { %s6256_s19 = scalar_lea.hbm %s7491_s12, 4096 }
  0xa7   : > { %p6257_p13 = scmp.ne.s32.totalorder %s7491_s12, %s6256_s19  ;;  %p6263_p5 = scmp.lt.u32.totalorder %s6256_s19, %s7491_s12 }
  0xa9   : > { %p6259_p1 = pnand %p6257_p13, %p6584_p0 }
  0xab   : > { %p6260_p6 = pneg %p6259_p1 }
  0xad   : > { %p6265_p9 = pnand %p6263_p5, %p6260_p6 }
  0xaf   : > { %6268 = shalt.err (!%p6265_p9)
}
  0xb0   : > { %s6269_s28 = scalar_lea.vmem %s577_s22, 4096  ;;  %p6277_p4 = scmp.lt.s32.totalorder %s577_s22, %s577_s22 }
  0xb1   : > { %p6270_p10 = scmp.ne.s32.totalorder %s577_s22, %s6269_s28  ;;  %p6278_p7 = scmp.lt.s32.totalorder %s6269_s28, %s6269_s28 }
  0xb3   : > { %p6272_p2 = pnand %p6270_p10, %p6584_p0  ;;  %p6279_p8 = por %p6278_p7, %p6277_p4 }
  0xb5   : > { %p6273_p3 = pneg %p6272_p2 }
  0xb7   : > { %p6280_p11 = pnand %p6279_p8, %p6273_p3 }
  0xb9   : > { %6283 = shalt.err (!%p6280_p11)
}
  0xba   : > { %5994 = dma.hbm_to_vmem [thread:$0]  (!%p6568_p12), %s7491_s12, 4096, %s577_s22, [#allocation9], %s6395_s17, %s6395_s17, %s6396_s24  }
  0xbb   : > { %s6284_s1 = scalar_lea.hbm %s7497_s18, 2048 }
  0xbc   : > { %p6285_p13 = scmp.ne.s32.totalorder %s7497_s18, %s6284_s1  ;;  %p6291_p5 = scmp.lt.u32.totalorder %s6284_s1, %s7497_s18 }
  0xbe   : > { %p6287_p1 = pnand %p6285_p13, %p6584_p0 }
  0xc0   : > { %p6288_p6 = pneg %p6287_p1 }
  0xc2   : > { %p6293_p9 = pnand %p6291_p5, %p6288_p6 }
  0xc4   : > { %6296 = shalt.err (!%p6293_p9)
}
  0xc5   : > { %s6297_s0 = scalar_lea.vmem %s615_s29, 2048  ;;  %p6305_p4 = scmp.lt.s32.totalorder %s615_s29, %s615_s29 }
  0xc6   : > { %p6298_p10 = scmp.ne.s32.totalorder %s615_s29, %s6297_s0  ;;  %p6306_p7 = scmp.lt.s32.totalorder %s6297_s0, %s6297_s0 }
  0xc8   : > { %p6300_p2 = pnand %p6298_p10, %p6584_p0  ;;  %p6307_p8 = por %p6306_p7, %p6305_p4 }
  0xca   : > { %p6301_p3 = pneg %p6300_p2 }
  0xcc   : > { %p6308_p11 = pnand %p6307_p8, %p6301_p3 }
  0xce   : > { %6311 = shalt.err (!%p6308_p11)
}
  0xcf   : > { %6000 = dma.hbm_to_vmem [thread:$0]  (!%p6568_p12), %s7497_s18, 2048, %s615_s29, [#allocation12], %s6395_s17, %s6395_s17, %s6396_s24  }
  0xd0   : > { %p7545_p13 = scmp.ne.s32.totalorder %s7538_s30, 0 }
  0xd1   : > { %p7546_p0 = scmp.eq.s32.totalorder (!%p7545_p13), %s6532_s2, 0 }
  0xd2   : > { %646 = sbr.rel (%p7545_p13) target bundleno = 9851 (0x267b), region = 100 }
  0xd9   : > { %6357 = dma.done.wait (%p7546_p0), [#allocation3], 16   ;;  %p7547_p1 = pmov %p7546_p0 }
  0xda   : > { %p7548_p6 = pmov %p7546_p0 }
  0xdb   : > { %6359 = vsyncadd (%p7547_p1), [#allocation3], 4294967280 }
  0xdc   : > { %6361 = dma.done.wait (%p7548_p6), [#allocation6], 1040   ;;  %p7549_p5 = pmov %p7546_p0 }
  0xdd   : > { %p7550_p9 = pmov %p7546_p0 }
  0xde   : > { %6363 = vsyncadd (%p7549_p5), [#allocation6], 4294966256 }
  0xdf   : > { %6365 = dma.done.wait (%p7550_p9), [#allocation9], 8192   ;;  %p7551_p12 = pmov %p7546_p0 }
  0xe0   : > { %p7552_p10 = pmov %p7546_p0 }
  0xe1   : > { %6367 = vsyncadd (%p7551_p12), [#allocation9], 4294959104 }
  0xe2   : > { %6369 = dma.done.wait (%p7552_p10), [#allocation12], 4096   ;;  %p7553_p2 = pmov %p7546_p0 }
  0xe3   : > { %p729_p3 = scmp.lt.s32.totalorder %s6532_s2, 1  ;;  %s7554_s24 = sld [smem:[#allocation28_spill]]  ;;  %v6401_v1 = vmov 0.0   ;;  %v738_v2 = vlaneseq  ;;  %v819_v11 = vld [vmem:[%s7484_s5] sm:$0xff]  ;;  %v6402_v12 = vmov 0   ;;  %vm6403_vm1 = vmmov 0  }
  0xe4   : > { %6371 = vsyncadd (%p7553_p2), [#allocation12], 4294963200  ;;  %5401 = vmatprep.subr.mxu1 %v6401_v1  ;;  %s7555_s15 = sld [smem:[#allocation32_spill]]  ;;  %6065 = vset.pattern.permute.xlu1 %v6402_v12  ;;  %v835_v13 = vld [vmem:[%s7484_s5 + $0x80] sm:$0xff]  ;;  %vm1421_vm2 = vcmask 64512   ;;  %s7556_s28 = sld [smem:[#allocation29_spill]] }
  0xe5   : > { %s6749_s4 = scalar_select %p729_p3, %s6532_s2, 1  ;;  %v739_v3 = vand.u32 127, %v738_v2  ;;  %912 = vperm.xlu1 %6065, %v819_v11   ;;  %v4924_v18 = vld [vmem:[#allocation2] ss:$0 sm:$0xff]  ;;  %v4925_v20 = vld [vmem:[#allocation5] ss:$0 sm:$0xff]  ;;  %5403 = vmatprep.mubr.msk.f32.mxu1 %vm6403_vm1, %v6401_v1 }
  0xe6   : > { %s7558_s19 = sld [smem:[#allocation21_spill]]  ;;  %s7559_s23 = sld [smem:[#allocation35_spill]] }
  0xe7   : > { %s4922_s30 = sshll.u32 %s6749_s4, 3  ;;  %vm740_vm0 = vcmp.lt.s32.totalorder %v739_v3, 32  ;;  %s7560_s0 = sld [smem:[#allocation26_spill]] }
  0xe8   : > { %v6757_v6 = vsel %vm740_vm0, 1.0, %v6401_v1  ;;  %s7561_s17 = sld [smem:[#allocation36_spill]]  ;;  %s7562_s26 = sld [smem:[#allocation37_spill]] }
  0xe9   : > { %s732_s29 = scalar_lea.vmem %s7554_s24, %s4922_s30  ;;  %980 = vperm.xlu1 %6065, %v835_v13   ;;  %s5076_s24 = sshll.u32 %s6532_s2, 4 }
  0xea   : > { %v736_v0 = vld [vmem:[%s732_s29] sm:$0xff]  ;;  %v772_v23 = vld [vmem:[%s7555_s15 + $0x8] sm:$0xff]  ;;  %v773_v24 = vld [vmem:[%s7555_s15 + $0x10] sm:$0xff]  ;;  %s6896_s30 = scalar_lea.vmem %s7556_s28, %s6749_s4  ;;  %s7557_s4 = sld [smem:[#allocation34_spill]] }
  0xeb   : > { %745 = vadd.xlane.f32.xlu0 %v736_v0  ;;  %v771_v10 = vld [vmem:[%s7555_s15] sm:$0xff]  ;;  %v774_v25 = vld [vmem:[%s7555_s15 + $0x18] sm:$0xff]  ;;  %v776_v27 = vld [vmem:[%s7555_s15 + $0x28] sm:$0xff]  ;;  %s6405_s2 = smov [#allocation14]  }
  0xec   : > { %5329 = vmatprep.mubr.f32.mxu0 %v771_v10  ;;  %v775_v26 = vld [vmem:[%s7555_s15 + $0x20] sm:$0xff]  ;;  %v777_v28 = vld [vmem:[%s7555_s15 + $0x30] sm:$0xff]  ;;  %v778_v29 = vld [vmem:[%s7555_s15 + $0x38] sm:$0xff]  ;;  %s727_s22 = sand.u32 1, %s7558_s19   ;;  %s6316_s20 = sshll.u32 %s6405_s2, 4  ;;  %s6317_s20 = int_to_ptr.vmem [resolvable:$false] %s6316_s20 }
  0xed   : > { %v779_v30 = vld [vmem:[%s7555_s15 + $0x40] sm:$0xff]  ;;  %v780_v31 = vld [vmem:[%s7555_s15 + $0x48] sm:$0xff]  ;;  %v781_v32 = vld [vmem:[%s7555_s15 + $0x50] sm:$0xff]  ;;  %s728_s29 = scalar_lea.vmem [#allocation14], %s727_s22  ;;  %s4759_s19 = scalar_lea.sflag [#allocation4], %s727_s22 }
  0xee   : > { %v782_v33 = vld [vmem:[%s7555_s15 + $0x58] sm:$0xff]  ;;  %v783_v34 = vld [vmem:[%s7555_s15 + $0x60] sm:$0xff]  ;;  %v784_v35 = vld [vmem:[%s7555_s15 + $0x68] sm:$0xff]  ;;  %s4771_s27 = sshll.u32 %s728_s29, 4  ;;  %s7437_s1 = scalar_lea.hbm %s7562_s26, %s5076_s24  ;;  %s7439_s27 = int_to_ptr.vmem [resolvable:$true] %s4771_s27 }
  0xef   : > { %v785_v36 = vld [vmem:[%s7555_s15 + $0x70] sm:$0xff]  ;;  %v786_v37 = vld [vmem:[%s7555_s15 + $0x78] sm:$0xff]  ;;  %v787_v38 = vld [vmem:[%s7555_s15 + $0x80] sm:$0xff]  ;;  %s6312_s3 = scalar_lea.vmem %s7439_s27, 16  ;;  %p7563_p7 = scmp.ne.s32.totalorder %s7560_s0, 0 }
  0xf0   : > { %v788_v39 = vld [vmem:[%s7555_s15 + $0x88] sm:$0xff]  ;;  %v789_v46 = vld [vmem:[%s7555_s15 + $0x90] sm:$0xff]  ;;  %v790_v47 = vld [vmem:[%s7555_s15 + $0x98] sm:$0xff]  ;;  %p6313_p4 = scmp.ne.s32.totalorder %s7439_s27, %s6312_s3  ;;  %p6319_p13 = scmp.lt.s32.totalorder %s7439_s27, %s6317_s20 }
  0xf1   : > { %v791_v48 = vld [vmem:[%s7555_s15 + $0xa0] sm:$0xff]  ;;  %v792_v50 = vld [vmem:[%s7555_s15 + $0xa8] sm:$0xff]  ;;  %v793_v52 = vld [vmem:[%s7555_s15 + $0xb0] sm:$0xff] }
  0xf2   : > { %v794_v54 = vld [vmem:[%s7555_s15 + $0xb8] sm:$0xff]  ;;  %v795_v56 = vld [vmem:[%s7555_s15 + $0xc0] sm:$0xff]  ;;  %v796_v58 = vld [vmem:[%s7555_s15 + $0xc8] sm:$0xff]  ;;  %p6314_p8 = pnand %p6313_p4, %p7563_p7 }
  0xf3   : > { %v797_v60 = vld [vmem:[%s7555_s15 + $0xd0] sm:$0xff]  ;;  %v798_v62 = vld [vmem:[%s7555_s15 + $0xd8] sm:$0xff]  ;;  %v800_v3 = vld [vmem:[%s7555_s15 + $0xe8] sm:$0xff] }
  0xf4   : > { %v803_v10 = vld [vmem:[%s7555_s15 + $0x100] sm:$0xff]  ;;  %v804_v13 = vld [vmem:[%s7555_s15 + $0x108] sm:$0xff]  ;;  %p6315_p11 = pneg %p6314_p8 }
 0x164   : > { %v913_v41 = vpop.permute.xlu1 %912 }
 0x178   : > { %v746_v4 = vpop.xlane.xlu0 %745 }
 0x179   : > { %v747_v5 = vmul.f32 0.03125, %v746_v4 }
 0x17b   : > { %v748_v7 = vsub.f32 %v736_v0, %v747_v5  ;;  %v799_v0 = vld [vmem:[%s7555_s15 + $0xe0] sm:$0xff]  ;;  %v801_v5 = vld [vmem:[%s7555_s15 + $0xf0] sm:$0xff] }
 0x17d   : > { %v749_v8 = vmul.f32 %v6757_v6, %v748_v7 }
 0x17f   : > { %v750_v9 = vmul.f32 %v749_v8, %v749_v8 }
 0x181   : > { %751 = vadd.xlane.f32.xlu0 %v750_v9 }
 0x20e   : > { %v752_v14 = vpop.xlane.xlu0 %751 }
 0x20f   : > { %v753_v15 = vmul.f32 0.03125, %v752_v14  ;;  %v981_v14 = vpop.permute.xlu1 %980 }
 0x211   : > { %v754_v16 = vadd.f32 1e-05, %v753_v15 }
 0x213   : > { %6067 = vrsqrt.f32 %v754_v16 }
 0x21d   : > { %v6068_v17 = vpop.eup %6067 }
 0x21e   : > { %v756_v19 = vmul.f32 %v6068_v17, %v749_v8  ;;  %v802_v8 = vld [vmem:[%s7555_s15 + $0xf8] sm:$0xff] }
 0x220   : > { %v763_v21 = vmul.f32 %v4924_v18, %v756_v19 }
 0x222   : > { %v6770_v22 = vadd.f32 %v4925_v20, %v763_v21 }
 0x224   : > { %5327 = vmatprep.subr.mxu0 %v6770_v22 }
 0x225   : > { %5328 = vmatpush3.xpose.msra.mxu0 %v6770_v22 }
 0x228   : > { %5330 = vmatmul.mubr.f32.vlgmr.msra.gmra.mrb[0].mxu0 %v772_v23 }
 0x229   : > { %5332 = vmatprep.mubr.f32.mxu0 %v773_v24 }
 0x22c   : > { %5333 = vmatmul.mubr.f32.gmra.mrb[2].mxu0 %v774_v25 }
 0x22d   : > { %5335 = vmatprep.mubr.f32.mxu0 %v775_v26 }
 0x230   : > { %5336 = vmatmul.mubr.f32.gmra.mrb[4].mxu0 %v776_v27 }
 0x231   : > { %5338 = vmatprep.mubr.f32.mxu0 %v777_v28 }
 0x234   : > { %5339 = vmatmul.mubr.f32.gmra.mrb[6].mxu0 %v778_v29 }
 0x235   : > { %5341 = vmatprep.mubr.f32.mxu0 %v779_v30 }
 0x238   : > { %5342 = vmatmul.mubr.f32.gmra.mrb[8].mxu0 %v780_v31 }
 0x239   : > { %5344 = vmatprep.mubr.f32.mxu0 %v781_v32  ;;  %v6899_v32 = vld [vmem:[%s6896_s30] ss:$0 sm:$0xff] }
 0x23c   : > { %5345 = vmatmul.mubr.f32.gmra.mrb[10].mxu0 %v782_v33 }
 0x23d   : > { %5347 = vmatprep.mubr.f32.mxu0 %v783_v34 }
 0x240   : > { %5348 = vmatmul.mubr.f32.gmra.mrb[12].mxu0 %v784_v35 }
 0x241   : > { %5350 = vmatprep.mubr.f32.mxu0 %v785_v36 }
 0x244   : > { %5351 = vmatmul.mubr.f32.gmra.mrb[14].mxu0 %v786_v37  ;;  %v820_v37 = vld [vmem:[%s7484_s5 + $0x8] sm:$0xff] }
 0x245   : > { %5353 = vmatprep.mubr.f32.mxu0 %v787_v38  ;;  %v851_v38 = vld [vmem:[%s7484_s5 + $0x100] sm:$0xff] }
 0x248   : > { %5354 = vmatmul.mubr.f32.gmra.mrb[16].mxu0 %v788_v39 }
 0x249   : > { %5356 = vmatprep.mubr.f32.mxu0 %v789_v46 }
 0x24c   : > { %5357 = vmatmul.mubr.f32.gmra.mrb[18].mxu0 %v790_v47 }
 0x24d   : > { %5359 = vmatprep.mubr.f32.mxu0 %v791_v48 }
 0x250   : > { %5360 = vmatmul.mubr.f32.gmra.mrb[20].mxu0 %v792_v50 }
 0x251   : > { %5362 = vmatprep.mubr.f32.mxu0 %v793_v52 }
 0x254   : > { %5363 = vmatmul.mubr.f32.gmra.mrb[22].mxu0 %v794_v54  ;;  %v821_v54 = vld [vmem:[%s7484_s5 + $0x10] sm:$0xff] }
 0x255   : > { %5365 = vmatprep.mubr.f32.mxu0 %v795_v56 }
 0x258   : > { %5366 = vmatmul.mubr.f32.gmra.mrb[24].mxu0 %v796_v58 }
 0x259   : > { %5368 = vmatprep.mubr.f32.mxu0 %v797_v60 }
 0x25c   : > { %5369 = vmatmul.mubr.f32.gmra.mrb[26].mxu0 %v798_v62 }
 0x25d   : > { %5371 = vmatprep.mubr.f32.mxu0 %v799_v0 }
 0x260   : > { %5372 = vmatmul.mubr.f32.gmra.mrb[28].mxu0 %v800_v3 }
 0x261   : > { %5374 = vmatprep.mubr.f32.mxu0 %v801_v5 }
 0x264   : > { %5375 = vmatmul.mubr.f32.gmra.mrb[30].mxu0 %v802_v8 }
 0x265   : > { %5377 = vmatprep.mubr.f32.mxu0 %v803_v10 }
 0x268   : > { %5378 = vmatmul.mubr.f32.gmra.mrb[32].mxu0 %v804_v13  ;;  %v852_v13 = vld [vmem:[%s7484_s5 + $0x108] sm:$0xff] }
 0x2fb   : > { %v6827_v40 = vpop.f32.mrb[0].mxu0 }
 0x2fc   : > { %v1180_v42 = vpop.f32.mrb[1].mxu0 }
 0x2fd   : > { %v1181_v43 = vadd.f32 %v1180_v42, %v913_v41  ;;  %v836_v42 = vld [vmem:[%s7484_s5 + $0x88] sm:$0xff] }
 0x2ff   : > { %1383 = vxpose.xlu0.b32.start.end [1/1] (short) (narrow) %v1181_v43, 8  ;;  %v6829_v44 = vpop.f32.mrb[2].mxu0 }
 0x300   : > { %v6831_v45 = vpop.f32.mrb[3].mxu0 }
 0x303   : > { %v5337_v49 = vpop.f32.mrb[4].mxu0 }
 0x304   : > { %v1200_v51 = vpop.f32.mrb[5].mxu0 }
 0x307   : > { %v5340_v53 = vpop.f32.mrb[6].mxu0 }
 0x308   : > { %v1208_v55 = vpop.f32.mrb[7].mxu0 }
 0x30b   : > { %v5343_v57 = vpop.f32.mrb[8].mxu0 }
 0x30c   : > { %v1216_v59 = vpop.f32.mrb[9].mxu0 }
 0x30f   : > { %v5346_v61 = vpop.f32.mrb[10].mxu0 }
 0x310   : > { %v1224_v63 = vpop.f32.mrb[11].mxu0 }
 0x313   : > { %v5349_v2 = vpop.f32.mrb[12].mxu0 }
 0x314   : > { %v1232_v4 = vpop.f32.mrb[13].mxu0 }
 0x317   : > { %v5352_v7 = vpop.f32.mrb[14].mxu0 }
 0x318   : > { %v1240_v9 = vpop.f32.mrb[15].mxu0 }
 0x31b   : > { %v6878_v11 = vpop.f32.mrb[16].mxu0 }
 0x31c   : > { %v1248_v15 = vpop.f32.mrb[17].mxu0 }
 0x31d   : > { %v1249_v16 = vadd.f32 %v1248_v15, %v981_v14 }
 0x31f   : > { %5402 = vmatpush3.msra.mxu1 %v1249_v16  ;;  %v6888_v18 = vpop.f32.mrb[18].mxu0 }
 0x320   : > { %5406 = vmatprep.subr.mxu1 %v6401_v1  ;;  %v6890_v19 = vpop.f32.mrb[19].mxu0 }
 0x323   : > { %v5361_v20 = vpop.f32.mrb[20].mxu0 }
 0x324   : > { %v1268_v21 = vpop.f32.mrb[21].mxu0 }
 0x325   : > { %v868_v21 = vld [vmem:[#allocation7 + $0x8] sm:$0xff] }
 0x327   : > { %v5364_v23 = vpop.f32.mrb[22].mxu0 }
 0x328   : > { %6066 = vset.pattern.permute.xlu0 %v6402_v12  ;;  %v1276_v24 = vpop.f32.mrb[23].mxu0  ;;  %v867_v23 = vld [vmem:[#allocation7] sm:$0xff] }
 0x32b   : > { %v5367_v25 = vpop.f32.mrb[24].mxu0 }
 0x32c   : > { %v1284_v26 = vpop.f32.mrb[25].mxu0 }
 0x32f   : > { %v5370_v27 = vpop.f32.mrb[26].mxu0 }
 0x330   : > { %v1292_v12 = vpop.f32.mrb[27].mxu0 }
 0x333   : > { %v5373_v28 = vpop.f32.mrb[28].mxu0 }
 0x334   : > { %v1300_v29 = vpop.f32.mrb[29].mxu0  ;;  %v805_v28 = vld [vmem:[%s7555_s15 + $0x110] sm:$0xff] }
 0x335   : > { %5380 = vmatprep.mubr.f32.mxu0 %v805_v28  ;;  %v5014_v28 = vld [vmem:[%s7484_s5 + $0x200] sm:$0xff] }
 0x337   : > { %v5376_v30 = vpop.f32.mrb[30].mxu0 }
 0x338   : > { %v1308_v31 = vpop.f32.mrb[31].mxu0 }
 0x33b   : > { %v5379_v39 = vpop.f32.mrb[32].mxu0 }
 0x33c   : > { %v1316_v41 = vpop.f32.mrb[33].mxu0 }
 0x37f   : > { %v1399_v17 = vpop.trf.xlu0 }
 0x380   : > { %5404 = vmatmul.mubr.msk.f32.vlgmr.msra.gmra.mrb[0].mxu1 %vm1421_vm2, %v1399_v17 }
 0x381   : > { %5408 = vmatprep.mubr.msk.f32.mxu1 %vm6403_vm1, %v6401_v1 }
 0x453   : > { %v1491_v33 = vpop.f32.mrb[0].mxu1 }
 0x454   : > { %v1492_v34 = vadd.f32 %v6899_v32, %v1491_v33  ;;  %v5405_v35 = vpop.f32.mrb[1].mxu1 }
 0x456   : > { %v1495_v36 = vsel %vm1421_vm2, %v1492_v34, -inf }
 0x457   : > { %1496 = vmax.xlane.f32.xlu1 %v1495_v36 }
 0x468   : > { %917 = vperm.xlu1 %6065, %v820_v37  }
 0x46c   : > { %1048 = vperm.xlu1 %6065, %v851_v38  }
 0x470   : > { %985 = vperm.xlu1 %6065, %v836_v42  }
 0x4e4   : > { %v1497_v43 = vpop.xlane.xlu1 %1496 }
 0x4e5   : > { %v1498_v46 = vsub.f32 %v1492_v34, %v1497_v43 }
 0x4e7   : > { %v1499_v47 = vmul.f32 1.442695, %v1498_v46 }
 0x4e8   : > { %v918_v48 = vpop.permute.xlu1 %917 }
 0x4e9   : > { %6069 = vpow2.f32 %v1499_v47  ;;  %v1186_v49 = vadd.f32 %v6827_v40, %v918_v48  ;;  %v837_v40 = vld [vmem:[%s7484_s5 + $0x90] sm:$0xff] }
 0x4ea   : > { %v853_v47 = vld [vmem:[%s7484_s5 + $0x110] sm:$0xff] }
 0x4eb   : > { %1582 = vxpose.xlu1.b32.start.end [1/1] (short) (narrow) %v1186_v49, 8 }
 0x4ec   : > { %v1049_v50 = vpop.permute.xlu1 %1048 }
 0x4ed   : > { %v1317_v51 = vadd.f32 %v1316_v41, %v1049_v50  ;;  %v838_v50 = vld [vmem:[%s7484_s5 + $0x98] sm:$0xff] }
 0x4ef   : > { %5407 = vmatpush3.xpose.msk.msra.mxu1 %vm1421_vm2, %v1317_v51 }
 0x4f0   : > { %5411 = vmatprep.subr.mxu1 %v6401_v1  ;;  %v986_v55 = vpop.permute.xlu1 %985 }
 0x4f1   : > { %v1254_v62 = vadd.f32 %v6878_v11, %v986_v55 }
 0x4f3   : > { %v6070_v52 = vpop.eup %6069 }
 0x4f4   : > { %v1501_v53 = vsel %vm1421_vm2, %v6070_v52, 0.0 }
 0x4f5   : > { %1502 = vadd.xlane.f32.xlu0 %v1501_v53 }
 0x509   : > { %922 = vperm.xlu1 %6065, %v821_v54  }
 0x50d   : > { %990 = vperm.xlu1 %6065, %v837_v40  }
 0x56b   : > { %v1598_v57 = vpop.trf.xlu1 }
 0x582   : > { %v1503_v56 = vpop.xlane.xlu0 %1502 }
 0x583   : > { %6071 = vrcp.f32 %v1503_v56 }
 0x588   : > { %v923_v58 = vpop.permute.xlu1 %922 }
 0x589   : > { %v1191_v59 = vadd.f32 %v6831_v45, %v923_v58  ;;  %v822_v45 = vld [vmem:[%s7484_s5 + $0x18] sm:$0xff] }
 0x58b   : > { %1920 = vxpose.xlu1.b32.start.end [1/1] (short) (narrow) %v1191_v59, 8 }
 0x58c   : > { %v991_v25 = vpop.permute.xlu1 %990 }
 0x58d   : > { %v6072_v60 = vpop.eup %6071  ;;  %v1259_v27 = vadd.f32 %v6890_v19, %v991_v25  ;;  %v806_v19 = vld [vmem:[%s7555_s15 + $0x118] sm:$0xff] }
 0x58e   : > { %v1505_v61 = vmul.f32 %v6072_v60, %v6070_v52  ;;  %5381 = vmatmul.mubr.f32.gmra.mrb[34].mxu0 %v806_v19  ;;  %v874_v19 = vld [vmem:[#allocation8] sm:$0xff] }
 0x590   : > { %5409 = vmatmul.mubr.msk.f32.vlgmr.msra.gmra.mrb[2].mxu1 %vm1421_vm2, %v1505_v61 }
 0x591   : > { %5412 = vmatpush3.msra.mxu1 %v1254_v62  ;;  %5413 = vmatprep.mubr.msk.f32.mxu1 %vm6403_vm1, %v6401_v1 }
 0x592   : > { %5416 = vmatprep.subr.mxu1 %v6401_v1 }
 0x594   : > { %5414 = vmatmul.mubr.msk.f32.vlgmr.msra.gmra.mrb[4].mxu1 %vm1421_vm2, %v1598_v57  ;;  %v869_v57 = vld [vmem:[#allocation7 + $0x10] sm:$0xff] }
 0x595   : > { %5418 = vmatprep.mubr.msk.f32.mxu1 %vm6403_vm1, %v6401_v1 }
 0x5a9   : > { %927 = vperm.xlu1 %6065, %v822_v45  }
 0x60b   : > { %v1936_v12 = vpop.trf.xlu1 }
 0x628   : > { %v928_v51 = vpop.permute.xlu1 %927 }
 0x629   : > { %v1196_v52 = vadd.f32 %v6829_v44, %v928_v51  ;;  %v884_v51 = vld [vmem:[#allocation8 + $0x50] sm:$0xff] }
 0x661   : > { %v5382_v48 = vpop.f32.mrb[34].mxu0 }
 0x662   : > { %v1326_v49 = vpop.f32.mrb[35].mxu0 }
 0x663   : > { %v1578_v63 = vpop.f32.mrb[2].mxu1 }
 0x664   : > { %v5410_v0 = vpop.f32.mrb[3].mxu1 }
 0x667   : > { %v1683_v2 = vpop.f32.mrb[4].mxu1 }
 0x668   : > { %v1684_v3 = vadd.f32 %v6899_v32, %v1683_v2  ;;  %v5415_v4 = vpop.f32.mrb[5].mxu1 }
 0x669   : > { %v854_v4 = vld [vmem:[%s7484_s5 + $0x118] sm:$0xff] }
 0x66a   : > { %v1687_v5 = vsel %vm1421_vm2, %v1684_v3, -inf }
 0x66b   : > { %1688 = vmax.xlane.f32.xlu0 %v1687_v5 }
 0x6f8   : > { %v1689_v7 = vpop.xlane.xlu0 %1688 }
 0x6f9   : > { %v1690_v8 = vsub.f32 %v1684_v3, %v1689_v7 }
 0x6fb   : > { %v1691_v9 = vmul.f32 1.442695, %v1690_v8 }
 0x6fd   : > { %6073 = vpow2.f32 %v1691_v9 }
 0x707   : > { %v6074_v10 = vpop.eup %6073 }
 0x708   : > { %v1693_v11 = vsel %vm1421_vm2, %v6074_v10, 0.0 }
 0x709   : > { %1694 = vadd.xlane.f32.xlu0 %v1693_v11 }
 0x71f   : > { %1053 = vperm.xlu0 %6066, %v852_v13  }
 0x796   : > { %v1695_v14 = vpop.xlane.xlu0 %1694 }
 0x797   : > { %6075 = vrcp.f32 %v1695_v14 }
 0x79e   : > { %v1054_v15 = vpop.permute.xlu0 %1053 }
 0x79f   : > { %v1322_v16 = vadd.f32 %v5379_v39, %v1054_v15 }
 0x7a1   : > { %v6076_v17 = vpop.eup %6075  ;;  %5417 = vmatpush3.xpose.msk.msra.mxu1 %vm1421_vm2, %v1322_v16 }
 0x7a2   : > { %v1697_v20 = vmul.f32 %v6076_v17, %v6074_v10  ;;  %5421 = vmatprep.subr.mxu1 %v6401_v1  ;;  %v870_v17 = vld [vmem:[#allocation7 + $0x18] sm:$0xff] }
 0x7a4   : > { %5419 = vmatmul.mubr.msk.f32.vlgmr.msra.gmra.mrb[6].mxu1 %vm1421_vm2, %v1697_v20 }
 0x7a5   : > { %5422 = vmatpush3.msra.mxu1 %v868_v21  ;;  %5423 = vmatprep.mubr.msk.f32.mxu1 %vm6403_vm1, %v6401_v1 }
 0x7a6   : > { %5426 = vmatprep.subr.mxu1 %v6401_v1 }
 0x877   : > { %v1770_v24 = vpop.f32.mrb[6].mxu1 }
 0x878   : > { %v5420_v26 = vpop.f32.mrb[7].mxu1  ;;  %5424 = vmatmul.mubr.msk.f32.vlgmr.msra.gmra.mrb[8].mxu1 %vm1421_vm2, %v1770_v24 }
 0x879   : > { %5427 = vmatpush3.msra.mxu1 %v867_v23  ;;  %5428 = vmatprep.mubr.msk.f32.mxu1 %vm6403_vm1, %v6401_v1  ;;  %v4943_v23 = vld [vmem:[%s7486_s7] ss:$0 sm:$0xff] }
 0x87a   : > { %5431 = vmatprep.subr.mxu1 %v6401_v1 }
 0x87c   : > { %5429 = vmatmul.mubr.msk.f32.vlgmr.msra.gmra.mrb[10].mxu1 %vm1421_vm2, %v1578_v63 }
 0x87d   : > { %5432 = vmatpush3.msra.mxu1 %v1259_v27  ;;  %5433 = vmatprep.mubr.msk.f32.mxu1 %vm6403_vm1, %v6401_v1 }
 0x87e   : > { %5436 = vmatprep.subr.mxu1 %v6401_v1 }
 0x880   : > { %5434 = vmatmul.mubr.msk.f32.vlgmr.msra.gmra.mrb[12].mxu1 %vm1421_vm2, %v1936_v12 }
 0x881   : > { %5438 = vmatprep.mubr.msk.f32.mxu1 %vm6403_vm1, %v6401_v1 }
 0x94b   : > { %v1843_v29 = vpop.f32.mrb[8].mxu1 }
 0x94c   : > { %v5425_v30 = vpop.f32.mrb[9].mxu1 }
 0x94d   : > { %v876_v30 = vld [vmem:[#allocation8 + $0x10] sm:$0xff] }
 0x94f   : > { %v1916_v31 = vpop.f32.mrb[10].mxu1 }
 0x950   : > { %v1917_v33 = vadd.f32 %v1916_v31, %v1843_v29  ;;  %v5430_v34 = vpop.f32.mrb[11].mxu1  ;;  %v875_v29 = vld [vmem:[#allocation8 + $0x8] sm:$0xff]  ;;  %v6404_v31 = vmov 0.0|0.0  }
 0x951   : > { %v877_v34 = vld [vmem:[#allocation8 + $0x18] sm:$0xff]  ;;  %5829 = vmatprep.subr.bf16.mxu0 %v6404_v31 }
 0x953   : > { %v2021_v35 = vpop.f32.mrb[12].mxu1 }
 0x954   : > { %v2022_v36 = vadd.f32 %v6899_v32, %v2021_v35  ;;  %v5435_v37 = vpop.f32.mrb[13].mxu1  ;;  %v5809_v35 = vpack.c.bf16 %v877_v34, %v876_v30  ;;  %v903_v30 = vld [vmem:[#allocation10 + $0x60] sm:$0xff]  ;;  %v813_v34 = vld [vmem:[%s7555_s15 + $0x150] sm:$0xff] }
 0x956   : > { %v2025_v38 = vsel %vm1421_vm2, %v2022_v36, -inf }
 0x957   : > { %2026 = vmax.xlane.f32.xlu0 %v2025_v38 }
 0x9e4   : > { %v2027_v39 = vpop.xlane.xlu0 %2026 }
 0x9e5   : > { %v2028_v41 = vsub.f32 %v2022_v36, %v2027_v39  ;;  %v879_v36 = vld [vmem:[#allocation8 + $0x28] sm:$0xff] }
 0x9e7   : > { %v2029_v42 = vmul.f32 1.442695, %v2028_v41 }
 0x9e9   : > { %6077 = vpow2.f32 %v2029_v42 }
 0x9f3   : > { %v6078_v43 = vpop.eup %6077 }
 0x9f4   : > { %v2031_v46 = vsel %vm1421_vm2, %v6078_v43, 0.0 }
 0x9f5   : > { %2032 = vadd.xlane.f32.xlu0 %v2031_v46  ;;  %v880_v46 = vld [vmem:[#allocation8 + $0x30] sm:$0xff] }
 0xa0b   : > { %1058 = vperm.xlu0 %6066, %v853_v47   ;;  %v881_v47 = vld [vmem:[#allocation8 + $0x38] sm:$0xff] }
 0xa0f   : > { %995 = vperm.xlu0 %6066, %v838_v50   ;;  %v883_v50 = vld [vmem:[#allocation8 + $0x48] sm:$0xff] }
 0xa2d   : > { %2186 = vxpose.xlu0.b32.start.end [1/1] (short) (narrow) %v1196_v52, 8 }
 0xa82   : > { %v2033_v53 = vpop.xlane.xlu0 %2032 }
 0xa83   : > { %6079 = vrcp.f32 %v2033_v53  ;;  %v885_v53 = vld [vmem:[#allocation8 + $0x58] sm:$0xff] }
 0xa8a   : > { %v1059_v54 = vpop.permute.xlu0 %1058 }
 0xa8b   : > { %v1327_v40 = vadd.f32 %v1326_v49, %v1059_v54  ;;  %v882_v49 = vld [vmem:[#allocation8 + $0x40] sm:$0xff]  ;;  %v5821_v54 = vpack.c.bf16 %v885_v53, %v884_v51 }
 0xa8c   : > { %v5818_v52 = vpack.c.bf16 %v883_v50, %v882_v49 }
 0xa8d   : > { %v6080_v55 = vpop.eup %6079  ;;  %5437 = vmatpush3.xpose.msk.msra.mxu1 %vm1421_vm2, %v1327_v40  ;;  %v886_v40 = vld [vmem:[#allocation8 + $0x60] sm:$0xff] }
 0xa8e   : > { %v2035_v56 = vmul.f32 %v6080_v55, %v6078_v43  ;;  %5441 = vmatprep.subr.mxu1 %v6401_v1  ;;  %v996_v44 = vpop.permute.xlu0 %995  ;;  %v887_v55 = vld [vmem:[#allocation8 + $0x68] sm:$0xff] }
 0xa8f   : > { %v1264_v58 = vadd.f32 %v6888_v18, %v996_v44  ;;  %v889_v44 = vld [vmem:[#allocation8 + $0x78] sm:$0xff] }
 0xa90   : > { %5439 = vmatmul.mubr.msk.f32.vlgmr.msra.gmra.mrb[14].mxu1 %vm1421_vm2, %v2035_v56  ;;  %v5824_v56 = vpack.c.bf16 %v887_v55, %v886_v40 }
 0xa91   : > { %5442 = vmatpush3.msra.mxu1 %v869_v57  ;;  %5443 = vmatprep.mubr.msk.f32.mxu1 %vm6403_vm1, %v6401_v1  ;;  %v888_v57 = vld [vmem:[#allocation8 + $0x70] sm:$0xff] }
 0xa92   : > { %5446 = vmatprep.subr.mxu1 %v6401_v1 }
 0xaad   : > { %v2202_v61 = vpop.trf.xlu0 }
 0xb63   : > { %v2108_v59 = vpop.f32.mrb[14].mxu1 }
 0xb64   : > { %v5440_v60 = vpop.f32.mrb[15].mxu1  ;;  %5444 = vmatmul.mubr.msk.f32.vlgmr.msra.gmra.mrb[16].mxu1 %vm1421_vm2, %v2108_v59  ;;  %v891_v59 = vld [vmem:[#allocation10] sm:$0xff] }
 0xb65   : > { %5447 = vmatpush3.msra.mxu1 %v1264_v58  ;;  %5448 = vmatprep.mubr.msk.f32.mxu1 %vm6403_vm1, %v6401_v1  ;;  %v5827_v58 = vpack.c.bf16 %v889_v44, %v888_v57  ;;  %v892_v60 = vld [vmem:[#allocation10 + $0x8] sm:$0xff] }
 0xb66   : > { %5451 = vmatprep.subr.mxu1 %v6401_v1 }
 0xb68   : > { %5449 = vmatmul.mubr.msk.f32.vlgmr.msra.gmra.mrb[18].mxu1 %vm1421_vm2, %v2202_v61  ;;  %v893_v61 = vld [vmem:[#allocation10 + $0x10] sm:$0xff] }
 0xb69   : > { %5453 = vmatprep.mubr.msk.f32.mxu1 %vm6403_vm1, %v6401_v1 }
 0xc37   : > { %v2181_v62 = vpop.f32.mrb[16].mxu1 }
 0xc38   : > { %v2185_v45 = vadd.f32 %v2181_v62, %v1917_v33  ;;  %v5445_v63 = vpop.f32.mrb[17].mxu1  ;;  %v5806_v33 = vpack.c.bf16 %v875_v29, %v874_v19  ;;  %v5830_v62 = vpack.c.bf16 %v892_v60, %v891_v59  ;;  %v811_v19 = vld [vmem:[%s7555_s15 + $0x140] sm:$0xff]  ;;  %v812_v29 = vld [vmem:[%s7555_s15 + $0x148] sm:$0xff] }
 0xc3a   : > { %5831 = vmatpush3.bf16.msra.mxu0 %v5830_v62 }
 0xc3b   : > { %v2287_v18 = vpop.f32.mrb[18].mxu1  ;;  %5832 = vmatprep.subr.bf16.mxu0 %v6404_v31 }
 0xc3c   : > { %v2288_v0 = vadd.f32 %v6899_v32, %v2287_v18  ;;  %v5450_v2 = vpop.f32.mrb[19].mxu1  ;;  %v895_v18 = vld [vmem:[#allocation10 + $0x20] sm:$0xff] }
 0xc3e   : > { %v2291_v3 = vsel %vm1421_vm2, %v2288_v0, -inf }
 0xc3f   : > { %2292 = vmax.xlane.f32.xlu1 %v2291_v3  ;;  %v897_v3 = vld [vmem:[#allocation10 + $0x30] sm:$0xff] }
 0xc50   : > { %1063 = vperm.xlu1 %6065, %v854_v4   ;;  %v898_v4 = vld [vmem:[#allocation10 + $0x38] sm:$0xff] }
 0xccc   : > { %v2293_v5 = vpop.xlane.xlu1 %2292 }
 0xccd   : > { %v2294_v7 = vsub.f32 %v2288_v0, %v2293_v5  ;;  %v896_v0 = vld [vmem:[#allocation10 + $0x28] sm:$0xff]  ;;  %v5839_v5 = vpack.c.bf16 %v898_v4, %v897_v3  ;;  %v4947_v4 = vld [vmem:[%s7492_s13] ss:$0 sm:$0xff] }
 0xcce   : > { %v5836_v2 = vpack.c.bf16 %v896_v0, %v895_v18 }
 0xccf   : > { %v2295_v8 = vmul.f32 1.442695, %v2294_v7  ;;  %v899_v7 = vld [vmem:[#allocation10 + $0x40] sm:$0xff] }
 0xcd0   : > { %v1064_v9 = vpop.permute.xlu1 %1063 }
 0xcd1   : > { %6081 = vpow2.f32 %v2295_v8  ;;  %v1332_v10 = vadd.f32 %v5382_v48, %v1064_v9  ;;  %v5815_v48 = vpack.c.bf16 %v881_v47, %v880_v46  ;;  %v900_v8 = vld [vmem:[#allocation10 + $0x48] sm:$0xff]  ;;  %v4946_v46 = vld [vmem:[%s7490_s11] ss:$0 sm:$0xff] }
 0xcd2   : > { %v5842_v9 = vpack.c.bf16 %v900_v8, %v899_v7 }
 0xcd3   : > { %5452 = vmatpush3.xpose.msk.msra.mxu1 %vm1421_vm2, %v1332_v10  ;;  %v901_v10 = vld [vmem:[#allocation10 + $0x50] sm:$0xff] }
 0xcd4   : > { %5456 = vmatprep.subr.mxu1 %v6401_v1 }
 0xcdb   : > { %v6082_v11 = vpop.eup %6081 }
 0xcdc   : > { %v2297_v13 = vsel %vm1421_vm2, %v6082_v11, 0.0 }
 0xcdd   : > { %2298 = vadd.xlane.f32.xlu0 %v2297_v13 }
 0xd6a   : > { %v2299_v14 = vpop.xlane.xlu0 %2298 }
 0xd6b   : > { %6083 = vrcp.f32 %v2299_v14 }
 0xd75   : > { %v6084_v15 = vpop.eup %6083 }
 0xd76   : > { %v2301_v16 = vmul.f32 %v6084_v15, %v6082_v11  ;;  %v902_v11 = vld [vmem:[#allocation10 + $0x58] sm:$0xff] }
 0xd77   : > { %v5845_v13 = vpack.c.bf16 %v902_v11, %v901_v10 }
 0xd78   : > { %5454 = vmatmul.mubr.msk.f32.vlgmr.msra.gmra.mrb[20].mxu1 %vm1421_vm2, %v2301_v16 }
 0xd79   : > { %5457 = vmatpush3.msra.mxu1 %v870_v17  ;;  %5458 = vmatprep.mubr.msk.f32.mxu1 %vm6403_vm1, %v6401_v1 }
 0xd7a   : > { %5805 = vmatprep.subr.bf16.mxu1 %v6404_v31 }
 0xe4b   : > { %v2374_v20 = vpop.f32.mrb[20].mxu1 }
 0xe4c   : > { %v5455_v21 = vpop.f32.mrb[21].mxu1  ;;  %5459 = vmatmul.mubr.msk.f32.vlgmr.msra.gmra.mrb[22].mxu1 %vm1421_vm2, %v2374_v20  ;;  %v4944_v20 = vld [vmem:[%s7487_s8] ss:$0 sm:$0xff] }
 0xe4d   : > { %5493 = vmatprep.mubr.msk.f32.mxu1 %vm6403_vm1, %v6401_v1  ;;  %5807 = vmatpush3.bf16.msra.mxu1 %v5806_v33  ;;  %v904_v33 = vld [vmem:[#allocation10 + $0x68] sm:$0xff] }
 0xe4e   : > { %5808 = vmatprep.subr.bf16.mxu1 %v6404_v31 }
 0xe51   : > { %5810 = vmatpush3.bf16.msra.mxu1 %v5809_v35  ;;  %v5848_v35 = vpack.c.bf16 %v904_v33, %v903_v30  ;;  %v4953_v30 = vld [vmem:[%s7555_s15 + $0x198] sm:$0xff]  ;;  %v4954_v33 = vld [vmem:[%s7555_s15 + $0x1a0] sm:$0xff] }
 0xe52   : > { %5811 = vmatprep.subr.bf16.mxu1 %v6404_v31 }
 0xf1f   : > { %v2447_v24 = vpop.f32.mrb[22].mxu1 }
 0xf20   : > { %v2451_v25 = vadd.f32 %v2447_v24, %v2185_v45  ;;  %v5460_v26 = vpop.f32.mrb[23].mxu1  ;;  %v894_v45 = vld [vmem:[#allocation10 + $0x18] sm:$0xff] }
 0xf21   : > { %v5833_v63 = vpack.c.bf16 %v894_v45, %v893_v61  ;;  %v807_v26 = vld [vmem:[%s7555_s15 + $0x120] sm:$0xff] }
 0xf22   : > { %v2458_v27 = vadd.f32 %v4943_v23, %v2451_v25  ;;  %v4945_v23 = vld [vmem:[%s7488_s9] ss:$0 sm:$0xff]  ;;  %5383 = vmatprep.mubr.f32.mxu0 %v807_v26 }
 0xf23   : > { %5834 = vmatpush3.bf16.msra.mxu0 %v5833_v63 }
 0xf24   : > { %v2459_v12 = vadd.f32 %v2458_v27, %v6770_v22  ;;  %v878_v22 = vld [vmem:[#allocation8 + $0x20] sm:$0xff]  ;;  %5835 = vmatprep.subr.bf16.mxu0 %v6404_v31 }
 0xf25   : > { %v5812_v37 = vpack.c.bf16 %v879_v36, %v878_v22  ;;  %v808_v27 = vld [vmem:[%s7555_s15 + $0x128] sm:$0xff]  ;;  %v814_v22 = vld [vmem:[%s7555_s15 + $0x158] sm:$0xff] }
 0xf26   : > { %2460 = vadd.xlane.f32.xlu1 %v2459_v12  ;;  %5384 = vmatmul.mubr.f32.gmra.mrb[36].mxu0 %v808_v27  ;;  %v905_v36 = vld [vmem:[#allocation10 + $0x70] sm:$0xff]  ;;  %v4949_v27 = vld [vmem:[%s7557_s4] ss:$0 sm:$0xff] }
 0xf27   : > { %5813 = vmatpush3.bf16.msra.mxu1 %v5812_v37  ;;  %5837 = vmatpush3.bf16.msra.mxu0 %v5836_v2  ;;  %v906_v37 = vld [vmem:[#allocation10 + $0x78] sm:$0xff] }
 0xf28   : > { %5814 = vmatprep.subr.bf16.mxu1 %v6404_v31  ;;  %5838 = vmatprep.subr.bf16.mxu0 %v6404_v31 }
 0xf2b   : > { %5816 = vmatpush3.bf16.msra.mxu1 %v5815_v48  ;;  %5840 = vmatpush3.bf16.msra.mxu0 %v5839_v5 }
 0xf2c   : > { %5817 = vmatprep.subr.bf16.mxu1 %v6404_v31  ;;  %5841 = vmatprep.subr.bf16.mxu0 %v6404_v31 }
 0xf2f   : > { %5819 = vmatpush3.bf16.msra.mxu1 %v5818_v52  ;;  %5843 = vmatpush3.bf16.msra.mxu0 %v5842_v9 }
 0xf30   : > { %5820 = vmatprep.subr.bf16.mxu1 %v6404_v31  ;;  %5844 = vmatprep.subr.bf16.mxu0 %v6404_v31 }
 0xf33   : > { %5822 = vmatpush3.bf16.msra.mxu1 %v5821_v54  ;;  %5846 = vmatpush3.bf16.msra.mxu0 %v5845_v13 }
 0xf34   : > { %5823 = vmatprep.subr.bf16.mxu1 %v6404_v31  ;;  %5847 = vmatprep.subr.bf16.mxu0 %v6404_v31 }
 0xf37   : > { %2895 = vperm.xlu1 %6065, %v5014_v28   ;;  %5825 = vmatpush3.bf16.msra.mxu1 %v5824_v56  ;;  %v810_v28 = vld [vmem:[%s7555_s15 + $0x138] sm:$0xff] }
 0xf38   : > { %5826 = vmatprep.subr.bf16.mxu1 %v6404_v31  ;;  %5849 = vmatpush3.bf16.msra.mxu0 %v5848_v35  ;;  %v4956_v35 = vld [vmem:[%s7555_s15 + $0x1b0] sm:$0xff] }
 0xf39   : > { %5850 = vmatprep.subr.bf16.mxu0 %v6404_v31 }
 0xf3b   : > { %5828 = vmatpush3.bf16.msra.mxu1 %v5827_v58 }
 0xfb3   : > { %v2461_v38 = vpop.xlane.xlu1 %2460 }
 0xfb4   : > { %v2462_v39 = vmul.f32 0.03125, %v2461_v38  ;;  %v815_v38 = vld [vmem:[%s7555_s15 + $0x160] sm:$0xff] }
 0xfb6   : > { %v2463_v41 = vsub.f32 %v2459_v12, %v2462_v39  ;;  %v809_v12 = vld [vmem:[%s7555_s15 + $0x130] sm:$0xff]  ;;  %v5851_v39 = vpack.c.bf16 %v906_v37, %v905_v36  ;;  %v4958_v36 = vld [vmem:[%s7555_s15 + $0x1c0] sm:$0xff]  ;;  %v4959_v37 = vld [vmem:[%s7555_s15 + $0x1c8] sm:$0xff] }
 0xfb7   : > { %5386 = vmatprep.mubr.f32.mxu0 %v809_v12 }
 0xfb8   : > { %v7015_v42 = vmul.f32 %v6757_v6, %v2463_v41  ;;  %5387 = vmatmul.mubr.f32.gmra.mrb[38].mxu0 %v810_v28  ;;  %v816_v41 = vld [vmem:[%s7555_s15 + $0x168] sm:$0xff] }
 0xfb9   : > { %5389 = vmatprep.mubr.f32.mxu0 %v811_v19  ;;  %5852 = vmatpush3.bf16.msra.mxu0 %v5851_v39  ;;  %v4951_v19 = vld [vmem:[%s7555_s15 + $0x188] sm:$0xff]  ;;  %v4961_v39 = vld [vmem:[%s7555_s15 + $0x1d8] sm:$0xff] }
 0xfba   : > { %v2465_v43 = vmul.f32 %v7015_v42, %v7015_v42  ;;  %5605 = vmatprep.subr.mxu0 %v6401_v1 }
 0xfbc   : > { %2466 = vadd.xlane.f32.xlu0 %v2465_v43  ;;  %5390 = vmatmul.mubr.f32.gmra.mrb[40].mxu0 %v812_v29  ;;  %v818_v43 = vld [vmem:[%s7555_s15 + $0x178] sm:$0xff]  ;;  %v4952_v29 = vld [vmem:[%s7555_s15 + $0x190] sm:$0xff] }
 0xfbd   : > { %5392 = vmatprep.mubr.f32.mxu0 %v813_v34  ;;  %v4955_v34 = vld [vmem:[%s7555_s15 + $0x1a8] sm:$0xff] }
 0xfc0   : > { %5393 = vmatmul.mubr.f32.gmra.mrb[42].mxu0 %v814_v22  ;;  %v4957_v22 = vld [vmem:[%s7555_s15 + $0x1b8] sm:$0xff] }
 0xfc1   : > { %5395 = vmatprep.mubr.f32.mxu0 %v815_v38  ;;  %v4960_v38 = vld [vmem:[%s7555_s15 + $0x1d0] sm:$0xff] }
 0xfc4   : > { %5396 = vmatmul.mubr.f32.gmra.mrb[44].mxu0 %v816_v41  ;;  %v4962_v41 = vld [vmem:[%s7555_s15 + $0x1e0] sm:$0xff] }
 0xff9   : > { %v5385_v44 = vpop.f32.mrb[36].mxu0 }
 0xffa   : > { %v1336_v58 = vpop.f32.mrb[37].mxu0 }
0x1049   : > { %v2467_v14 = vpop.xlane.xlu0 %2466 }
0x104a   : > { %v2468_v15 = vmul.f32 0.03125, %v2467_v14 }
0x104c   : > { %v2469_v16 = vadd.f32 1e-05, %v2468_v15 }
0x104e   : > { %6085 = vrsqrt.f32 %v2469_v16  ;;  %v4998_v16 = vld [vmem:[%s7484_s5 + $0x180] sm:$0xff] }
0x1058   : > { %v6086_v17 = vpop.eup %6085 }
0x1059   : > { %v2471_v21 = vmul.f32 %v6086_v17, %v7015_v42  ;;  %v817_v42 = vld [vmem:[%s7555_s15 + $0x170] sm:$0xff]  ;;  %v4950_v17 = vld [vmem:[%s7555_s15 + $0x180] sm:$0xff] }
0x105a   : > { %5398 = vmatprep.mubr.f32.mxu0 %v817_v42  ;;  %v4963_v42 = vld [vmem:[%s7555_s15 + $0x1e8] sm:$0xff] }
0x105b   : > { %v2478_v24 = vmul.f32 %v4944_v20, %v2471_v21  ;;  %5399 = vmatmul.mubr.f32.gmra.mrb[46].mxu0 %v818_v43  ;;  %v4964_v43 = vld [vmem:[%s7555_s15 + $0x1f0] sm:$0xff] }
0x105c   : > { %5528 = vmatprep.mubr.msk.f32.mxu0 %vm6403_vm1, %v6401_v1 }
0x105d   : > { %v7036_v25 = vadd.f32 %v4945_v23, %v2478_v24 }
0x105f   : > { %5494 = vmatmul.mubr.f32.vlgmr.msra.gmra.mrb[24].mxu1 %v7036_v25 }
0x1060   : > { %5533 = vmatprep.mubr.f32.mxu1 %v4950_v17  ;;  %v4978_v17 = vld [vmem:[%s7555_s15 + $0x260] sm:$0xff] }
0x108b   : > { %v5388_v59 = vpop.f32.mrb[38].mxu0 }
0x108c   : > { %v1344_v60 = vpop.f32.mrb[39].mxu0 }
0x108f   : > { %v5391_v61 = vpop.f32.mrb[40].mxu0 }
0x1090   : > { %v1352_v62 = vpop.f32.mrb[41].mxu0 }
0x1093   : > { %v5394_v45 = vpop.f32.mrb[42].mxu0 }
0x1094   : > { %v1360_v63 = vpop.f32.mrb[43].mxu0 }
0x1097   : > { %v5397_v18 = vpop.f32.mrb[44].mxu0 }
0x1098   : > { %v1368_v0 = vpop.f32.mrb[45].mxu0 }
0x1099   : > { %v2896_v0 = vpop.permute.xlu1 %2895 }
0x112e   : > { %v5400_v2 = vpop.f32.mrb[46].mxu0 }
0x112f   : > { %v1376_v3 = vpop.f32.mrb[47].mxu0 }
0x1132   : > { %v2558_v47 = vpop.f32.mrb[24].mxu1 }
0x1133   : > { %v2559_v48 = vadd.f32 %v4946_v46, %v2558_v47  ;;  %v5495_v49 = vpop.f32.mrb[25].mxu1  ;;  %v4965_v46 = vld [vmem:[%s7555_s15 + $0x1f8] sm:$0xff]  ;;  %v4966_v47 = vld [vmem:[%s7555_s15 + $0x200] sm:$0xff] }
0x1135   : > { %v2563_v50 = vmul.f32 0.044715, %v2559_v48  ;;  %v2562_v55 = vmul.f32 0.5, %v2559_v48 }
0x1137   : > { %v2564_v51 = vmul.f32 %v2563_v50, %v2559_v48 }
0x1139   : > { %v2565_v52 = vmul.f32 %v2564_v51, %v2559_v48 }
0x113b   : > { %v2566_v53 = vadd.f32 %v2565_v52, %v2559_v48  ;;  %v4967_v48 = vld [vmem:[%s7555_s15 + $0x208] sm:$0xff] }
0x113d   : > { %v2567_v54 = vmul.f32 0.7978846, %v2566_v53 }
0x113f   : > { %6087 = vtanh.f32 %v2567_v54 }
0x1149   : > { %v6088_v40 = vpop.eup %6087 }
0x114a   : > { %v2569_v56 = vadd.f32 1.0, %v6088_v40 }
0x114c   : > { %v2570_v57 = vmul.f32 %v2569_v56, %v2562_v55 }
0x114e   : > { %5529 = vmatmul.mubr.f32.vlgmr.msra.gmra.mrb[48].mxu0 %v2570_v57 }
0x114f   : > { %5607 = vmatprep.mubr.msk.f32.mxu0 %vm6403_vm1, %v6401_v1 }
0x1221   : > { %v2643_v5 = vpop.f32.mrb[48].mxu0 }
0x1222   : > { %v2644_v7 = vadd.f32 %v4947_v4, %v2643_v5  ;;  %v5530_v8 = vpop.f32.mrb[49].mxu0  ;;  %v4999_v4 = vld [vmem:[%s7484_s5 + $0x188] sm:$0xff]  ;;  %v4968_v5 = vld [vmem:[%s7555_s15 + $0x210] sm:$0xff] }
0x1223   : > { %v4970_v8 = vld [vmem:[%s7555_s15 + $0x220] sm:$0xff] }
0x1224   : > { %v2647_v9 = vadd.f32 %v2644_v7, %v7036_v25  ;;  %v4948_v25 = vld [vmem:[%s7493_s14] ss:$0 sm:$0xff]  ;;  %v4969_v7 = vld [vmem:[%s7555_s15 + $0x218] sm:$0xff] }
0x1226   : > { %2648 = vadd.xlane.f32.xlu0 %v2647_v9 }
0x12b3   : > { %v2649_v10 = vpop.xlane.xlu0 %2648 }
0x12b4   : > { %v2650_v11 = vmul.f32 0.03125, %v2649_v10  ;;  %v4972_v10 = vld [vmem:[%s7555_s15 + $0x230] sm:$0xff] }
0x12b6   : > { %v2651_v13 = vsub.f32 %v2647_v9, %v2650_v11  ;;  %v4971_v9 = vld [vmem:[%s7555_s15 + $0x228] sm:$0xff]  ;;  %v4973_v11 = vld [vmem:[%s7555_s15 + $0x238] sm:$0xff] }
0x12b8   : > { %v2652_v14 = vmul.f32 %v6757_v6, %v2651_v13  ;;  %v4974_v13 = vld [vmem:[%s7555_s15 + $0x240] sm:$0xff] }
0x12ba   : > { %v2653_v15 = vmul.f32 %v2652_v14, %v2652_v14 }
0x12bc   : > { %2654 = vadd.xlane.f32.xlu0 %v2653_v15  ;;  %v4976_v15 = vld [vmem:[%s7555_s15 + $0x250] sm:$0xff] }
0x12d2   : > { %2827 = vperm.xlu0 %6066, %v4998_v16   ;;  %v4977_v16 = vld [vmem:[%s7555_s15 + $0x258] sm:$0xff] }
0x1349   : > { %v2655_v20 = vpop.xlane.xlu0 %2654 }
0x134a   : > { %v2656_v21 = vmul.f32 0.03125, %v2655_v20  ;;  %v4979_v20 = vld [vmem:[%s7555_s15 + $0x268] sm:$0xff] }
0x134c   : > { %v2657_v23 = vadd.f32 1e-05, %v2656_v21  ;;  %v4980_v21 = vld [vmem:[%s7555_s15 + $0x270] sm:$0xff] }
0x134e   : > { %6089 = vrsqrt.f32 %v2657_v23  ;;  %v4981_v23 = vld [vmem:[%s7555_s15 + $0x278] sm:$0xff] }
0x1351   : > { %v2828_v50 = vpop.permute.xlu0 %2827 }
0x1358   : > { %v6090_v24 = vpop.eup %6089 }
0x1359   : > { %v2659_v26 = vmul.f32 %v6090_v24, %v2652_v14  ;;  %v4975_v14 = vld [vmem:[%s7555_s15 + $0x248] sm:$0xff]  ;;  %v4982_v24 = vld [vmem:[%s7555_s15 + $0x280] sm:$0xff] }
0x135b   : > { %v2666_v12 = vmul.f32 %v4948_v25, %v2659_v26  ;;  %v4983_v25 = vld [vmem:[%s7555_s15 + $0x288] sm:$0xff] }
0x135d   : > { %v7101_v28 = vadd.f32 %v4949_v27, %v2666_v12 }
0x135f   : > { %5531 = vmatprep.subr.mxu1 %v7101_v28 }
0x1360   : > { %5532 = vmatpush3.xpose.msra.mxu1 %v7101_v28 }
0x1361   : > { %5853 = vmatprep.subr.bf16.mxu1 %v6404_v31 }
0x1363   : > { %5534 = vmatmul.mubr.f32.vlgmr.msra.gmra.mrb[26].mxu1 %v4951_v19 }
0x1364   : > { %5536 = vmatprep.mubr.f32.mxu1 %v4952_v29 }
0x1367   : > { %5537 = vmatmul.mubr.f32.gmra.mrb[28].mxu1 %v4953_v30 }
0x1368   : > { %5539 = vmatprep.mubr.f32.mxu1 %v4954_v33 }
0x136b   : > { %5540 = vmatmul.mubr.f32.gmra.mrb[30].mxu1 %v4955_v34 }
0x136c   : > { %5542 = vmatprep.mubr.f32.mxu1 %v4956_v35 }
0x136f   : > { %5543 = vmatmul.mubr.f32.gmra.mrb[32].mxu1 %v4957_v22 }
0x1370   : > { %5545 = vmatprep.mubr.f32.mxu1 %v4958_v36 }
0x1373   : > { %5546 = vmatmul.mubr.f32.gmra.mrb[34].mxu1 %v4959_v37 }
0x1374   : > { %5548 = vmatprep.mubr.f32.mxu1 %v4960_v38 }
0x1377   : > { %5549 = vmatmul.mubr.f32.gmra.mrb[36].mxu1 %v4961_v39 }
0x1378   : > { %5551 = vmatprep.mubr.f32.mxu1 %v4962_v41 }
0x137b   : > { %5552 = vmatmul.mubr.f32.gmra.mrb[38].mxu1 %v4963_v42 }
0x137c   : > { %5554 = vmatprep.mubr.f32.mxu1 %v4964_v43 }
0x137f   : > { %5555 = vmatmul.mubr.f32.gmra.mrb[40].mxu1 %v4965_v46 }
0x1380   : > { %5557 = vmatprep.mubr.f32.mxu1 %v4966_v47 }
0x1383   : > { %5558 = vmatmul.mubr.f32.gmra.mrb[42].mxu1 %v4967_v48  ;;  %v5030_v48 = vld [vmem:[%s7484_s5 + $0x280] sm:$0xff] }
0x1384   : > { %5560 = vmatprep.mubr.f32.mxu1 %v4968_v5 }
0x1387   : > { %5561 = vmatmul.mubr.f32.gmra.mrb[44].mxu1 %v4969_v7 }
0x1388   : > { %5563 = vmatprep.mubr.f32.mxu1 %v4970_v8  ;;  %v7250_v8 = vld [vmem:[%s6896_s30] ss:$0 sm:$0xff] }
0x138b   : > { %5564 = vmatmul.mubr.f32.gmra.mrb[46].mxu1 %v4971_v9 }
0x138c   : > { %5566 = vmatprep.mubr.f32.mxu1 %v4972_v10 }
0x138f   : > { %5567 = vmatmul.mubr.f32.gmra.mrb[48].mxu1 %v4973_v11 }
0x1390   : > { %5569 = vmatprep.mubr.f32.mxu1 %v4974_v13 }
0x1393   : > { %5570 = vmatmul.mubr.f32.gmra.mrb[50].mxu1 %v4975_v14 }
0x1394   : > { %5572 = vmatprep.mubr.f32.mxu1 %v4976_v15 }
0x1397   : > { %5573 = vmatmul.mubr.f32.gmra.mrb[52].mxu1 %v4977_v16 }
0x1398   : > { %5575 = vmatprep.mubr.f32.mxu1 %v4978_v17 }
0x139b   : > { %5576 = vmatmul.mubr.f32.gmra.mrb[54].mxu1 %v4979_v20  ;;  %v5000_v20 = vld [vmem:[%s7484_s5 + $0x190] sm:$0xff] }
0x139c   : > { %5578 = vmatprep.mubr.f32.mxu1 %v4980_v21  ;;  %v5016_v21 = vld [vmem:[%s7484_s5 + $0x210] sm:$0xff] }
0x139f   : > { %5579 = vmatmul.mubr.f32.gmra.mrb[56].mxu1 %v4981_v23 }
0x13a0   : > { %5581 = vmatprep.mubr.f32.mxu1 %v4982_v24 }
0x13a3   : > { %5582 = vmatmul.mubr.f32.gmra.mrb[58].mxu1 %v4983_v25 }
0x1436   : > { %v7157_v49 = vpop.f32.mrb[26].mxu1 }
0x1437   : > { %v3095_v51 = vpop.f32.mrb[27].mxu1 }
0x1438   : > { %v3096_v52 = vadd.f32 %v3095_v51, %v2828_v50 }
0x143a   : > { %3298 = vxpose.xlu0.b32.start.end [1/1] (short) (narrow) %v3096_v52, 8  ;;  %v7159_v53 = vpop.f32.mrb[28].mxu1 }
0x143b   : > { %v7161_v54 = vpop.f32.mrb[29].mxu1 }
0x143e   : > { %v5541_v40 = vpop.f32.mrb[30].mxu1 }
0x143f   : > { %v3115_v55 = vpop.f32.mrb[31].mxu1 }
0x1442   : > { %v5544_v56 = vpop.f32.mrb[32].mxu1 }
0x1443   : > { %v3123_v57 = vpop.f32.mrb[33].mxu1 }
0x1446   : > { %v5547_v44 = vpop.f32.mrb[34].mxu1 }
0x1447   : > { %v3131_v58 = vpop.f32.mrb[35].mxu1 }
0x1448   : > { %v5015_v58 = vld [vmem:[%s7484_s5 + $0x208] sm:$0xff] }
0x144a   : > { %v5550_v59 = vpop.f32.mrb[36].mxu1 }
0x144b   : > { %v3139_v60 = vpop.f32.mrb[37].mxu1 }
0x144e   : > { %v5553_v61 = vpop.f32.mrb[38].mxu1 }
0x144f   : > { %v3147_v62 = vpop.f32.mrb[39].mxu1  ;;  %v5031_v61 = vld [vmem:[%s7484_s5 + $0x288] sm:$0xff] }
0x1452   : > { %v5556_v45 = vpop.f32.mrb[40].mxu1 }
0x1453   : > { %v3155_v63 = vpop.f32.mrb[41].mxu1 }
0x1456   : > { %v7163_v18 = vpop.f32.mrb[42].mxu1 }
0x1457   : > { %v3163_v2 = vpop.f32.mrb[43].mxu1 }
0x1458   : > { %v3164_v3 = vadd.f32 %v3163_v2, %v2896_v0 }
0x145a   : > { %5606 = vmatpush3.msra.mxu0 %v3164_v3  ;;  %v7220_v27 = vpop.f32.mrb[44].mxu1 }
0x145b   : > { %5610 = vmatprep.subr.mxu0 %v6401_v1  ;;  %v7222_v12 = vpop.f32.mrb[45].mxu1 }
0x145e   : > { %v5565_v19 = vpop.f32.mrb[46].mxu1 }
0x145f   : > { %v3183_v29 = vpop.f32.mrb[47].mxu1 }
0x1460   : > { %v2774_v29 = vld [vmem:[#allocation7 + $0x28] sm:$0xff] }
0x1462   : > { %v5568_v30 = vpop.f32.mrb[48].mxu1 }
0x1463   : > { %2832 = vperm.xlu0 %6066, %v4999_v4   ;;  %v3191_v33 = vpop.f32.mrb[49].mxu1  ;;  %v4984_v30 = vld [vmem:[%s7555_s15 + $0x290] sm:$0xff] }
0x1464   : > { %5584 = vmatprep.mubr.f32.mxu1 %v4984_v30  ;;  %v2773_v33 = vld [vmem:[#allocation7 + $0x20] sm:$0xff] }
0x1466   : > { %v5571_v34 = vpop.f32.mrb[50].mxu1 }
0x1467   : > { %v3199_v35 = vpop.f32.mrb[51].mxu1 }
0x146a   : > { %v5574_v22 = vpop.f32.mrb[52].mxu1 }
0x146b   : > { %v3207_v36 = vpop.f32.mrb[53].mxu1 }
0x146e   : > { %v5577_v37 = vpop.f32.mrb[54].mxu1 }
0x146f   : > { %v3215_v38 = vpop.f32.mrb[55].mxu1 }
0x1472   : > { %v5580_v39 = vpop.f32.mrb[56].mxu1 }
0x1473   : > { %v3223_v41 = vpop.f32.mrb[57].mxu1 }
0x1476   : > { %v5583_v50 = vpop.f32.mrb[58].mxu1 }
0x1477   : > { %v3231_v51 = vpop.f32.mrb[59].mxu1 }
0x14ba   : > { %v3314_v26 = vpop.trf.xlu0 }
0x14bb   : > { %5608 = vmatmul.mubr.msk.f32.vlgmr.msra.gmra.mrb[50].mxu0 %vm1421_vm2, %v3314_v26 }
0x14bc   : > { %5612 = vmatprep.mubr.msk.f32.mxu0 %vm6403_vm1, %v6401_v1 }
0x14e2   : > { %v2833_v59 = vpop.permute.xlu0 %2832 }
0x14e3   : > { %v3101_v60 = vadd.f32 %v7157_v49, %v2833_v59 }
0x158e   : > { %v3399_v42 = vpop.f32.mrb[50].mxu0 }
0x158f   : > { %v3400_v43 = vadd.f32 %v6899_v32, %v3399_v42  ;;  %v5609_v46 = vpop.f32.mrb[51].mxu0 }
0x1591   : > { %v3403_v47 = vsel %vm1421_vm2, %v3400_v43, -inf }
0x1592   : > { %3404 = vmax.xlane.f32.xlu1 %v3403_v47 }
0x15a3   : > { %2963 = vperm.xlu1 %6065, %v5030_v48  }
0x161f   : > { %v3405_v52 = vpop.xlane.xlu1 %3404 }
0x1620   : > { %v3406_v40 = vsub.f32 %v3400_v43, %v3405_v52  ;;  %v5001_v52 = vld [vmem:[%s7484_s5 + $0x198] sm:$0xff] }
0x1622   : > { %v3407_v55 = vmul.f32 1.442695, %v3406_v40 }
0x1623   : > { %v2964_v56 = vpop.permute.xlu1 %2963 }
0x1624   : > { %6091 = vpow2.f32 %v3407_v55  ;;  %v3232_v57 = vadd.f32 %v3231_v51, %v2964_v56  ;;  %v5017_v55 = vld [vmem:[%s7484_s5 + $0x218] sm:$0xff] }
0x1626   : > { %5611 = vmatpush3.xpose.msk.msra.mxu0 %vm1421_vm2, %v3232_v57 }
0x1627   : > { %5615 = vmatprep.subr.mxu0 %v6401_v1 }
0x162e   : > { %v6092_v32 = vpop.eup %6091 }
0x162f   : > { %v3409_v44 = vsel %vm1421_vm2, %v6092_v32, 0.0 }
0x1630   : > { %3410 = vadd.xlane.f32.xlu1 %v3409_v44 }
0x1641   : > { %2900 = vperm.xlu1 %6065, %v5015_v58  }
0x166a   : > { %3490 = vxpose.xlu1.b32.start.end [1/1] (short) (narrow) %v3101_v60, 8 }
0x1688   : > { %2968 = vperm.xlu1 %6065, %v5031_v61  }
0x16bd   : > { %v3411_v62 = vpop.xlane.xlu1 %3410 }
0x16be   : > { %6093 = vrcp.f32 %v3411_v62 }
0x16c1   : > { %v2901_v45 = vpop.permute.xlu1 %2900 }
0x16c2   : > { %v3169_v2 = vadd.f32 %v7163_v18, %v2901_v45 }
0x16c8   : > { %v6094_v63 = vpop.eup %6093 }
0x16c9   : > { %v3413_v0 = vmul.f32 %v6094_v63, %v6092_v32 }
0x16cb   : > { %5613 = vmatmul.mubr.msk.f32.vlgmr.msra.gmra.mrb[52].mxu0 %vm1421_vm2, %v3413_v0 }
0x16cc   : > { %5616 = vmatpush3.msra.mxu0 %v3169_v2  ;;  %5617 = vmatprep.mubr.msk.f32.mxu0 %vm6403_vm1, %v6401_v1  ;;  %v2775_v2 = vld [vmem:[#allocation7 + $0x30] sm:$0xff] }
0x16cd   : > { %5620 = vmatprep.subr.mxu0 %v6401_v1 }
0x16ea   : > { %v3506_v49 = vpop.trf.xlu1 }
0x16eb   : > { %5618 = vmatmul.mubr.msk.f32.vlgmr.msra.gmra.mrb[54].mxu0 %vm1421_vm2, %v3506_v49 }
0x16ec   : > { %5622 = vmatprep.mubr.msk.f32.mxu0 %vm6403_vm1, %v6401_v1 }
0x1707   : > { %v2969_v3 = vpop.permute.xlu1 %2968 }
0x1708   : > { %v3237_v4 = vadd.f32 %v5583_v50, %v2969_v3  ;;  %v5032_v50 = vld [vmem:[%s7484_s5 + $0x290] sm:$0xff] }
0x170a   : > { %5621 = vmatpush3.xpose.msk.msra.mxu0 %vm1421_vm2, %v3237_v4 }
0x170b   : > { %5625 = vmatprep.subr.mxu0 %v6401_v1 }
0x179e   : > { %v3486_v18 = vpop.f32.mrb[52].mxu0 }
0x179f   : > { %v5614_v5 = vpop.f32.mrb[53].mxu0 }
0x17be   : > { %v3591_v7 = vpop.f32.mrb[54].mxu0 }
0x17bf   : > { %v3592_v9 = vadd.f32 %v7250_v8, %v3591_v7  ;;  %v5619_v10 = vpop.f32.mrb[55].mxu0 }
0x17c1   : > { %v3595_v11 = vsel %vm1421_vm2, %v3592_v9, -inf }
0x17c2   : > { %3596 = vmax.xlane.f32.xlu0 %v3595_v11 }
0x184f   : > { %v3597_v13 = vpop.xlane.xlu0 %3596 }
0x1850   : > { %v3598_v14 = vsub.f32 %v3592_v9, %v3597_v13 }
0x1852   : > { %v3599_v15 = vmul.f32 1.442695, %v3598_v14 }
0x1854   : > { %6095 = vpow2.f32 %v3599_v15 }
0x185e   : > { %v6096_v16 = vpop.eup %6095 }
0x185f   : > { %v3601_v17 = vsel %vm1421_vm2, %v6096_v16, 0.0 }
0x1860   : > { %3602 = vadd.xlane.f32.xlu0 %v3601_v17 }
0x1876   : > { %2837 = vperm.xlu0 %6066, %v5000_v20  }
0x187a   : > { %2905 = vperm.xlu0 %6066, %v5016_v21   ;;  %v5033_v21 = vld [vmem:[%s7484_s5 + $0x298] sm:$0xff] }
0x18ed   : > { %v3603_v23 = vpop.xlane.xlu0 %3602 }
0x18ee   : > { %6097 = vrcp.f32 %v3603_v23 }
0x18f5   : > { %v2838_v24 = vpop.permute.xlu0 %2837 }
0x18f6   : > { %v3106_v25 = vadd.f32 %v7161_v54, %v2838_v24  ;;  %v4985_v54 = vld [vmem:[%s7555_s15 + $0x298] sm:$0xff] }
0x18f7   : > { %5585 = vmatmul.mubr.f32.gmra.mrb[60].mxu1 %v4985_v54  ;;  %v5069_v54 = vld [vmem:[%s7486_s7 + $0x1] ss:$0 sm:$0xff] }
0x18f8   : > { %v6098_v26 = vpop.eup %6097  ;;  %3828 = vxpose.xlu0.b32.start.end [1/1] (short) (narrow) %v3106_v25, 8 }
0x18f9   : > { %v3605_v19 = vmul.f32 %v6098_v26, %v6096_v16  ;;  %v2906_v35 = vpop.permute.xlu0 %2905 }
0x18fa   : > { %v3174_v36 = vadd.f32 %v7222_v12, %v2906_v35 }
0x18fb   : > { %5623 = vmatmul.mubr.msk.f32.vlgmr.msra.gmra.mrb[56].mxu0 %vm1421_vm2, %v3605_v19  ;;  %v2776_v19 = vld [vmem:[#allocation7 + $0x38] sm:$0xff] }
0x18fc   : > { %5626 = vmatpush3.msra.mxu0 %v2774_v29  ;;  %5627 = vmatprep.mubr.msk.f32.mxu0 %vm6403_vm1, %v6401_v1 }
0x18fd   : > { %5630 = vmatprep.subr.mxu0 %v6401_v1 }
0x1978   : > { %v3844_v37 = vpop.trf.xlu0 }
0x19ca   : > { %v5586_v51 = vpop.f32.mrb[60].mxu1 }
0x19cb   : > { %v3241_v40 = vpop.f32.mrb[61].mxu1 }
0x19ce   : > { %v3678_v34 = vpop.f32.mrb[56].mxu0 }
0x19cf   : > { %v5624_v22 = vpop.f32.mrb[57].mxu0  ;;  %5628 = vmatmul.mubr.msk.f32.vlgmr.msra.gmra.mrb[58].mxu0 %vm1421_vm2, %v3678_v34 }
0x19d0   : > { %5631 = vmatpush3.msra.mxu0 %v2773_v33  ;;  %5632 = vmatprep.mubr.msk.f32.mxu0 %vm6403_vm1, %v6401_v1 }
0x19d1   : > { %5635 = vmatprep.subr.mxu0 %v6401_v1 }
0x19d3   : > { %5633 = vmatmul.mubr.msk.f32.vlgmr.msra.gmra.mrb[60].mxu0 %vm1421_vm2, %v3486_v18 }
0x19d4   : > { %5636 = vmatpush3.msra.mxu0 %v3174_v36  ;;  %5637 = vmatprep.mubr.msk.f32.mxu0 %vm6403_vm1, %v6401_v1 }
0x19d5   : > { %5640 = vmatprep.subr.mxu0 %v6401_v1 }
0x19d7   : > { %5638 = vmatmul.mubr.msk.f32.vlgmr.msra.gmra.mrb[62].mxu0 %vm1421_vm2, %v3844_v37  ;;  %v2784_v37 = vld [vmem:[#allocation8 + $0x80] sm:$0xff] }
0x19d8   : > { %5642 = vmatprep.mubr.msk.f32.mxu0 %vm6403_vm1, %v6401_v1 }
0x1aa2   : > { %v3751_v38 = vpop.f32.mrb[58].mxu0 }
0x1aa3   : > { %v5629_v39 = vpop.f32.mrb[59].mxu0 }
0x1aa4   : > { %v2786_v39 = vld [vmem:[#allocation8 + $0x90] sm:$0xff] }
0x1aa6   : > { %v3824_v41 = vpop.f32.mrb[60].mxu0 }
0x1aa7   : > { %v3825_v42 = vadd.f32 %v3824_v41, %v3751_v38  ;;  %v5634_v43 = vpop.f32.mrb[61].mxu0  ;;  %v2785_v38 = vld [vmem:[#allocation8 + $0x88] sm:$0xff] }
0x1aa8   : > { %v5854_v41 = vpack.c.bf16 %v2785_v38, %v2784_v37 }
0x1aaa   : > { %v3929_v12 = vpop.f32.mrb[62].mxu0  ;;  %5855 = vmatpush3.bf16.msra.mxu1 %v5854_v41 }
0x1aab   : > { %v3930_v46 = vadd.f32 %v7250_v8, %v3929_v12  ;;  %v5639_v47 = vpop.f32.mrb[63].mxu0  ;;  %v2788_v12 = vld [vmem:[#allocation8 + $0xa0] sm:$0xff]  ;;  %5856 = vmatprep.subr.bf16.mxu1 %v6404_v31 }
0x1aac   : > { %v4986_v47 = vld [vmem:[%s7555_s15 + $0x2a0] sm:$0xff] }
0x1aad   : > { %v3933_v48 = vsel %vm1421_vm2, %v3930_v46, -inf  ;;  %5587 = vmatprep.mubr.f32.mxu1 %v4986_v47  ;;  %v2808_v47 = vld [vmem:[#allocation10 + $0xa8] sm:$0xff] }
0x1aae   : > { %3934 = vmax.xlane.f32.xlu1 %v3933_v48 }
0x1abf   : > { %2973 = vperm.xlu1 %6065, %v5032_v50   ;;  %v2790_v50 = vld [vmem:[#allocation8 + $0xb0] sm:$0xff] }
0x1ac3   : > { %2842 = vperm.xlu1 %6065, %v5001_v52  }
0x1ac7   : > { %2910 = vperm.xlu1 %6065, %v5017_v55   ;;  %v2793_v55 = vld [vmem:[#allocation8 + $0xc8] sm:$0xff] }
0x1b3b   : > { %v3935_v56 = vpop.xlane.xlu1 %3934 }
0x1b3c   : > { %v3936_v57 = vsub.f32 %v3930_v46, %v3935_v56  ;;  %v2789_v46 = vld [vmem:[#allocation8 + $0xa8] sm:$0xff] }
0x1b3d   : > { %v5860_v48 = vpack.c.bf16 %v2789_v46, %v2788_v12  ;;  %v2807_v46 = vld [vmem:[#allocation10 + $0xa0] sm:$0xff] }
0x1b3e   : > { %v3937_v32 = vmul.f32 1.442695, %v3936_v57  ;;  %v2794_v57 = vld [vmem:[#allocation8 + $0xd0] sm:$0xff] }
0x1b3f   : > { %v2974_v44 = vpop.permute.xlu1 %2973 }
0x1b40   : > { %6099 = vpow2.f32 %v3937_v32  ;;  %v3242_v58 = vadd.f32 %v3241_v40, %v2974_v44  ;;  %v2792_v40 = vld [vmem:[#allocation8 + $0xc0] sm:$0xff]  ;;  %v2795_v32 = vld [vmem:[#allocation8 + $0xd8] sm:$0xff] }
0x1b41   : > { %v5866_v56 = vpack.c.bf16 %v2793_v55, %v2792_v40  ;;  %v5869_v44 = vpack.c.bf16 %v2795_v32, %v2794_v57  ;;  %v2812_v40 = vld [vmem:[#allocation10 + $0xc8] sm:$0xff]  ;;  %v2814_v57 = vld [vmem:[#allocation10 + $0xd8] sm:$0xff] }
0x1b42   : > { %5641 = vmatpush3.xpose.msk.msra.mxu0 %vm1421_vm2, %v3242_v58  ;;  %v2796_v58 = vld [vmem:[#allocation8 + $0xe0] sm:$0xff] }
0x1b43   : > { %v2843_v59 = vpop.permute.xlu1 %2842  ;;  %5645 = vmatprep.subr.mxu0 %v6401_v1 }
0x1b44   : > { %v3111_v60 = vadd.f32 %v7159_v53, %v2843_v59  ;;  %v2797_v59 = vld [vmem:[#allocation8 + $0xe8] sm:$0xff] }
0x1b46   : > { %4094 = vxpose.xlu1.b32.start.end [1/1] (short) (narrow) %v3111_v60, 8  ;;  %v5872_v60 = vpack.c.bf16 %v2797_v59, %v2796_v58  ;;  %v2816_v58 = vld [vmem:[#allocation10 + $0xe8] sm:$0xff] }
0x1b47   : > { %v2911_v49 = vpop.permute.xlu1 %2910 }
0x1b48   : > { %v3179_v53 = vadd.f32 %v7220_v27, %v2911_v49  ;;  %v4989_v49 = vld [vmem:[%s7555_s15 + $0x2b8] sm:$0xff] }
0x1b4a   : > { %v6100_v61 = vpop.eup %6099 }
0x1b4b   : > { %v3939_v62 = vsel %vm1421_vm2, %v6100_v61, 0.0 }
0x1b4c   : > { %3940 = vadd.xlane.f32.xlu0 %v3939_v62 }
0x1bc6   : > { %v4110_v18 = vpop.trf.xlu1 }
0x1bd9   : > { %v3941_v45 = vpop.xlane.xlu0 %3940 }
0x1bda   : > { %6101 = vrcp.f32 %v3941_v45 }
0x1be4   : > { %v6102_v63 = vpop.eup %6101 }
0x1be5   : > { %v3943_v0 = vmul.f32 %v6102_v63, %v6100_v61 }
0x1be7   : > { %5643 = vmatmul.mubr.msk.f32.vlgmr.msra.gmra.mrb[64].mxu0 %vm1421_vm2, %v3943_v0 }
0x1be8   : > { %5646 = vmatpush3.msra.mxu0 %v2775_v2  ;;  %5647 = vmatprep.mubr.msk.f32.mxu0 %vm6403_vm1, %v6401_v1  ;;  %v4988_v2 = vld [vmem:[%s7555_s15 + $0x2b0] sm:$0xff] }
0x1be9   : > { %5650 = vmatprep.subr.mxu0 %v6401_v1 }
0x1cba   : > { %v4016_v3 = vpop.f32.mrb[64].mxu0 }
0x1cbb   : > { %v5644_v4 = vpop.f32.mrb[65].mxu0  ;;  %5648 = vmatmul.mubr.msk.f32.vlgmr.msra.gmra.mrb[66].mxu0 %vm1421_vm2, %v4016_v3  ;;  %v4991_v3 = vld [vmem:[%s7555_s15 + $0x2c8] sm:$0xff] }
0x1cbc   : > { %5651 = vmatpush3.msra.mxu0 %v3179_v53  ;;  %5652 = vmatprep.mubr.msk.f32.mxu0 %vm6403_vm1, %v6401_v1  ;;  %v4990_v53 = vld [vmem:[%s7555_s15 + $0x2c0] sm:$0xff]  ;;  %v4992_v4 = vld [vmem:[%s7555_s15 + $0x2d0] sm:$0xff] }
0x1cbd   : > { %5655 = vmatprep.subr.mxu0 %v6401_v1 }
0x1cbf   : > { %5653 = vmatmul.mubr.msk.f32.vlgmr.msra.gmra.mrb[68].mxu0 %vm1421_vm2, %v4110_v18  ;;  %v4993_v18 = vld [vmem:[%s7555_s15 + $0x2d8] sm:$0xff] }
0x1cc0   : > { %5657 = vmatprep.mubr.msk.f32.mxu0 %vm6403_vm1, %v6401_v1 }
0x1d8e   : > { %v4089_v5 = vpop.f32.mrb[66].mxu0 }
0x1d8f   : > { %v4093_v7 = vadd.f32 %v4089_v5, %v3825_v42  ;;  %v5649_v9 = vpop.f32.mrb[67].mxu0  ;;  %v2787_v42 = vld [vmem:[#allocation8 + $0x98] sm:$0xff] }
0x1d90   : > { %v5857_v43 = vpack.c.bf16 %v2787_v42, %v2786_v39  ;;  %v4994_v5 = vld [vmem:[%s7555_s15 + $0x2e0] sm:$0xff]  ;;  %v2798_v9 = vld [vmem:[#allocation8 + $0xf0] sm:$0xff] }
0x1d91   : > { %v2805_v42 = vld [vmem:[#allocation10 + $0x90] sm:$0xff] }
0x1d92   : > { %v4195_v27 = vpop.f32.mrb[68].mxu0  ;;  %5858 = vmatpush3.bf16.msra.mxu1 %v5857_v43  ;;  %v2806_v43 = vld [vmem:[#allocation10 + $0x98] sm:$0xff] }
0x1d93   : > { %v4196_v10 = vadd.f32 %v7250_v8, %v4195_v27  ;;  %v5654_v11 = vpop.f32.mrb[69].mxu0  ;;  %5859 = vmatprep.subr.bf16.mxu1 %v6404_v31  ;;  %v2799_v27 = vld [vmem:[#allocation8 + $0xf8] sm:$0xff]  ;;  %v5881_v12 = vpack.c.bf16 %v2806_v43, %v2805_v42  ;;  %v4594_v42 = vld [vmem:[#allocation11 + $0x60] sm:$0xff]  ;;  %v4595_v43 = vld [vmem:[#allocation11 + $0x68] sm:$0xff] }
0x1d94   : > { %v5875_v11 = vpack.c.bf16 %v2799_v27, %v2798_v9 }
0x1d95   : > { %v4199_v13 = vsel %vm1421_vm2, %v4196_v10, -inf }
0x1d96   : > { %4200 = vmax.xlane.f32.xlu0 %v4199_v13  ;;  %5861 = vmatpush3.bf16.msra.mxu1 %v5860_v48  ;;  %v4997_v13 = vld [vmem:[%s7555_s15 + $0x2f8] sm:$0xff] }
0x1d97   : > { %5862 = vmatprep.subr.bf16.mxu1 %v6404_v31  ;;  %v2809_v48 = vld [vmem:[#allocation10 + $0xb0] sm:$0xff] }
0x1e23   : > { %v4201_v14 = vpop.xlane.xlu0 %4200 }
0x1e24   : > { %v4202_v15 = vsub.f32 %v4196_v10, %v4201_v14  ;;  %v4996_v10 = vld [vmem:[%s7555_s15 + $0x2f0] sm:$0xff] }
0x1e26   : > { %v4203_v16 = vmul.f32 1.442695, %v4202_v15 }
0x1e28   : > { %6103 = vpow2.f32 %v4203_v16  ;;  %v2803_v16 = vld [vmem:[#allocation10 + $0x80] sm:$0xff] }
0x1e32   : > { %v6104_v17 = vpop.eup %6103 }
0x1e33   : > { %v4205_v20 = vsel %vm1421_vm2, %v6104_v17, 0.0 }
0x1e34   : > { %4206 = vadd.xlane.f32.xlu0 %v4205_v20 }
0x1e4a   : > { %2978 = vperm.xlu0 %6066, %v5033_v21  }
0x1ec1   : > { %v4207_v23 = vpop.xlane.xlu0 %4206 }
0x1ec2   : > { %6105 = vrcp.f32 %v4207_v23 }
0x1ec9   : > { %v2979_v8 = vpop.permute.xlu0 %2978 }
0x1eca   : > { %v3247_v24 = vadd.f32 %v5586_v51, %v2979_v8  ;;  %v2791_v51 = vld [vmem:[#allocation8 + $0xb8] sm:$0xff] }
0x1ecb   : > { %v5863_v52 = vpack.c.bf16 %v2791_v51, %v2790_v50  ;;  %v2810_v50 = vld [vmem:[#allocation10 + $0xb8] sm:$0xff] }
0x1ecc   : > { %v6106_v25 = vpop.eup %6105  ;;  %5656 = vmatpush3.xpose.msk.msra.mxu0 %vm1421_vm2, %v3247_v24  ;;  %v5887_v51 = vpack.c.bf16 %v2810_v50, %v2809_v48  ;;  %v4671_v48 = vld [vmem:[#allocation13 + $0x8] sm:$0xff]  ;;  %v4672_v50 = vld [vmem:[#allocation13 + $0x10] sm:$0xff] }
0x1ecd   : > { %v4209_v26 = vmul.f32 %v6106_v25, %v6104_v17  ;;  %5660 = vmatprep.subr.mxu0 %v6401_v1  ;;  %5864 = vmatpush3.bf16.msra.mxu1 %v5863_v52  ;;  %v2804_v17 = vld [vmem:[#allocation10 + $0x88] sm:$0xff]  ;;  %v5070_v25 = vld [vmem:[%s7487_s8 + $0x1] ss:$0 sm:$0xff]  ;;  %v2811_v52 = vld [vmem:[#allocation10 + $0xc0] sm:$0xff] }
0x1ece   : > { %5865 = vmatprep.subr.bf16.mxu1 %v6404_v31  ;;  %v5878_v20 = vpack.c.bf16 %v2804_v17, %v2803_v16  ;;  %v5890_v55 = vpack.c.bf16 %v2812_v40, %v2811_v52  ;;  %v4582_v16 = vld [vmem:[#allocation11] sm:$0xff]  ;;  %v4583_v17 = vld [vmem:[#allocation11 + $0x8] sm:$0xff]  ;;  %v4673_v52 = vld [vmem:[#allocation13 + $0x18] sm:$0xff] }
0x1ecf   : > { %5658 = vmatmul.mubr.msk.f32.vlgmr.msra.gmra.mrb[70].mxu0 %vm1421_vm2, %v4209_v26  ;;  %v5929_v40 = vpack.c.bf16 %v4673_v52, %v4672_v50 }
0x1ed0   : > { %5661 = vmatpush3.msra.mxu0 %v2776_v19  ;;  %5662 = vmatprep.mubr.msk.f32.mxu0 %vm6403_vm1, %v6401_v1  ;;  %v5071_v19 = vld [vmem:[%s7488_s9 + $0x1] ss:$0 sm:$0xff] }
0x1ed1   : > { %5877 = vmatprep.subr.bf16.mxu0 %v6404_v31  ;;  %5867 = vmatpush3.bf16.msra.mxu1 %v5866_v56  ;;  %v2813_v56 = vld [vmem:[#allocation10 + $0xd0] sm:$0xff] }
0x1ed2   : > { %5868 = vmatprep.subr.bf16.mxu1 %v6404_v31  ;;  %v5893_v32 = vpack.c.bf16 %v2814_v57, %v2813_v56  ;;  %v4675_v56 = vld [vmem:[#allocation13 + $0x28] sm:$0xff] }
0x1ed5   : > { %5870 = vmatpush3.bf16.msra.mxu1 %v5869_v44  ;;  %v2815_v44 = vld [vmem:[#allocation10 + $0xe0] sm:$0xff] }
0x1ed6   : > { %5871 = vmatprep.subr.bf16.mxu1 %v6404_v31  ;;  %v5896_v59 = vpack.c.bf16 %v2816_v58, %v2815_v44  ;;  %v4677_v44 = vld [vmem:[#allocation13 + $0x38] sm:$0xff] }
0x1ed9   : > { %5873 = vmatpush3.bf16.msra.mxu1 %v5872_v60  ;;  %v2817_v60 = vld [vmem:[#allocation10 + $0xf0] sm:$0xff] }
0x1eda   : > { %5874 = vmatprep.subr.bf16.mxu1 %v6404_v31 }
0x1edd   : > { %5876 = vmatpush3.bf16.msra.mxu1 %v5875_v11 }
0x1ede   : > { %5901 = vmatprep.subr.bf16.mxu1 %v6404_v31 }
0x1fa2   : > { %v4282_v29 = vpop.f32.mrb[70].mxu0 }
0x1fa3   : > { %v5659_v30 = vpop.f32.mrb[71].mxu0  ;;  %5663 = vmatmul.mubr.msk.f32.vlgmr.msra.gmra.mrb[72].mxu0 %vm1421_vm2, %v4282_v29 }
0x1fa4   : > { %5732 = vmatprep.mubr.msk.f32.mxu0 %vm6403_vm1, %v6401_v1  ;;  %5879 = vmatpush3.bf16.msra.mxu0 %v5878_v20  ;;  %v4584_v20 = vld [vmem:[#allocation11 + $0x10] sm:$0xff] }
0x1fa5   : > { %5880 = vmatprep.subr.bf16.mxu0 %v6404_v31 }
0x1fa8   : > { %5882 = vmatpush3.bf16.msra.mxu0 %v5881_v12  ;;  %v4596_v12 = vld [vmem:[#allocation11 + $0x70] sm:$0xff] }
0x1fa9   : > { %5883 = vmatprep.subr.bf16.mxu0 %v6404_v31 }
0x2076   : > { %v4355_v33 = vpop.f32.mrb[72].mxu0 }
0x2077   : > { %v4359_v34 = vadd.f32 %v4355_v33, %v4093_v7  ;;  %v5664_v35 = vpop.f32.mrb[73].mxu0  ;;  %v4995_v7 = vld [vmem:[%s7555_s15 + $0x2e8] sm:$0xff] }
0x2079   : > { %v4366_v22 = vadd.f32 %v5069_v54, %v4359_v34 }
0x207b   : > { %v4367_v36 = vadd.f32 %v4366_v22, %v7101_v28  ;;  %v4987_v28 = vld [vmem:[%s7555_s15 + $0x2a8] sm:$0xff] }
0x207c   : > { %5588 = vmatmul.mubr.f32.gmra.mrb[62].mxu1 %v4987_v28  ;;  %v5884_v28 = vpack.c.bf16 %v2808_v47, %v2807_v46  ;;  %v4597_v46 = vld [vmem:[#allocation11 + $0x78] sm:$0xff] }
0x207d   : > { %4368 = vadd.xlane.f32.xlu1 %v4367_v36  ;;  %5590 = vmatprep.mubr.f32.mxu1 %v4988_v2  ;;  %v5923_v47 = vpack.c.bf16 %v4597_v46, %v4596_v12 }
0x207e   : > { %5885 = vmatpush3.bf16.msra.mxu0 %v5884_v28  ;;  %v4670_v28 = vld [vmem:[#allocation13] sm:$0xff] }
0x207f   : > { %5886 = vmatprep.subr.bf16.mxu0 %v6404_v31 }
0x2080   : > { %5591 = vmatmul.mubr.f32.gmra.mrb[64].mxu1 %v4989_v49 }
0x2081   : > { %5593 = vmatprep.mubr.f32.mxu1 %v4990_v53 }
0x2082   : > { %5888 = vmatpush3.bf16.msra.mxu0 %v5887_v51  ;;  %v5926_v51 = vpack.c.bf16 %v4671_v48, %v4670_v28 }
0x2083   : > { %5889 = vmatprep.subr.bf16.mxu0 %v6404_v31 }
0x2084   : > { %5594 = vmatmul.mubr.f32.gmra.mrb[66].mxu1 %v4991_v3 }
0x2085   : > { %5596 = vmatprep.mubr.f32.mxu1 %v4992_v4 }
0x2086   : > { %5891 = vmatpush3.bf16.msra.mxu0 %v5890_v55  ;;  %v4674_v55 = vld [vmem:[#allocation13 + $0x20] sm:$0xff] }
0x2087   : > { %5892 = vmatprep.subr.bf16.mxu0 %v6404_v31  ;;  %v5932_v57 = vpack.c.bf16 %v4675_v56, %v4674_v55 }
0x2088   : > { %5597 = vmatmul.mubr.f32.gmra.mrb[68].mxu1 %v4993_v18 }
0x2089   : > { %5599 = vmatprep.mubr.f32.mxu1 %v4994_v5 }
0x208a   : > { %5894 = vmatpush3.bf16.msra.mxu0 %v5893_v32  ;;  %v4676_v32 = vld [vmem:[#allocation13 + $0x30] sm:$0xff] }
0x208b   : > { %5895 = vmatprep.subr.bf16.mxu0 %v6404_v31  ;;  %v5935_v58 = vpack.c.bf16 %v4677_v44, %v4676_v32 }
0x208c   : > { %5600 = vmatmul.mubr.f32.gmra.mrb[70].mxu1 %v4995_v7 }
0x208d   : > { %5602 = vmatprep.mubr.f32.mxu1 %v4996_v10  ;;  %v5073_v10 = vld [vmem:[%s7492_s13 + $0x1] ss:$0 sm:$0xff] }
0x208e   : > { %5897 = vmatpush3.bf16.msra.mxu0 %v5896_v59  ;;  %v4678_v59 = vld [vmem:[#allocation13 + $0x40] sm:$0xff] }
0x208f   : > { %5898 = vmatprep.subr.bf16.mxu0 %v6404_v31 }
0x2090   : > { %5603 = vmatmul.mubr.f32.gmra.mrb[72].mxu1 %v4997_v13 }
0x2091   : > { %5697 = vmatprep.mubr.msk.f32.mxu1 %vm6403_vm1, %v6401_v1 }
0x210a   : > { %v4369_v61 = vpop.xlane.xlu1 %4368 }
0x210b   : > { %v4370_v62 = vmul.f32 0.03125, %v4369_v61  ;;  %v2818_v61 = vld [vmem:[#allocation10 + $0xf8] sm:$0xff] }
0x210d   : > { %v4371_v45 = vsub.f32 %v4367_v36, %v4370_v62  ;;  %v5899_v62 = vpack.c.bf16 %v2818_v61, %v2817_v60  ;;  %v4679_v60 = vld [vmem:[#allocation13 + $0x48] sm:$0xff] }
0x210e   : > { %v5938_v61 = vpack.c.bf16 %v4679_v60, %v4678_v59 }
0x210f   : > { %v4372_v63 = vmul.f32 %v6757_v6, %v4371_v45  ;;  %5900 = vmatpush3.bf16.msra.mxu0 %v5899_v62  ;;  %v5072_v45 = vld [vmem:[%s7490_s11 + $0x1] ss:$0 sm:$0xff] }
0x2110   : > { %5925 = vmatprep.subr.bf16.mxu0 %v6404_v31 }
0x2111   : > { %v4373_v0 = vmul.f32 %v4372_v63, %v4372_v63 }
0x2113   : > { %4374 = vadd.xlane.f32.xlu0 %v4373_v0 }
0x214f   : > { %v5589_v14 = vpop.f32.mrb[62].mxu1 }
0x2150   : > { %v3251_v15 = vpop.f32.mrb[63].mxu1 }
0x2153   : > { %v5592_v54 = vpop.f32.mrb[64].mxu1 }
0x2154   : > { %v3259_v33 = vpop.f32.mrb[65].mxu1 }
0x2155   : > { %v4588_v33 = vld [vmem:[#allocation11 + $0x30] sm:$0xff] }
0x2157   : > { %v5595_v34 = vpop.f32.mrb[66].mxu1 }
0x2158   : > { %v3267_v35 = vpop.f32.mrb[67].mxu1  ;;  %v4589_v34 = vld [vmem:[#allocation11 + $0x38] sm:$0xff] }
0x2159   : > { %v5911_v35 = vpack.c.bf16 %v4589_v34, %v4588_v33 }
0x215b   : > { %v5598_v22 = vpop.f32.mrb[68].mxu1 }
0x215c   : > { %v3275_v36 = vpop.f32.mrb[69].mxu1  ;;  %v4590_v22 = vld [vmem:[#allocation11 + $0x40] sm:$0xff] }
0x215d   : > { %v4591_v36 = vld [vmem:[#allocation11 + $0x48] sm:$0xff] }
0x215f   : > { %v5601_v37 = vpop.f32.mrb[70].mxu1 }
0x2160   : > { %v3283_v38 = vpop.f32.mrb[71].mxu1  ;;  %v4592_v37 = vld [vmem:[#allocation11 + $0x50] sm:$0xff] }
0x2161   : > { %v5914_v38 = vpack.c.bf16 %v4591_v36, %v4590_v22 }
0x2163   : > { %v5604_v39 = vpop.f32.mrb[72].mxu1 }
0x2164   : > { %v3291_v41 = vpop.f32.mrb[73].mxu1  ;;  %v4593_v39 = vld [vmem:[#allocation11 + $0x58] sm:$0xff] }
0x2165   : > { %v5917_v41 = vpack.c.bf16 %v4593_v39, %v4592_v37 }
0x21a0   : > { %v4375_v21 = vpop.xlane.xlu0 %4374 }
0x21a1   : > { %v4376_v23 = vmul.f32 0.03125, %v4375_v21  ;;  %v5902_v21 = vpack.c.bf16 %v4583_v17, %v4582_v16 }
0x21a3   : > { %v4377_v8 = vadd.f32 1e-05, %v4376_v23  ;;  %v4585_v23 = vld [vmem:[#allocation11 + $0x18] sm:$0xff] }
0x21a5   : > { %6107 = vrsqrt.f32 %v4377_v8  ;;  %v5905_v8 = vpack.c.bf16 %v4585_v23, %v4584_v20  ;;  %v4686_v23 = vld [vmem:[%s7561_s17] sm:$0x1] }
0x21af   : > { %v6108_v24 = vpop.eup %6107 }
0x21b0   : > { %v4379_v26 = vmul.f32 %v6108_v24, %v4372_v63  ;;  %v4587_v24 = vld [vmem:[#allocation11 + $0x28] sm:$0xff] }
0x21b2   : > { %v4386_v29 = vmul.f32 %v5070_v25, %v4379_v26 }
0x21b4   : > { %v7384_v30 = vadd.f32 %v5071_v19, %v4386_v29 }
0x21b6   : > { %5698 = vmatmul.mubr.f32.vlgmr.msra.gmra.mrb[74].mxu1 %v7384_v30 }
0x21b7   : > { %5767 = vmatprep.mubr.msk.f32.mxu1 %vm6403_vm1, %v6401_v1  ;;  %5903 = vmatpush3.bf16.msra.mxu1 %v5902_v21 }
0x21b8   : > { %5904 = vmatprep.subr.bf16.mxu1 %v6404_v31 }
0x21bb   : > { %5906 = vmatpush3.bf16.msra.mxu1 %v5905_v8 }
0x21bc   : > { %5907 = vmatprep.subr.bf16.mxu1 %v6404_v31 }
0x2289   : > { %v4466_v63 = vpop.f32.mrb[74].mxu1 }
0x228a   : > { %v4467_v0 = vadd.f32 %v5072_v45, %v4466_v63  ;;  %v5699_v2 = vpop.f32.mrb[75].mxu1 }
0x228b   : > { %v5074_v2 = vld [vmem:[%s7493_s14 + $0x1] ss:$0 sm:$0xff] }
0x228c   : > { %v4471_v49 = vmul.f32 0.044715, %v4467_v0  ;;  %v4470_v7 = vmul.f32 0.5, %v4467_v0 }
0x228e   : > { %v4472_v53 = vmul.f32 %v4471_v49, %v4467_v0 }
0x2290   : > { %v4473_v3 = vmul.f32 %v4472_v53, %v4467_v0  ;;  %v5075_v53 = vld [vmem:[%s7557_s4 + $0x1] ss:$0 sm:$0xff] }
0x2292   : > { %v4474_v4 = vadd.f32 %v4473_v3, %v4467_v0 }
0x2294   : > { %v4475_v18 = vmul.f32 0.7978846, %v4474_v4 }
0x2296   : > { %6109 = vtanh.f32 %v4475_v18  ;;  %v4680_v18 = vld [vmem:[#allocation13 + $0x50] sm:$0xff] }
0x22a0   : > { %v6110_v5 = vpop.eup %6109 }
0x22a1   : > { %v4477_v9 = vadd.f32 1.0, %v6110_v5  ;;  %v4681_v5 = vld [vmem:[#allocation13 + $0x58] sm:$0xff] }
0x22a3   : > { %v4478_v27 = vmul.f32 %v4477_v9, %v4470_v7  ;;  %v5941_v7 = vpack.c.bf16 %v4681_v5, %v4680_v18  ;;  %v4682_v9 = vld [vmem:[#allocation13 + $0x60] sm:$0xff] }
0x22a5   : > { %5733 = vmatmul.mubr.f32.vlgmr.msra.gmra.mrb[74].mxu0 %v4478_v27  ;;  %v4683_v27 = vld [vmem:[#allocation13 + $0x68] sm:$0xff] }
0x22a6   : > { %5802 = vmatprep.mubr.msk.f32.mxu0 %vm6403_vm1, %v6401_v1  ;;  %v4586_v1 = vld [vmem:[#allocation11 + $0x20] sm:$0xff]  ;;  %5927 = vmatpush3.bf16.msra.mxu0 %v5926_v51 }
0x22a7   : > { %v5908_v25 = vpack.c.bf16 %v4587_v24, %v4586_v1  ;;  %5928 = vmatprep.subr.bf16.mxu0 %v6404_v31 }
0x22a9   : > { %5909 = vmatpush3.bf16.msra.mxu1 %v5908_v25 }
0x22aa   : > { %5910 = vmatprep.subr.bf16.mxu1 %v6404_v31  ;;  %5930 = vmatpush3.bf16.msra.mxu0 %v5929_v40 }
0x22ab   : > { %5931 = vmatprep.subr.bf16.mxu0 %v6404_v31 }
0x22ad   : > { %5912 = vmatpush3.bf16.msra.mxu1 %v5911_v35 }
0x22ae   : > { %5913 = vmatprep.subr.bf16.mxu1 %v6404_v31  ;;  %5933 = vmatpush3.bf16.msra.mxu0 %v5932_v57 }
0x22af   : > { %5934 = vmatprep.subr.bf16.mxu0 %v6404_v31 }
0x22b1   : > { %5915 = vmatpush3.bf16.msra.mxu1 %v5914_v38 }
0x22b2   : > { %5916 = vmatprep.subr.bf16.mxu1 %v6404_v31  ;;  %5936 = vmatpush3.bf16.msra.mxu0 %v5935_v58 }
0x22b3   : > { %5937 = vmatprep.subr.bf16.mxu0 %v6404_v31 }
0x22b5   : > { %5918 = vmatpush3.bf16.msra.mxu1 %v5917_v41 }
0x22b6   : > { %5919 = vmatprep.subr.bf16.mxu1 %v6404_v31  ;;  %5939 = vmatpush3.bf16.msra.mxu0 %v5938_v61 }
0x22b7   : > { %5940 = vmatprep.subr.bf16.mxu0 %v6404_v31 }
0x22ba   : > { %5942 = vmatpush3.bf16.msra.mxu0 %v5941_v7 }
0x22bb   : > { %5943 = vmatprep.subr.bf16.mxu0 %v6404_v31 }
0x2378   : > { %v4551_v11 = vpop.f32.mrb[74].mxu0 }
0x2379   : > { %v4552_v13 = vadd.f32 %v5073_v10, %v4551_v11  ;;  %v5734_v14 = vpop.f32.mrb[75].mxu0  ;;  %v5944_v10 = vpack.c.bf16 %v4683_v27, %v4682_v9  ;;  %v4684_v11 = vld [vmem:[#allocation13 + $0x70] sm:$0xff] }
0x237b   : > { %v4555_v15 = vadd.f32 %v4552_v13, %v7384_v30  ;;  %v4685_v13 = vld [vmem:[#allocation13 + $0x78] sm:$0xff]  ;;  %5945 = vmatpush3.bf16.msra.mxu0 %v5944_v10 }
0x237c   : > { %v5947_v14 = vpack.c.bf16 %v4685_v13, %v4684_v11  ;;  %5946 = vmatprep.subr.bf16.mxu0 %v6404_v31 }
0x237d   : > { %4556 = vadd.xlane.f32.xlu0 %v4555_v15 }
0x237f   : > { %5948 = vmatpush3.bf16.msra.mxu0 %v5947_v14 }
0x240a   : > { %v4557_v26 = vpop.xlane.xlu0 %4556 }
0x240b   : > { %v4558_v19 = vmul.f32 0.03125, %v4557_v26 }
0x240d   : > { %v4559_v29 = vsub.f32 %v4555_v15, %v4558_v19  ;;  %v4598_v15 = vld [vmem:[%s7559_s23] sm:$0x1]  ;;  %s6318_s23 = scalar_lea.vmem %s6317_s20, 32 }
0x240e   : > { %p6320_p0 = scmp.lt.s32.totalorder %s6318_s23, %s6312_s3 }
0x240f   : > { %v4560_v30 = vmul.f32 %v6757_v6, %v4559_v29  ;;  %v5920_v6 = vpack.c.bf16 %v4595_v43, %v4594_v42 }
0x2410   : > { %p6321_p1 = por %p6320_p0, %p6319_p13 }
0x2411   : > { %v4561_v54 = vmul.f32 %v4560_v30, %v4560_v30  ;;  %5921 = vmatpush3.bf16.msra.mxu1 %v5920_v6 }
0x2412   : > { %5922 = vmatprep.subr.bf16.mxu1 %v6404_v31  ;;  %p6322_p6 = pnand %p6321_p1, %p6315_p11 }
0x2413   : > { %4562 = vadd.xlane.f32.xlu0 %v4561_v54 }
0x2415   : > { %5924 = vmatpush3.bf16.msra.mxu1 %v5923_v47 }
0x24a0   : > { %v4563_v62 = vpop.xlane.xlu0 %4562 }
0x24a1   : > { %v4564_v45 = vmul.f32 0.03125, %v4563_v62 }
0x24a3   : > { %v4565_v63 = vadd.f32 1e-05, %v4564_v45 }
0x24a5   : > { %6111 = vrsqrt.f32 %v4565_v63 }
0x24af   : > { %v6112_v0 = vpop.eup %6111 }
0x24b0   : > { %v4567_v49 = vmul.f32 %v6112_v0, %v4560_v30 }
0x24b2   : > { %v4574_v3 = vmul.f32 %v5074_v2, %v4567_v49 }
0x24b4   : > { %v4581_v4 = vadd.f32 %v5075_v53, %v4574_v3 }
0x24b6   : > { %5768 = vmatmul.mubr.f32.vlgmr.msra.gmra.mrb[76].mxu1 %v4581_v4 }
0x2589   : > { %v4665_v16 = vpop.f32.mrb[76].mxu1 }
0x258a   : > { %v4666_v17 = vadd.f32 %v4665_v16, %v4598_v15  ;;  %v5769_v20 = vpop.f32.mrb[77].mxu1 }
0x258c   : > { %6113 = vtanh.f32 %v4666_v17 }
0x2596   : > { %v6114_v21 = vpop.eup %6113 }
0x2597   : > { %5803 = vmatmul.mubr.f32.vlgmr.msra.gmra.mrb[76].mxu0 %v6114_v21 }
0x266a   : > { %v4753_v31 = vpop.f32.mrb[76].mxu0 }
0x266b   : > { %v4754_v8 = vadd.f32 %v4753_v31, %v4686_v23  ;;  %v5804_v1 = vpop.f32.mrb[77].mxu0 }
0x266d   : > { %4757 = vst [vmem:[%s728_s29] sm:$0x1] %v4754_v8 }
0x266e   : > { %6325 = shalt.err (!%p6322_p6)
}
0x266f   : > { %s6326_s22 = scalar_lea.hbm %s7437_s1, 16  ;;  %s6330_s17 = scalar_lea.hbm %s7562_s26, 32 }
0x2670   : > { %p6327_p5 = scmp.ne.s32.totalorder %s7437_s1, %s6326_s22  ;;  %p6331_p10 = scmp.lt.u32.totalorder %s7437_s1, %s7562_s26 }
0x2671   : > { %p6332_p2 = scmp.lt.u32.totalorder %s6330_s17, %s6326_s22  ;;  %p6334_p4 = scmp.lt.u32.totalorder %s6326_s22, %s7437_s1 }
0x2672   : > { %p6328_p9 = pnand %p6327_p5, %p7563_p7 }
0x2673   : > { %p6333_p3 = por %p6332_p2, %p6331_p10 }
0x2674   : > { %p6329_p12 = pneg %p6328_p9 }
0x2675   : > { %p6335_p8 = por %p6334_p4, %p6333_p3 }
0x2677   : > { %p6336_p11 = pnand %p6335_p8, %p6329_p12 }
0x2679   : > { %6339 = shalt.err (!%p6336_p11)
}
0x267a   : > { %5977 = dma.vmem_to_hbm [thread:$0]  (%p7563_p7), %s7439_s27, 16, %s7437_s1, %s4759_s19  }
0x267b PF: > { %s7564_s30 = sld [smem:[#allocation23_spill]]  ;;  %s7565_s10 = sld [smem:[#allocation20_spill]] }
0x267c   : > { %s7566_s3 = sld [smem:[#allocation27_spill]] }
0x2681   : > { %p6019_p13 = scmp.ge.s32.totalorder %s7564_s30, 2  ;;  %s4783_s2 = sand.u32 1, %s7565_s10  }
0x2682   : > { %p7567_p0 = scmp.ne.s32.totalorder %s7566_s3, 0  ;;  %s4784_s20 = scalar_lea.sflag [#allocation4], %s4783_s2 }
0x2684   : > { %p6002_p1 = pnand %p6019_p13, %p7567_p0 }
0x2686   : > { %6373 = dma.done.wait (!%p6002_p1), %s4784_s20, 16  }
0x2687   : > { %6375 = vsyncadd (!%p6002_p1), %s4784_s20, 4294967280  ;;  %s7568_s24 = sld [smem:[#allocation24_spill]]  ;;  %s7569_s1 = sld [smem:[#allocation21_spill]] }
0x2688   : > { %s7570_s22 = sld [smem:[#allocation22_spill]]  ;;  %s7571_s23 = sld [smem:[#allocation25_spill]] }
0x268d   : > { %p34_p6 = scmp.ge.s32.totalorder %s7568_s24, 4  }
0x268f   :  { %36 = sbr.rel (!%p34_p6) target bundleno = 18 (0x12), region = 179 }
0x2696   :  { %4788 = vsyncpa [#allocation3], 1 }
0x2697   :  { %4790 = vsyncpa [#allocation3 + $0x1], 1 }
0x2698   :  { %4791 = vsyncpa [#allocation6], 1 }
0x2699   :  { %4792 = vsyncpa [#allocation9], 1 }
0x269a   :  { %4793 = vsyncpa [#allocation12], 1 }
0x269b   :  { %4794 = vsyncpa [#allocation4], 1 }
0x269c   :  { %4796 = vsyncpa [#allocation4 + $0x1], 1 }

</bundles_post_ra>
